<compile_context>
chip_gen: v7x
topology: tpu7x:2x2x1
jax: 0.10.0
libtpu: 0.0.40
codegen_flags: <defaults>
</compile_context>

<pallas_src>
import math
import functools

import jax
import jax.numpy as jnp
from jax import lax
from jax.experimental import pallas as pl
from jax.experimental.pallas import tpu as pltpu


FFN_HIDDEN_CHUNK = 512  # columns of W1 / rows of W2 processed per accumulation step


# ----------------------------------------------------------------------------
# Kernel: one full encoder layer (self-attention + FFN, post-LayerNorm).
# Grid is over batch tiles; each grid step processes TB sequences so the QKV /
# output / FFN matmuls see M = TB*S rows.
# ----------------------------------------------------------------------------
def encoder_layer_kernel(*refs, n_heads, add_pos, embed_scale):
    if add_pos:
        (x_ref, mask_ref, pos_ref,
         wqkv_ref, bqkv_ref, wo_ref, bo_ref,
         ln1g_ref, ln1b_ref, w1_ref, b1_ref, w2_ref, b2_ref, ln2g_ref, ln2b_ref,
         o_ref) = refs
    else:
        (x_ref, mask_ref,
         wqkv_ref, bqkv_ref, wo_ref, bo_ref,
         ln1g_ref, ln1b_ref, w1_ref, b1_ref, w2_ref, b2_ref, ln2g_ref, ln2b_ref,
         o_ref) = refs
        pos_ref = None

    TB, S, D = x_ref.shape
    dh = D // n_heads
    inv_sqrt_dh = 1.0 / math.sqrt(dh)

    # Residual base in f32; embedding scale + positional encoding fused into layer 0.
    xf = x_ref[...].astype(jnp.float32)                          # (TB, S, D)
    if pos_ref is not None:
        xf = xf * embed_scale + pos_ref[...]                     # pos broadcasts over batch
    x2 = xf.reshape(TB * S, D).astype(jnp.bfloat16)              # batch fused into MXU M dim

    # ---- fused QKV projection: one bf16 MXU matmul with N = 3D, f32 accumulation ----
    qkv = jnp.dot(x2, wqkv_ref[...], preferred_element_type=jnp.float32) + bqkv_ref[...]
    qkv3 = qkv.reshape(TB, S, 3 * D).astype(jnp.bfloat16)        # [Q | K | V] along lanes

    # Additive key-padding mask in f32, hoisted out of the head loop.
    neg = (1.0 - mask_ref[...].astype(jnp.float32)) * -1e9       # (TB, 1, S)

    # ---- per-head scaled dot-product attention, output projection accumulated per head ----
    attn = jnp.zeros((TB * S, D), jnp.float32)
    for h in range(n_heads):
        q0 = h * dh
        qh = qkv3[:, :, q0:q0 + dh]
        kh = qkv3[:, :, D + q0:D + q0 + dh]
        vh = qkv3[:, :, 2 * D + q0:2 * D + q0 + dh]
        # Contract the stored last dim of both operands (no explicit K transpose).
        sc = jnp.einsum('bqd,bkd->bqk', qh, kh,
                        preferred_element_type=jnp.float32) * inv_sqrt_dh
        sc = sc + neg                                            # broadcast over query rows
        sc = sc - jnp.max(sc, axis=-1, keepdims=True)
        p = jnp.exp(sc)
        p = p * pl.reciprocal(jnp.sum(p, axis=-1, keepdims=True), approx=False)
        oh = jnp.einsum('bqk,bkd->bqd', p.astype(jnp.bfloat16), vh,
                        preferred_element_type=jnp.float32)      # (TB, S, dh)
        # Accumulate directly into the output projection (wo row-slice is a cheap
        # sublane ref slice) -> no per-head lane-masked stores, no scratch.
        attn = attn + jnp.dot(oh.reshape(TB * S, dh).astype(jnp.bfloat16),
                              wo_ref[q0:q0 + dh, :],
                              preferred_element_type=jnp.float32)
    attn = attn + bo_ref[...]

    # ---- residual + LayerNorm 1 (f32) ----
    h1 = xf.reshape(TB * S, D) + attn
    mu1 = jnp.mean(h1, axis=-1, keepdims=True)
    var1 = jnp.mean((h1 - mu1) ** 2, axis=-1, keepdims=True)
    h1n = (h1 - mu1) * lax.rsqrt(var1 + 1e-5) * ln1g_ref[...] + ln1b_ref[...]

    # ---- position-wise FFN (Linear -> ReLU -> Linear), hidden dim chunked ----
    h1n_bf = h1n.astype(jnp.bfloat16)
    Hd = w1_ref.shape[1]
    ff = jnp.zeros((TB * S, D), jnp.float32)
    c0 = 0
    while c0 < Hd:
        c1 = min(c0 + FFN_HIDDEN_CHUNK, Hd)
        hc = (jnp.dot(h1n_bf, w1_ref[:, c0:c1], preferred_element_type=jnp.float32)
              + b1_ref[:, c0:c1])
        hc = jnp.maximum(hc, 0.0).astype(jnp.bfloat16)
        ff = ff + jnp.dot(hc, w2_ref[c0:c1, :], preferred_element_type=jnp.float32)
        c0 = c1
    ff = ff + b2_ref[...]

    # ---- residual + LayerNorm 2 (f32) ----
    h2 = h1n + ff
    mu2 = jnp.mean(h2, axis=-1, keepdims=True)
    var2 = jnp.mean((h2 - mu2) ** 2, axis=-1, keepdims=True)
    out = (h2 - mu2) * lax.rsqrt(var2 + 1e-5) * ln2g_ref[...] + ln2b_ref[...]

    o_ref[...] = out.reshape(TB, S, D).astype(o_ref.dtype)


# ----------------------------------------------------------------------------
# Wrappers (pallas_call plumbing)
# ----------------------------------------------------------------------------
WEIGHT_ORDER = ("wqkv", "bqkv", "wo", "bo",
                "ln1_g", "ln1_b", "w1", "b1", "w2", "b2", "ln2_g", "ln2_b")

# Fallback ladder: (single_buffer_weights, set_vmem_limit).  First working config is cached.
_LAYER_CONFIGS = ((True, True), (False, True), (False, False))
_LAYER_CONFIG_IDX = {"idx": None}


@functools.lru_cache(maxsize=1)
def _vmem_limit_bytes():
    """Per-chip VMEM budget: leave ~16 MiB headroom on v7x (64 MiB), ~100 MiB on v5e/v6e."""
    mib = 1024 * 1024
    try:
        cap = int(pltpu.get_tpu_info().vmem_capacity_bytes)
    except Exception:
        return 48 * mib                       # conservative default, safe on every chip
    return int(min(100 * mib, max(32 * mib, cap - 16 * mib)))


def _pick_batch_tile(B, S, target_rows=512):
    # Fuse enough sequences per grid step to fill the MXU M dimension (~512 rows on
    # v6e/v7x's 256-wide MXU), but keep >= 2 grid steps so v7x's 2 TensorCores both work.
    tb = max(1, min(B, max(1, target_rows // max(S, 1))))
    tb = min(tb, max(1, B // 2))
    while B % tb:
        tb -= 1
    return tb


def run_encoder_layer(x, mask, lp, n_heads, *, pos=None, embed_scale=1.0,
                      out_dtype=jnp.bfloat16):
    B, S, D = x.shape
    TB = _pick_batch_tile(B, S)
    add_pos = pos is not None

    kern = functools.partial(encoder_layer_kernel, n_heads=n_heads,
                             add_pos=add_pos, embed_scale=embed_scale)

    weights = [lp[name] for name in WEIGHT_ORDER]
    inputs = [x, mask] + ([pos] if add_pos else []) + weights

    def build(single_buffer, set_vmem):
        def w_spec(arr):
            nd = arr.ndim
            imap = lambda b, _nd=nd: (0,) * _nd          # grid-invariant weight block
            if single_buffer:
                # Nothing to pipeline for constant blocks: single-buffer to halve residency.
                return pl.BlockSpec(arr.shape, imap, pipeline_mode=pl.Buffered(1))
            return pl.BlockSpec(arr.shape, imap)

        in_specs = [pl.BlockSpec((TB, S, D), lambda b: (b, 0, 0)),   # activations
                    pl.BlockSpec((TB, 1, S), lambda b: (b, 0, 0))]   # key-padding mask
        if add_pos:
            in_specs.append(pl.BlockSpec((S, D), lambda b: (0, 0)))  # positional encoding
        in_specs += [w_spec(w) for w in weights]

        if set_vmem:
            cp = pltpu.CompilerParams(dimension_semantics=("parallel",),
                                      vmem_limit_bytes=_vmem_limit_bytes())
        else:
            cp = pltpu.CompilerParams(dimension_semantics=("parallel",))

        return pl.pallas_call(
            kern,
            out_shape=jax.ShapeDtypeStruct((B, S, D), out_dtype),
            grid=(B // TB,),
            in_specs=in_specs,
            out_specs=pl.BlockSpec((TB, S, D), lambda b: (b, 0, 0)),
            compiler_params=cp,
        )(*inputs)

    idx = _LAYER_CONFIG_IDX["idx"]
    if idx is not None:
        return build(*_LAYER_CONFIGS[idx])

    last_err = None
    for i, cfg in enumerate(_LAYER_CONFIGS):
        try:
            out = build(*cfg)
            _LAYER_CONFIG_IDX["idx"] = i
            return out
        except Exception as e:                           # e.g. pl.Buffered(1) unsupported
            last_err = e
    raise last_err


def encoder_forward(token_ids, mask, params, *, d_model, n_heads):
    # Embedding lookup (row gather) is glue, done in plain JAX.
    emb = jnp.take(params["embedding"], token_ids, axis=0)           # (B, S, D) f32
    S = token_ids.shape[1]
    pos = params["pos_encoding"][:S]                                 # (S, D) f32

    layers = params["layers"]
    if not layers:
        return emb * math.sqrt(d_model) + pos

    h = emb
    n = len(layers)
    for li, lp in enumerate(layers):
        h = run_encoder_layer(
            h, mask, lp, n_heads,
            pos=pos if li == 0 else None,                            # scale + pos fused into layer 0
            embed_scale=math.sqrt(d_model) if li == 0 else 1.0,
            out_dtype=jnp.float32 if li == n - 1 else jnp.bfloat16)  # bf16 between layers
    return h


# ----------------------------------------------------------------------------
# Deterministic parameter construction
# ----------------------------------------------------------------------------
def sinusoidal_pos_encoding(max_len, d_model):
    pos = jnp.arange(max_len, dtype=jnp.float32)[:, None]
    i = jnp.arange(d_model, dtype=jnp.float32)[None, :]
    angle = pos / jnp.power(10000.0, (2.0 * jnp.floor(i / 2.0)) / d_model)
    pe = jnp.where(jnp.mod(i, 2) == 0, jnp.sin(angle), jnp.cos(angle))
    return pe.astype(jnp.float32)


def init_params(key, vocab_size, num_layers, d_model, hidden, max_len):
    def dense(k, fan_in, fan_out):
        lim = 1.0 / math.sqrt(fan_in)
        kw, kb = jax.random.split(k)
        w = jax.random.uniform(kw, (fan_in, fan_out), jnp.float32, -lim, lim)
        b = jax.random.uniform(kb, (1, fan_out), jnp.float32, -lim, lim)
        return w, b

    keys = jax.random.split(key, 1 + num_layers)
    params = {
        "embedding": jax.random.normal(keys[0], (vocab_size, d_model), jnp.float32),
        "pos_encoding": sinusoidal_pos_encoding(max_len, d_model),
        "layers": [],
    }
    for li in range(num_layers):
        lk = jax.random.split(keys[1 + li], 6)
        wq, bq = dense(lk[0], d_model, d_model)
        wk, bk = dense(lk[1], d_model, d_model)
        wv, bv = dense(lk[2], d_model, d_model)
        wo, bo = dense(lk[3], d_model, d_model)
        w1, b1 = dense(lk[4], d_model, hidden)
        w2, b2 = dense(lk[5], hidden, d_model)
        params["layers"].append({
            # fused QKV: one (D, 3D) bf16 MXU weight + one (1, 3D) f32 bias
            "wqkv": jnp.concatenate([wq, wk, wv], axis=1).astype(jnp.bfloat16),
            "bqkv": jnp.concatenate([bq, bk, bv], axis=1),
            "wo": wo.astype(jnp.bfloat16), "bo": bo,
            "ln1_g": jnp.ones((1, d_model), jnp.float32),
            "ln1_b": jnp.zeros((1, d_model), jnp.float32),
            "w1": w1.astype(jnp.bfloat16), "b1": b1,
            "w2": w2.astype(jnp.bfloat16), "b2": b2,
            "ln2_g": jnp.ones((1, d_model), jnp.float32),
            "ln2_b": jnp.zeros((1, d_model), jnp.float32),
        })
    return params


# ----------------------------------------------------------------------------
# Pure-JAX reference (same math, f32) for a correctness cross-check
# ----------------------------------------------------------------------------
def _layernorm(x, g, b, eps=1e-5):
    mu = jnp.mean(x, axis=-1, keepdims=True)
    var = jnp.mean((x - mu) ** 2, axis=-1, keepdims=True)
    return (x - mu) * lax.rsqrt(var + eps) * g + b


def encoder_reference(token_ids, mask, params, *, d_model, n_heads):
    B, S = token_ids.shape
    dh = d_model // n_heads
    emb = jnp.take(params["embedding"], token_ids, axis=0)
    h = emb * math.sqrt(d_model) + params["pos_encoding"][:S]
    neg = (1.0 - mask.astype(jnp.float32)) * -1e9                    # (B, 1, S)
    for lp in params["layers"]:
        qkv = h @ lp["wqkv"].astype(jnp.float32) + lp["bqkv"]
        q, k, v = jnp.split(qkv, 3, axis=-1)
        split = lambda t: t.reshape(B, S, n_heads, dh).transpose(0, 2, 1, 3)
        qh, kh, vh = split(q), split(k), split(v)
        sc = jnp.einsum('bhqd,bhkd->bhqk', qh, kh) / math.sqrt(dh) + neg[:, None]
        p = jax.nn.softmax(sc, axis=-1)
        oh = jnp.einsum('bhqk,bhkd->bhqd', p, vh).transpose(0, 2, 1, 3).reshape(B, S, d_model)
        attn = oh @ lp["wo"].astype(jnp.float32) + lp["bo"]
        h1 = _layernorm(h + attn, lp["ln1_g"], lp["ln1_b"])
        ff = jnp.maximum(h1 @ lp["w1"].astype(jnp.float32) + lp["b1"], 0.0)
        ff = ff @ lp["w2"].astype(jnp.float32) + lp["b2"]
        h = _layernorm(h1 + ff, lp["ln2_g"], lp["ln2_b"])
    return h


# ----------------------------------------------------------------------------
if __name__ == "__main__":
    vocab_size, num_layers, d_model, n_heads, hidden, max_len = 100, 2, 32, 4, 64, 16
    B, S = 2, 8

    key = jax.random.PRNGKey(0)
    kp, kx = jax.random.split(key)
    params = init_params(kp, vocab_size, num_layers, d_model, hidden, max_len)

    token_ids = jax.random.randint(kx, (B, S), 0, vocab_size, dtype=jnp.int32)
    # key-padding mask: 1 = attend, 0 = pad (last two positions of batch element 1 are padded)
    mask = jnp.ones((B, 1, S), jnp.float32).at[1, 0, -2:].set(0.0)

    out = encoder_forward(token_ids, mask, params, d_model=d_model, n_heads=n_heads)
    out = jax.block_until_ready(out)
    assert out.shape == (B, S, d_model) and out.dtype == jnp.float32
    assert bool(jnp.all(jnp.isfinite(out)))

    ref = encoder_reference(token_ids, mask, params, d_model=d_model, n_heads=n_heads)
    max_err = float(jnp.max(jnp.abs(out - ref)))
    assert max_err < 0.2, f"kernel/reference mismatch: max abs err = {max_err}"
    print("KERNEL_OK")
</pallas_src>

<mosaic_0001>
module attributes {stable_mosaic.version = 11 : i64} {
  func.func @encoder_layer_kernel(%arg0: i32, %arg1: memref<1x8x32xf32, #tpu.memory_space<vmem>>, %arg2: memref<1x1x8xf32, #tpu.memory_space<vmem>>, %arg3: memref<8x32xf32, #tpu.memory_space<vmem>>, %arg4: memref<32x96xbf16, #tpu.memory_space<vmem>>, %arg5: memref<1x96xf32, #tpu.memory_space<vmem>>, %arg6: memref<32x32xbf16, #tpu.memory_space<vmem>>, %arg7: memref<1x32xf32, #tpu.memory_space<vmem>>, %arg8: memref<1x32xf32, #tpu.memory_space<vmem>>, %arg9: memref<1x32xf32, #tpu.memory_space<vmem>>, %arg10: memref<32x64xbf16, #tpu.memory_space<vmem>>, %arg11: memref<1x64xf32, #tpu.memory_space<vmem>>, %arg12: memref<64x32xbf16, #tpu.memory_space<vmem>>, %arg13: memref<1x32xf32, #tpu.memory_space<vmem>>, %arg14: memref<1x32xf32, #tpu.memory_space<vmem>>, %arg15: memref<1x32xf32, #tpu.memory_space<vmem>>, %arg16: memref<1x8x32xbf16, #tpu.memory_space<vmem>>) attributes {dimension_semantics = [#tpu.dimension_semantics<parallel>], iteration_bounds = array<i64: 2>, scalar_prefetch = 0 : i64, scratch_operands = 0 : i64, tpu.core_type = #tpu.core_type<tc>, window_params = [{transform_indices = @transform_0, window_bounds = array<i64: 1, 8, 32>}, {transform_indices = @transform_1, window_bounds = array<i64: 1, 1, 8>}, {pipeline_mode = #tpu.pipeline_mode<synchronous>, transform_indices = @transform_2, window_bounds = array<i64: 8, 32>}, {pipeline_mode = #tpu.pipeline_mode<synchronous>, transform_indices = @transform_3, window_bounds = array<i64: 32, 96>}, {pipeline_mode = #tpu.pipeline_mode<synchronous>, transform_indices = @transform_4, window_bounds = array<i64: 1, 96>}, {pipeline_mode = #tpu.pipeline_mode<synchronous>, transform_indices = @transform_5, window_bounds = array<i64: 32, 32>}, {pipeline_mode = #tpu.pipeline_mode<synchronous>, transform_indices = @transform_6, window_bounds = array<i64: 1, 32>}, {pipeline_mode = #tpu.pipeline_mode<synchronous>, transform_indices = @transform_7, window_bounds = array<i64: 1, 32>}, {pipeline_mode = #tpu.pipeline_mode<synchronous>, transform_indices = @transform_8, window_bounds = array<i64: 1, 32>}, {pipeline_mode = #tpu.pipeline_mode<synchronous>, transform_indices = @transform_9, window_bounds = array<i64: 32, 64>}, {pipeline_mode = #tpu.pipeline_mode<synchronous>, transform_indices = @transform_10, window_bounds = array<i64: 1, 64>}, {pipeline_mode = #tpu.pipeline_mode<synchronous>, transform_indices = @transform_11, window_bounds = array<i64: 64, 32>}, {pipeline_mode = #tpu.pipeline_mode<synchronous>, transform_indices = @transform_12, window_bounds = array<i64: 1, 32>}, {pipeline_mode = #tpu.pipeline_mode<synchronous>, transform_indices = @transform_13, window_bounds = array<i64: 1, 32>}, {pipeline_mode = #tpu.pipeline_mode<synchronous>, transform_indices = @transform_14, window_bounds = array<i64: 1, 32>}, {transform_indices = @transform_15, window_bounds = array<i64: 1, 8, 32>}]} {
    %c0 = arith.constant 0 : index
    %c0_0 = arith.constant 0 : index
    %c0_1 = arith.constant 0 : index
    %0 = vector.load %arg1[%c0, %c0_0, %c0_1] : memref<1x8x32xf32, #tpu.memory_space<vmem>>, vector<1x8x32xf32>
    %cst = arith.constant 5.65685415 : f32
    %1 = vector.broadcast %cst : f32 to vector<1x8x32xf32>
    %2 = arith.mulf %0, %1 : vector<1x8x32xf32>
    %c0_2 = arith.constant 0 : index
    %c0_3 = arith.constant 0 : index
    %3 = vector.load %arg3[%c0_2, %c0_3] : memref<8x32xf32, #tpu.memory_space<vmem>>, vector<8x32xf32>
    %4 = vector.shape_cast %3 : vector<8x32xf32> to vector<1x8x32xf32>
    %5 = arith.addf %2, %4 : vector<1x8x32xf32>
    %6 = vector.shape_cast %5 : vector<1x8x32xf32> to vector<8x32xf32>
    %7 = arith.truncf %6 : vector<8x32xf32> to vector<8x32xbf16>
    %c0_4 = arith.constant 0 : index
    %c0_5 = arith.constant 0 : index
    %8 = vector.load %arg4[%c0_4, %c0_5] : memref<32x96xbf16, #tpu.memory_space<vmem>>, vector<32x96xbf16>
    %cst_6 = arith.constant dense<0.000000e+00> : vector<8x96xf32>
    %9 = tpu.matmul %7, %8, %cst_6 {dimension_numbers = #tpu.dot_dimension_numbers<[1], [0], [0], [1], [0, 0, 1, 1], [], []>} : vector<8x32xbf16>, vector<32x96xbf16>, vector<8x96xf32> -> vector<8x96xf32>
    %c0_7 = arith.constant 0 : index
    %c0_8 = arith.constant 0 : index
    %10 = vector.load %arg5[%c0_7, %c0_8] : memref<1x96xf32, #tpu.memory_space<vmem>>, vector<1x96xf32>
    %11 = vector.broadcast %10 : vector<1x96xf32> to vector<8x96xf32>
    %12 = arith.addf %9, %11 : vector<8x96xf32>
    %13 = vector.shape_cast %12 : vector<8x96xf32> to vector<1x8x96xf32>
    %14 = arith.truncf %13 : vector<1x8x96xf32> to vector<1x8x96xbf16>
    %c0_9 = arith.constant 0 : index
    %c0_10 = arith.constant 0 : index
    %c0_11 = arith.constant 0 : index
    %15 = vector.load %arg2[%c0_9, %c0_10, %c0_11] : memref<1x1x8xf32, #tpu.memory_space<vmem>>, vector<1x1x8xf32>
    %cst_12 = arith.constant 1.000000e+00 : f32
    %16 = vector.broadcast %cst_12 : f32 to vector<1x1x8xf32>
    %17 = arith.subf %16, %15 : vector<1x1x8xf32>
    %cst_13 = arith.constant -1.000000e+09 : f32
    %18 = vector.broadcast %cst_13 : f32 to vector<1x1x8xf32>
    %19 = arith.mulf %17, %18 : vector<1x1x8xf32>
    %cst_14 = arith.constant 0.000000e+00 : f32
    %20 = vector.broadcast %cst_14 : f32 to vector<8x32xf32>
    %21 = vector.extract_strided_slice %14 {offsets = [0, 0, 0], sizes = [1, 8, 8], strides = [1, 1, 1]} : vector<1x8x96xbf16> to vector<1x8x8xbf16>
    %22 = vector.extract_strided_slice %14 {offsets = [0, 0, 32], sizes = [1, 8, 8], strides = [1, 1, 1]} : vector<1x8x96xbf16> to vector<1x8x8xbf16>
    %23 = vector.extract_strided_slice %14 {offsets = [0, 0, 64], sizes = [1, 8, 8], strides = [1, 1, 1]} : vector<1x8x96xbf16> to vector<1x8x8xbf16>
    "tpu.trace_start"() <{level = 10 : i32, message = "bqd,bkd->bqk"}> : () -> ()
    %cst_15 = arith.constant dense<0.000000e+00> : vector<1x8x8xf32>
    %24 = tpu.matmul %21, %22, %cst_15 {dimension_numbers = #tpu.dot_dimension_numbers<[2], [2], [1], [1], [0, 0, 0, 1, 1, 1], [0], [0]>} : vector<1x8x8xbf16>, vector<1x8x8xbf16>, vector<1x8x8xf32> -> vector<1x8x8xf32>
    "tpu.trace_stop"() : () -> ()
    %cst_16 = arith.constant 0.353553385 : f32
    %25 = vector.broadcast %cst_16 : f32 to vector<1x8x8xf32>
    %26 = arith.mulf %24, %25 : vector<1x8x8xf32>
    %27 = vector.broadcast %19 : vector<1x1x8xf32> to vector<1x8x8xf32>
    %28 = arith.addf %26, %27 : vector<1x8x8xf32>
    %cst_17 = arith.constant dense<0xFF800000> : vector<1x8xf32>
    %29 = vector.multi_reduction <maximumf>, %28, %cst_17 [2] : vector<1x8x8xf32> to vector<1x8xf32>
    %30 = vector.shape_cast %29 : vector<1x8xf32> to vector<1x8x1xf32>
    %31 = vector.broadcast %30 : vector<1x8x1xf32> to vector<1x8x8xf32>
    %32 = arith.subf %28, %31 : vector<1x8x8xf32>
    %33 = math.exp %32 : vector<1x8x8xf32>
    %cst_18 = arith.constant dense<0.000000e+00> : vector<1x8xf32>
    %34 = vector.multi_reduction <add>, %33, %cst_18 [2] : vector<1x8x8xf32> to vector<1x8xf32>
    %35 = vector.shape_cast %34 : vector<1x8xf32> to vector<1x8x1xf32>
    %36 = tpu.reciprocal %35 : vector<1x8x1xf32> -> vector<1x8x1xf32>
    %37 = vector.broadcast %36 : vector<1x8x1xf32> to vector<1x8x8xf32>
    %38 = arith.mulf %33, %37 : vector<1x8x8xf32>
    %39 = arith.truncf %38 : vector<1x8x8xf32> to vector<1x8x8xbf16>
    "tpu.trace_start"() <{level = 10 : i32, message = "bqk,bkd->bqd"}> : () -> ()
    %cst_19 = arith.constant dense<0.000000e+00> : vector<1x8x8xf32>
    %40 = tpu.matmul %39, %23, %cst_19 {dimension_numbers = #tpu.dot_dimension_numbers<[2], [1], [1], [2], [0, 0, 0, 1, 1, 2], [0], [0]>} : vector<1x8x8xbf16>, vector<1x8x8xbf16>, vector<1x8x8xf32> -> vector<1x8x8xf32>
    "tpu.trace_stop"() : () -> ()
    %41 = vector.shape_cast %40 : vector<1x8x8xf32> to vector<8x8xf32>
    %42 = arith.truncf %41 : vector<8x8xf32> to vector<8x8xbf16>
    %c0_20 = arith.constant 0 : index
    %c0_21 = arith.constant 0 : index
    %43 = vector.load %arg6[%c0_20, %c0_21] : memref<32x32xbf16, #tpu.memory_space<vmem>>, vector<8x32xbf16>
    %cst_22 = arith.constant dense<0.000000e+00> : vector<8x32xf32>
    %44 = tpu.matmul %42, %43, %cst_22 {dimension_numbers = #tpu.dot_dimension_numbers<[1], [0], [0], [1], [0, 0, 1, 1], [], []>} : vector<8x8xbf16>, vector<8x32xbf16>, vector<8x32xf32> -> vector<8x32xf32>
    %45 = arith.addf %20, %44 : vector<8x32xf32>
    %46 = vector.extract_strided_slice %14 {offsets = [0, 0, 8], sizes = [1, 8, 8], strides = [1, 1, 1]} : vector<1x8x96xbf16> to vector<1x8x8xbf16>
    %47 = vector.extract_strided_slice %14 {offsets = [0, 0, 40], sizes = [1, 8, 8], strides = [1, 1, 1]} : vector<1x8x96xbf16> to vector<1x8x8xbf16>
    %48 = vector.extract_strided_slice %14 {offsets = [0, 0, 72], sizes = [1, 8, 8], strides = [1, 1, 1]} : vector<1x8x96xbf16> to vector<1x8x8xbf16>
    "tpu.trace_start"() <{level = 10 : i32, message = "bqd,bkd->bqk"}> : () -> ()
    %cst_23 = arith.constant dense<0.000000e+00> : vector<1x8x8xf32>
    %49 = tpu.matmul %46, %47, %cst_23 {dimension_numbers = #tpu.dot_dimension_numbers<[2], [2], [1], [1], [0, 0, 0, 1, 1, 1], [0], [0]>} : vector<1x8x8xbf16>, vector<1x8x8xbf16>, vector<1x8x8xf32> -> vector<1x8x8xf32>
    "tpu.trace_stop"() : () -> ()
    %cst_24 = arith.constant 0.353553385 : f32
    %50 = vector.broadcast %cst_24 : f32 to vector<1x8x8xf32>
    %51 = arith.mulf %49, %50 : vector<1x8x8xf32>
    %52 = vector.broadcast %19 : vector<1x1x8xf32> to vector<1x8x8xf32>
    %53 = arith.addf %51, %52 : vector<1x8x8xf32>
    %cst_25 = arith.constant dense<0xFF800000> : vector<1x8xf32>
    %54 = vector.multi_reduction <maximumf>, %53, %cst_25 [2] : vector<1x8x8xf32> to vector<1x8xf32>
    %55 = vector.shape_cast %54 : vector<1x8xf32> to vector<1x8x1xf32>
    %56 = vector.broadcast %55 : vector<1x8x1xf32> to vector<1x8x8xf32>
    %57 = arith.subf %53, %56 : vector<1x8x8xf32>
    %58 = math.exp %57 : vector<1x8x8xf32>
    %cst_26 = arith.constant dense<0.000000e+00> : vector<1x8xf32>
    %59 = vector.multi_reduction <add>, %58, %cst_26 [2] : vector<1x8x8xf32> to vector<1x8xf32>
    %60 = vector.shape_cast %59 : vector<1x8xf32> to vector<1x8x1xf32>
    %61 = tpu.reciprocal %60 : vector<1x8x1xf32> -> vector<1x8x1xf32>
    %62 = vector.broadcast %61 : vector<1x8x1xf32> to vector<1x8x8xf32>
    %63 = arith.mulf %58, %62 : vector<1x8x8xf32>
    %64 = arith.truncf %63 : vector<1x8x8xf32> to vector<1x8x8xbf16>
    "tpu.trace_start"() <{level = 10 : i32, message = "bqk,bkd->bqd"}> : () -> ()
    %cst_27 = arith.constant dense<0.000000e+00> : vector<1x8x8xf32>
    %65 = tpu.matmul %64, %48, %cst_27 {dimension_numbers = #tpu.dot_dimension_numbers<[2], [1], [1], [2], [0, 0, 0, 1, 1, 2], [0], [0]>} : vector<1x8x8xbf16>, vector<1x8x8xbf16>, vector<1x8x8xf32> -> vector<1x8x8xf32>
    "tpu.trace_stop"() : () -> ()
    %66 = vector.shape_cast %65 : vector<1x8x8xf32> to vector<8x8xf32>
    %67 = arith.truncf %66 : vector<8x8xf32> to vector<8x8xbf16>
    %c8 = arith.constant 8 : index
    %c0_28 = arith.constant 0 : index
    %68 = vector.load %arg6[%c8, %c0_28] : memref<32x32xbf16, #tpu.memory_space<vmem>>, vector<8x32xbf16>
    %cst_29 = arith.constant dense<0.000000e+00> : vector<8x32xf32>
    %69 = tpu.matmul %67, %68, %cst_29 {dimension_numbers = #tpu.dot_dimension_numbers<[1], [0], [0], [1], [0, 0, 1, 1], [], []>} : vector<8x8xbf16>, vector<8x32xbf16>, vector<8x32xf32> -> vector<8x32xf32>
    %70 = arith.addf %45, %69 : vector<8x32xf32>
    %71 = vector.extract_strided_slice %14 {offsets = [0, 0, 16], sizes = [1, 8, 8], strides = [1, 1, 1]} : vector<1x8x96xbf16> to vector<1x8x8xbf16>
    %72 = vector.extract_strided_slice %14 {offsets = [0, 0, 48], sizes = [1, 8, 8], strides = [1, 1, 1]} : vector<1x8x96xbf16> to vector<1x8x8xbf16>
    %73 = vector.extract_strided_slice %14 {offsets = [0, 0, 80], sizes = [1, 8, 8], strides = [1, 1, 1]} : vector<1x8x96xbf16> to vector<1x8x8xbf16>
    "tpu.trace_start"() <{level = 10 : i32, message = "bqd,bkd->bqk"}> : () -> ()
    %cst_30 = arith.constant dense<0.000000e+00> : vector<1x8x8xf32>
    %74 = tpu.matmul %71, %72, %cst_30 {dimension_numbers = #tpu.dot_dimension_numbers<[2], [2], [1], [1], [0, 0, 0, 1, 1, 1], [0], [0]>} : vector<1x8x8xbf16>, vector<1x8x8xbf16>, vector<1x8x8xf32> -> vector<1x8x8xf32>
    "tpu.trace_stop"() : () -> ()
    %cst_31 = arith.constant 0.353553385 : f32
    %75 = vector.broadcast %cst_31 : f32 to vector<1x8x8xf32>
    %76 = arith.mulf %74, %75 : vector<1x8x8xf32>
    %77 = vector.broadcast %19 : vector<1x1x8xf32> to vector<1x8x8xf32>
    %78 = arith.addf %76, %77 : vector<1x8x8xf32>
    %cst_32 = arith.constant dense<0xFF800000> : vector<1x8xf32>
    %79 = vector.multi_reduction <maximumf>, %78, %cst_32 [2] : vector<1x8x8xf32> to vector<1x8xf32>
    %80 = vector.shape_cast %79 : vector<1x8xf32> to vector<1x8x1xf32>
    %81 = vector.broadcast %80 : vector<1x8x1xf32> to vector<1x8x8xf32>
    %82 = arith.subf %78, %81 : vector<1x8x8xf32>
    %83 = math.exp %82 : vector<1x8x8xf32>
    %cst_33 = arith.constant dense<0.000000e+00> : vector<1x8xf32>
    %84 = vector.multi_reduction <add>, %83, %cst_33 [2] : vector<1x8x8xf32> to vector<1x8xf32>
    %85 = vector.shape_cast %84 : vector<1x8xf32> to vector<1x8x1xf32>
    %86 = tpu.reciprocal %85 : vector<1x8x1xf32> -> vector<1x8x1xf32>
    %87 = vector.broadcast %86 : vector<1x8x1xf32> to vector<1x8x8xf32>
    %88 = arith.mulf %83, %87 : vector<1x8x8xf32>
    %89 = arith.truncf %88 : vector<1x8x8xf32> to vector<1x8x8xbf16>
    "tpu.trace_start"() <{level = 10 : i32, message = "bqk,bkd->bqd"}> : () -> ()
    %cst_34 = arith.constant dense<0.000000e+00> : vector<1x8x8xf32>
    %90 = tpu.matmul %89, %73, %cst_34 {dimension_numbers = #tpu.dot_dimension_numbers<[2], [1], [1], [2], [0, 0, 0, 1, 1, 2], [0], [0]>} : vector<1x8x8xbf16>, vector<1x8x8xbf16>, vector<1x8x8xf32> -> vector<1x8x8xf32>
    "tpu.trace_stop"() : () -> ()
    %91 = vector.shape_cast %90 : vector<1x8x8xf32> to vector<8x8xf32>
    %92 = arith.truncf %91 : vector<8x8xf32> to vector<8x8xbf16>
    %c16 = arith.constant 16 : index
    %c0_35 = arith.constant 0 : index
    %93 = vector.load %arg6[%c16, %c0_35] : memref<32x32xbf16, #tpu.memory_space<vmem>>, vector<8x32xbf16>
    %cst_36 = arith.constant dense<0.000000e+00> : vector<8x32xf32>
    %94 = tpu.matmul %92, %93, %cst_36 {dimension_numbers = #tpu.dot_dimension_numbers<[1], [0], [0], [1], [0, 0, 1, 1], [], []>} : vector<8x8xbf16>, vector<8x32xbf16>, vector<8x32xf32> -> vector<8x32xf32>
    %95 = arith.addf %70, %94 : vector<8x32xf32>
    %96 = vector.extract_strided_slice %14 {offsets = [0, 0, 24], sizes = [1, 8, 8], strides = [1, 1, 1]} : vector<1x8x96xbf16> to vector<1x8x8xbf16>
    %97 = vector.extract_strided_slice %14 {offsets = [0, 0, 56], sizes = [1, 8, 8], strides = [1, 1, 1]} : vector<1x8x96xbf16> to vector<1x8x8xbf16>
    %98 = vector.extract_strided_slice %14 {offsets = [0, 0, 88], sizes = [1, 8, 8], strides = [1, 1, 1]} : vector<1x8x96xbf16> to vector<1x8x8xbf16>
    "tpu.trace_start"() <{level = 10 : i32, message = "bqd,bkd->bqk"}> : () -> ()
    %cst_37 = arith.constant dense<0.000000e+00> : vector<1x8x8xf32>
    %99 = tpu.matmul %96, %97, %cst_37 {dimension_numbers = #tpu.dot_dimension_numbers<[2], [2], [1], [1], [0, 0, 0, 1, 1, 1], [0], [0]>} : vector<1x8x8xbf16>, vector<1x8x8xbf16>, vector<1x8x8xf32> -> vector<1x8x8xf32>
    "tpu.trace_stop"() : () -> ()
    %cst_38 = arith.constant 0.353553385 : f32
    %100 = vector.broadcast %cst_38 : f32 to vector<1x8x8xf32>
    %101 = arith.mulf %99, %100 : vector<1x8x8xf32>
    %102 = vector.broadcast %19 : vector<1x1x8xf32> to vector<1x8x8xf32>
    %103 = arith.addf %101, %102 : vector<1x8x8xf32>
    %cst_39 = arith.constant dense<0xFF800000> : vector<1x8xf32>
    %104 = vector.multi_reduction <maximumf>, %103, %cst_39 [2] : vector<1x8x8xf32> to vector<1x8xf32>
    %105 = vector.shape_cast %104 : vector<1x8xf32> to vector<1x8x1xf32>
    %106 = vector.broadcast %105 : vector<1x8x1xf32> to vector<1x8x8xf32>
    %107 = arith.subf %103, %106 : vector<1x8x8xf32>
    %108 = math.exp %107 : vector<1x8x8xf32>
    %cst_40 = arith.constant dense<0.000000e+00> : vector<1x8xf32>
    %109 = vector.multi_reduction <add>, %108, %cst_40 [2] : vector<1x8x8xf32> to vector<1x8xf32>
    %110 = vector.shape_cast %109 : vector<1x8xf32> to vector<1x8x1xf32>
    %111 = tpu.reciprocal %110 : vector<1x8x1xf32> -> vector<1x8x1xf32>
    %112 = vector.broadcast %111 : vector<1x8x1xf32> to vector<1x8x8xf32>
    %113 = arith.mulf %108, %112 : vector<1x8x8xf32>
    %114 = arith.truncf %113 : vector<1x8x8xf32> to vector<1x8x8xbf16>
    "tpu.trace_start"() <{level = 10 : i32, message = "bqk,bkd->bqd"}> : () -> ()
    %cst_41 = arith.constant dense<0.000000e+00> : vector<1x8x8xf32>
    %115 = tpu.matmul %114, %98, %cst_41 {dimension_numbers = #tpu.dot_dimension_numbers<[2], [1], [1], [2], [0, 0, 0, 1, 1, 2], [0], [0]>} : vector<1x8x8xbf16>, vector<1x8x8xbf16>, vector<1x8x8xf32> -> vector<1x8x8xf32>
    "tpu.trace_stop"() : () -> ()
    %116 = vector.shape_cast %115 : vector<1x8x8xf32> to vector<8x8xf32>
    %117 = arith.truncf %116 : vector<8x8xf32> to vector<8x8xbf16>
    %c24 = arith.constant 24 : index
    %c0_42 = arith.constant 0 : index
    %118 = vector.load %arg6[%c24, %c0_42] : memref<32x32xbf16, #tpu.memory_space<vmem>>, vector<8x32xbf16>
    %cst_43 = arith.constant dense<0.000000e+00> : vector<8x32xf32>
    %119 = tpu.matmul %117, %118, %cst_43 {dimension_numbers = #tpu.dot_dimension_numbers<[1], [0], [0], [1], [0, 0, 1, 1], [], []>} : vector<8x8xbf16>, vector<8x32xbf16>, vector<8x32xf32> -> vector<8x32xf32>
    %120 = arith.addf %95, %119 : vector<8x32xf32>
    %c0_44 = arith.constant 0 : index
    %c0_45 = arith.constant 0 : index
    %121 = vector.load %arg7[%c0_44, %c0_45] : memref<1x32xf32, #tpu.memory_space<vmem>>, vector<1x32xf32>
    %122 = vector.broadcast %121 : vector<1x32xf32> to vector<8x32xf32>
    %123 = arith.addf %120, %122 : vector<8x32xf32>
    %124 = vector.shape_cast %5 : vector<1x8x32xf32> to vector<8x32xf32>
    %125 = arith.addf %124, %123 : vector<8x32xf32>
    %cst_46 = arith.constant dense<0.000000e+00> : vector<8xf32>
    %126 = vector.multi_reduction <add>, %125, %cst_46 [1] : vector<8x32xf32> to vector<8xf32>
    %127 = vector.shape_cast %126 : vector<8xf32> to vector<8x1xf32>
    %cst_47 = arith.constant 3.200000e+01 : f32
    %128 = vector.broadcast %cst_47 : f32 to vector<8x1xf32>
    %129 = arith.divf %127, %128 : vector<8x1xf32>
    %130 = vector.broadcast %129 : vector<8x1xf32> to vector<8x32xf32>
    %131 = arith.subf %125, %130 : vector<8x32xf32>
    %132 = arith.mulf %131, %131 : vector<8x32xf32>
    %cst_48 = arith.constant dense<0.000000e+00> : vector<8xf32>
    %133 = vector.multi_reduction <add>, %132, %cst_48 [1] : vector<8x32xf32> to vector<8xf32>
    %134 = vector.shape_cast %133 : vector<8xf32> to vector<8x1xf32>
    %cst_49 = arith.constant 3.200000e+01 : f32
    %135 = vector.broadcast %cst_49 : f32 to vector<8x1xf32>
    %136 = arith.divf %134, %135 : vector<8x1xf32>
    %137 = vector.broadcast %129 : vector<8x1xf32> to vector<8x32xf32>
    %138 = arith.subf %125, %137 : vector<8x32xf32>
    %cst_50 = arith.constant 9.99999974E-6 : f32
    %139 = vector.broadcast %cst_50 : f32 to vector<8x1xf32>
    %140 = arith.addf %136, %139 : vector<8x1xf32>
    %141 = math.rsqrt %140 : vector<8x1xf32>
    %142 = vector.broadcast %141 : vector<8x1xf32> to vector<8x32xf32>
    %143 = arith.mulf %138, %142 : vector<8x32xf32>
    %c0_51 = arith.constant 0 : index
    %c0_52 = arith.constant 0 : index
    %144 = vector.load %arg8[%c0_51, %c0_52] : memref<1x32xf32, #tpu.memory_space<vmem>>, vector<1x32xf32>
    %145 = vector.broadcast %144 : vector<1x32xf32> to vector<8x32xf32>
    %146 = arith.mulf %143, %145 : vector<8x32xf32>
    %c0_53 = arith.constant 0 : index
    %c0_54 = arith.constant 0 : index
    %147 = vector.load %arg9[%c0_53, %c0_54] : memref<1x32xf32, #tpu.memory_space<vmem>>, vector<1x32xf32>
    %148 = vector.broadcast %147 : vector<1x32xf32> to vector<8x32xf32>
    %149 = arith.addf %146, %148 : vector<8x32xf32>
    %150 = arith.truncf %149 : vector<8x32xf32> to vector<8x32xbf16>
    %cst_55 = arith.constant 0.000000e+00 : f32
    %151 = vector.broadcast %cst_55 : f32 to vector<8x32xf32>
    %c0_56 = arith.constant 0 : index
    %c0_57 = arith.constant 0 : index
    %152 = vector.load %arg10[%c0_56, %c0_57] : memref<32x64xbf16, #tpu.memory_space<vmem>>, vector<32x64xbf16>
    %cst_58 = arith.constant dense<0.000000e+00> : vector<8x64xf32>
    %153 = tpu.matmul %150, %152, %cst_58 {dimension_numbers = #tpu.dot_dimension_numbers<[1], [0], [0], [1], [0, 0, 1, 1], [], []>} : vector<8x32xbf16>, vector<32x64xbf16>, vector<8x64xf32> -> vector<8x64xf32>
    %c0_59 = arith.constant 0 : index
    %c0_60 = arith.constant 0 : index
    %154 = vector.load %arg11[%c0_59, %c0_60] : memref<1x64xf32, #tpu.memory_space<vmem>>, vector<1x64xf32>
    %155 = vector.broadcast %154 : vector<1x64xf32> to vector<8x64xf32>
    %156 = arith.addf %153, %155 : vector<8x64xf32>
    %cst_61 = arith.constant 0.000000e+00 : f32
    %157 = vector.broadcast %cst_61 : f32 to vector<8x64xf32>
    %158 = arith.maximumf %156, %157 : vector<8x64xf32>
    %159 = arith.truncf %158 : vector<8x64xf32> to vector<8x64xbf16>
    %c0_62 = arith.constant 0 : index
    %c0_63 = arith.constant 0 : index
    %160 = vector.load %arg12[%c0_62, %c0_63] : memref<64x32xbf16, #tpu.memory_space<vmem>>, vector<64x32xbf16>
    %cst_64 = arith.constant dense<0.000000e+00> : vector<8x32xf32>
    %161 = tpu.matmul %159, %160, %cst_64 {dimension_numbers = #tpu.dot_dimension_numbers<[1], [0], [0], [1], [0, 0, 1, 1], [], []>} : vector<8x64xbf16>, vector<64x32xbf16>, vector<8x32xf32> -> vector<8x32xf32>
    %162 = arith.addf %151, %161 : vector<8x32xf32>
    %c0_65 = arith.constant 0 : index
    %c0_66 = arith.constant 0 : index
    %163 = vector.load %arg13[%c0_65, %c0_66] : memref<1x32xf32, #tpu.memory_space<vmem>>, vector<1x32xf32>
    %164 = vector.broadcast %163 : vector<1x32xf32> to vector<8x32xf32>
    %165 = arith.addf %162, %164 : vector<8x32xf32>
    %166 = arith.addf %149, %165 : vector<8x32xf32>
    %cst_67 = arith.constant dense<0.000000e+00> : vector<8xf32>
    %167 = vector.multi_reduction <add>, %166, %cst_67 [1] : vector<8x32xf32> to vector<8xf32>
    %168 = vector.shape_cast %167 : vector<8xf32> to vector<8x1xf32>
    %cst_68 = arith.constant 3.200000e+01 : f32
    %169 = vector.broadcast %cst_68 : f32 to vector<8x1xf32>
    %170 = arith.divf %168, %169 : vector<8x1xf32>
    %171 = vector.broadcast %170 : vector<8x1xf32> to vector<8x32xf32>
    %172 = arith.subf %166, %171 : vector<8x32xf32>
    %173 = arith.mulf %172, %172 : vector<8x32xf32>
    %cst_69 = arith.constant dense<0.000000e+00> : vector<8xf32>
    %174 = vector.multi_reduction <add>, %173, %cst_69 [1] : vector<8x32xf32> to vector<8xf32>
    %175 = vector.shape_cast %174 : vector<8xf32> to vector<8x1xf32>
    %cst_70 = arith.constant 3.200000e+01 : f32
    %176 = vector.broadcast %cst_70 : f32 to vector<8x1xf32>
    %177 = arith.divf %175, %176 : vector<8x1xf32>
    %178 = vector.broadcast %170 : vector<8x1xf32> to vector<8x32xf32>
    %179 = arith.subf %166, %178 : vector<8x32xf32>
    %cst_71 = arith.constant 9.99999974E-6 : f32
    %180 = vector.broadcast %cst_71 : f32 to vector<8x1xf32>
    %181 = arith.addf %177, %180 : vector<8x1xf32>
    %182 = math.rsqrt %181 : vector<8x1xf32>
    %183 = vector.broadcast %182 : vector<8x1xf32> to vector<8x32xf32>
    %184 = arith.mulf %179, %183 : vector<8x32xf32>
    %c0_72 = arith.constant 0 : index
    %c0_73 = arith.constant 0 : index
    %185 = vector.load %arg14[%c0_72, %c0_73] : memref<1x32xf32, #tpu.memory_space<vmem>>, vector<1x32xf32>
    %186 = vector.broadcast %185 : vector<1x32xf32> to vector<8x32xf32>
    %187 = arith.mulf %184, %186 : vector<8x32xf32>
    %c0_74 = arith.constant 0 : index
    %c0_75 = arith.constant 0 : index
    %188 = vector.load %arg15[%c0_74, %c0_75] : memref<1x32xf32, #tpu.memory_space<vmem>>, vector<1x32xf32>
    %189 = vector.broadcast %188 : vector<1x32xf32> to vector<8x32xf32>
    %190 = arith.addf %187, %189 : vector<8x32xf32>
    %191 = vector.shape_cast %190 : vector<8x32xf32> to vector<1x8x32xf32>
    %192 = arith.truncf %191 : vector<1x8x32xf32> to vector<1x8x32xbf16>
    %c0_76 = arith.constant 0 : index
    %c0_77 = arith.constant 0 : index
    %c0_78 = arith.constant 0 : index
    %193 = vector.load %arg16[%c0_76, %c0_77, %c0_78] : memref<1x8x32xbf16, #tpu.memory_space<vmem>>, vector<1x8x32xbf16>
    tpu.vector_store %arg16[%c0_76, %c0_77, %c0_78], %192 {strides = array<i32>} : memref<1x8x32xbf16, #tpu.memory_space<vmem>>, vector<1x8x32xbf16>,
    return
  }
  func.func @transform_0(%arg0: i32) -> (i32, i32, i32) {
    %c0_i32 = arith.constant 0 : i32
    %c0_i32_0 = arith.constant 0 : i32
    %c0_i32_1 = arith.constant 0 : i32
    return %arg0, %c0_i32, %c0_i32_0 : i32, i32, i32
  }
  func.func @transform_1(%arg0: i32) -> (i32, i32, i32) {
    %c0_i32 = arith.constant 0 : i32
    %c0_i32_0 = arith.constant 0 : i32
    %c0_i32_1 = arith.constant 0 : i32
    return %arg0, %c0_i32, %c0_i32_0 : i32, i32, i32
  }
  func.func @transform_2(%arg0: i32) -> (i32, i32) {
    %c0_i32 = arith.constant 0 : i32
    %c0_i32_0 = arith.constant 0 : i32
    %c0_i32_1 = arith.constant 0 : i32
    return %c0_i32, %c0_i32_0 : i32, i32
  }
  func.func @transform_3(%arg0: i32) -> (i32, i32) {
    %c0_i32 = arith.constant 0 : i32
    %c0_i32_0 = arith.constant 0 : i32
    %c0_i32_1 = arith.constant 0 : i32
    return %c0_i32, %c0_i32_0 : i32, i32
  }
  func.func @transform_4(%arg0: i32) -> (i32, i32) {
    %c0_i32 = arith.constant 0 : i32
    %c0_i32_0 = arith.constant 0 : i32
    %c0_i32_1 = arith.constant 0 : i32
    return %c0_i32, %c0_i32_0 : i32, i32
  }
  func.func @transform_5(%arg0: i32) -> (i32, i32) {
    %c0_i32 = arith.constant 0 : i32
    %c0_i32_0 = arith.constant 0 : i32
    %c0_i32_1 = arith.constant 0 : i32
    return %c0_i32, %c0_i32_0 : i32, i32
  }
  func.func @transform_6(%arg0: i32) -> (i32, i32) {
    %c0_i32 = arith.constant 0 : i32
    %c0_i32_0 = arith.constant 0 : i32
    %c0_i32_1 = arith.constant 0 : i32
    return %c0_i32, %c0_i32_0 : i32, i32
  }
  func.func @transform_7(%arg0: i32) -> (i32, i32) {
    %c0_i32 = arith.constant 0 : i32
    %c0_i32_0 = arith.constant 0 : i32
    %c0_i32_1 = arith.constant 0 : i32
    return %c0_i32, %c0_i32_0 : i32, i32
  }
  func.func @transform_8(%arg0: i32) -> (i32, i32) {
    %c0_i32 = arith.constant 0 : i32
    %c0_i32_0 = arith.constant 0 : i32
    %c0_i32_1 = arith.constant 0 : i32
    return %c0_i32, %c0_i32_0 : i32, i32
  }
  func.func @transform_9(%arg0: i32) -> (i32, i32) {
    %c0_i32 = arith.constant 0 : i32
    %c0_i32_0 = arith.constant 0 : i32
    %c0_i32_1 = arith.constant 0 : i32
    return %c0_i32, %c0_i32_0 : i32, i32
  }
  func.func @transform_10(%arg0: i32) -> (i32, i32) {
    %c0_i32 = arith.constant 0 : i32
    %c0_i32_0 = arith.constant 0 : i32
    %c0_i32_1 = arith.constant 0 : i32
    return %c0_i32, %c0_i32_0 : i32, i32
  }
  func.func @transform_11(%arg0: i32) -> (i32, i32) {
    %c0_i32 = arith.constant 0 : i32
    %c0_i32_0 = arith.constant 0 : i32
    %c0_i32_1 = arith.constant 0 : i32
    return %c0_i32, %c0_i32_0 : i32, i32
  }
  func.func @transform_12(%arg0: i32) -> (i32, i32) {
    %c0_i32 = arith.constant 0 : i32
    %c0_i32_0 = arith.constant 0 : i32
    %c0_i32_1 = arith.constant 0 : i32
    return %c0_i32, %c0_i32_0 : i32, i32
  }
  func.func @transform_13(%arg0: i32) -> (i32, i32) {
    %c0_i32 = arith.constant 0 : i32
    %c0_i32_0 = arith.constant 0 : i32
    %c0_i32_1 = arith.constant 0 : i32
    return %c0_i32, %c0_i32_0 : i32, i32
  }
  func.func @transform_14(%arg0: i32) -> (i32, i32) {
    %c0_i32 = arith.constant 0 : i32
    %c0_i32_0 = arith.constant 0 : i32
    %c0_i32_1 = arith.constant 0 : i32
    return %c0_i32, %c0_i32_0 : i32, i32
  }
  func.func @transform_15(%arg0: i32) -> (i32, i32, i32) {
    %c0_i32 = arith.constant 0 : i32
    %c0_i32_0 = arith.constant 0 : i32
    %c0_i32_1 = arith.constant 0 : i32
    return %arg0, %c0_i32, %c0_i32_0 : i32, i32, i32
  }
}

module attributes {stable_mosaic.version = 11 : i64} {
  func.func @encoder_layer_kernel(%arg0: i32, %arg1: memref<1x8x32xf32, #tpu.memory_space<vmem>>, %arg2: memref<1x1x8xf32, #tpu.memory_space<vmem>>, %arg3: memref<8x32xf32, #tpu.memory_space<vmem>>, %arg4: memref<32x96xbf16, #tpu.memory_space<vmem>>, %arg5: memref<1x96xf32, #tpu.memory_space<vmem>>, %arg6: memref<32x32xbf16, #tpu.memory_space<vmem>>, %arg7: memref<1x32xf32, #tpu.memory_space<vmem>>, %arg8: memref<1x32xf32, #tpu.memory_space<vmem>>, %arg9: memref<1x32xf32, #tpu.memory_space<vmem>>, %arg10: memref<32x64xbf16, #tpu.memory_space<vmem>>, %arg11: memref<1x64xf32, #tpu.memory_space<vmem>>, %arg12: memref<64x32xbf16, #tpu.memory_space<vmem>>, %arg13: memref<1x32xf32, #tpu.memory_space<vmem>>, %arg14: memref<1x32xf32, #tpu.memory_space<vmem>>, %arg15: memref<1x32xf32, #tpu.memory_space<vmem>>, %arg16: memref<1x8x32xbf16, #tpu.memory_space<vmem>>) attributes {dimension_semantics = [#tpu.dimension_semantics<parallel>], iteration_bounds = array<i64: 2>, scalar_prefetch = 0 : i64, scratch_operands = 0 : i64, tpu.core_type = #tpu.core_type<tc>, window_params = [{transform_indices = @transform_0, window_bounds = array<i64: 1, 8, 32>}, {transform_indices = @transform_1, window_bounds = array<i64: 1, 1, 8>}, {pipeline_mode = #tpu.pipeline_mode<synchronous>, transform_indices = @transform_2, window_bounds = array<i64: 8, 32>}, {pipeline_mode = #tpu.pipeline_mode<synchronous>, transform_indices = @transform_3, window_bounds = array<i64: 32, 96>}, {pipeline_mode = #tpu.pipeline_mode<synchronous>, transform_indices = @transform_4, window_bounds = array<i64: 1, 96>}, {pipeline_mode = #tpu.pipeline_mode<synchronous>, transform_indices = @transform_5, window_bounds = array<i64: 32, 32>}, {pipeline_mode = #tpu.pipeline_mode<synchronous>, transform_indices = @transform_6, window_bounds = array<i64: 1, 32>}, {pipeline_mode = #tpu.pipeline_mode<synchronous>, transform_indices = @transform_7, window_bounds = array<i64: 1, 32>}, {pipeline_mode = #tpu.pipeline_mode<synchronous>, transform_indices = @transform_8, window_bounds = array<i64: 1, 32>}, {pipeline_mode = #tpu.pipeline_mode<synchronous>, transform_indices = @transform_9, window_bounds = array<i64: 32, 64>}, {pipeline_mode = #tpu.pipeline_mode<synchronous>, transform_indices = @transform_10, window_bounds = array<i64: 1, 64>}, {pipeline_mode = #tpu.pipeline_mode<synchronous>, transform_indices = @transform_11, window_bounds = array<i64: 64, 32>}, {pipeline_mode = #tpu.pipeline_mode<synchronous>, transform_indices = @transform_12, window_bounds = array<i64: 1, 32>}, {pipeline_mode = #tpu.pipeline_mode<synchronous>, transform_indices = @transform_13, window_bounds = array<i64: 1, 32>}, {pipeline_mode = #tpu.pipeline_mode<synchronous>, transform_indices = @transform_14, window_bounds = array<i64: 1, 32>}, {transform_indices = @transform_15, window_bounds = array<i64: 1, 8, 32>}]} {
    %c0 = arith.constant 0 : index
    %c0_0 = arith.constant 0 : index
    %c0_1 = arith.constant 0 : index
    %0 = vector.load %arg1[%c0, %c0_0, %c0_1] : memref<1x8x32xf32, #tpu.memory_space<vmem>>, vector<1x8x32xf32>
    %cst = arith.constant 5.65685415 : f32
    %1 = vector.broadcast %cst : f32 to vector<1x8x32xf32>
    %2 = arith.mulf %0, %1 : vector<1x8x32xf32>
    %c0_2 = arith.constant 0 : index
    %c0_3 = arith.constant 0 : index
    %3 = vector.load %arg3[%c0_2, %c0_3] : memref<8x32xf32, #tpu.memory_space<vmem>>, vector<8x32xf32>
    %4 = vector.shape_cast %3 : vector<8x32xf32> to vector<1x8x32xf32>
    %5 = arith.addf %2, %4 : vector<1x8x32xf32>
    %6 = vector.shape_cast %5 : vector<1x8x32xf32> to vector<8x32xf32>
    %7 = arith.truncf %6 : vector<8x32xf32> to vector<8x32xbf16>
    %c0_4 = arith.constant 0 : index
    %c0_5 = arith.constant 0 : index
    %8 = vector.load %arg4[%c0_4, %c0_5] : memref<32x96xbf16, #tpu.memory_space<vmem>>, vector<32x96xbf16>
    %cst_6 = arith.constant dense<0.000000e+00> : vector<8x96xf32>
    %9 = tpu.matmul %7, %8, %cst_6 {dimension_numbers = #tpu.dot_dimension_numbers<[1], [0], [0], [1], [0, 0, 1, 1], [], []>} : vector<8x32xbf16>, vector<32x96xbf16>, vector<8x96xf32> -> vector<8x96xf32>
    %c0_7 = arith.constant 0 : index
    %c0_8 = arith.constant 0 : index
    %10 = vector.load %arg5[%c0_7, %c0_8] : memref<1x96xf32, #tpu.memory_space<vmem>>, vector<1x96xf32>
    %11 = vector.broadcast %10 : vector<1x96xf32> to vector<8x96xf32>
    %12 = arith.addf %9, %11 : vector<8x96xf32>
    %13 = vector.shape_cast %12 : vector<8x96xf32> to vector<1x8x96xf32>
    %14 = arith.truncf %13 : vector<1x8x96xf32> to vector<1x8x96xbf16>
    %c0_9 = arith.constant 0 : index
    %c0_10 = arith.constant 0 : index
    %c0_11 = arith.constant 0 : index
    %15 = vector.load %arg2[%c0_9, %c0_10, %c0_11] : memref<1x1x8xf32, #tpu.memory_space<vmem>>, vector<1x1x8xf32>
    %cst_12 = arith.constant 1.000000e+00 : f32
    %16 = vector.broadcast %cst_12 : f32 to vector<1x1x8xf32>
    %17 = arith.subf %16, %15 : vector<1x1x8xf32>
    %cst_13 = arith.constant -1.000000e+09 : f32
    %18 = vector.broadcast %cst_13 : f32 to vector<1x1x8xf32>
    %19 = arith.mulf %17, %18 : vector<1x1x8xf32>
    %cst_14 = arith.constant 0.000000e+00 : f32
    %20 = vector.broadcast %cst_14 : f32 to vector<8x32xf32>
    %21 = vector.extract_strided_slice %14 {offsets = [0, 0, 0], sizes = [1, 8, 8], strides = [1, 1, 1]} : vector<1x8x96xbf16> to vector<1x8x8xbf16>
    %22 = vector.extract_strided_slice %14 {offsets = [0, 0, 32], sizes = [1, 8, 8], strides = [1, 1, 1]} : vector<1x8x96xbf16> to vector<1x8x8xbf16>
    %23 = vector.extract_strided_slice %14 {offsets = [0, 0, 64], sizes = [1, 8, 8], strides = [1, 1, 1]} : vector<1x8x96xbf16> to vector<1x8x8xbf16>
    "tpu.trace_start"() <{level = 10 : i32, message = "bqd,bkd->bqk"}> : () -> ()
    %cst_15 = arith.constant dense<0.000000e+00> : vector<1x8x8xf32>
    %24 = tpu.matmul %21, %22, %cst_15 {dimension_numbers = #tpu.dot_dimension_numbers<[2], [2], [1], [1], [0, 0, 0, 1, 1, 1], [0], [0]>} : vector<1x8x8xbf16>, vector<1x8x8xbf16>, vector<1x8x8xf32> -> vector<1x8x8xf32>
    "tpu.trace_stop"() : () -> ()
    %cst_16 = arith.constant 0.353553385 : f32
    %25 = vector.broadcast %cst_16 : f32 to vector<1x8x8xf32>
    %26 = arith.mulf %24, %25 : vector<1x8x8xf32>
    %27 = vector.broadcast %19 : vector<1x1x8xf32> to vector<1x8x8xf32>
    %28 = arith.addf %26, %27 : vector<1x8x8xf32>
    %cst_17 = arith.constant dense<0xFF800000> : vector<1x8xf32>
    %29 = vector.multi_reduction <maximumf>, %28, %cst_17 [2] : vector<1x8x8xf32> to vector<1x8xf32>
    %30 = vector.shape_cast %29 : vector<1x8xf32> to vector<1x8x1xf32>
    %31 = vector.broadcast %30 : vector<1x8x1xf32> to vector<1x8x8xf32>
    %32 = arith.subf %28, %31 : vector<1x8x8xf32>
    %33 = math.exp %32 : vector<1x8x8xf32>
    %cst_18 = arith.constant dense<0.000000e+00> : vector<1x8xf32>
    %34 = vector.multi_reduction <add>, %33, %cst_18 [2] : vector<1x8x8xf32> to vector<1x8xf32>
    %35 = vector.shape_cast %34 : vector<1x8xf32> to vector<1x8x1xf32>
    %36 = tpu.reciprocal %35 : vector<1x8x1xf32> -> vector<1x8x1xf32>
    %37 = vector.broadcast %36 : vector<1x8x1xf32> to vector<1x8x8xf32>
    %38 = arith.mulf %33, %37 : vector<1x8x8xf32>
    %39 = arith.truncf %38 : vector<1x8x8xf32> to vector<1x8x8xbf16>
    "tpu.trace_start"() <{level = 10 : i32, message = "bqk,bkd->bqd"}> : () -> ()
    %cst_19 = arith.constant dense<0.000000e+00> : vector<1x8x8xf32>
    %40 = tpu.matmul %39, %23, %cst_19 {dimension_numbers = #tpu.dot_dimension_numbers<[2], [1], [1], [2], [0, 0, 0, 1, 1, 2], [0], [0]>} : vector<1x8x8xbf16>, vector<1x8x8xbf16>, vector<1x8x8xf32> -> vector<1x8x8xf32>
    "tpu.trace_stop"() : () -> ()
    %41 = vector.shape_cast %40 : vector<1x8x8xf32> to vector<8x8xf32>
    %42 = arith.truncf %41 : vector<8x8xf32> to vector<8x8xbf16>
    %c0_20 = arith.constant 0 : index
    %c0_21 = arith.constant 0 : index
    %43 = vector.load %arg6[%c0_20, %c0_21] : memref<32x32xbf16, #tpu.memory_space<vmem>>, vector<8x32xbf16>
    %cst_22 = arith.constant dense<0.000000e+00> : vector<8x32xf32>
    %44 = tpu.matmul %42, %43, %cst_22 {dimension_numbers = #tpu.dot_dimension_numbers<[1], [0], [0], [1], [0, 0, 1, 1], [], []>} : vector<8x8xbf16>, vector<8x32xbf16>, vector<8x32xf32> -> vector<8x32xf32>
    %45 = arith.addf %20, %44 : vector<8x32xf32>
    %46 = vector.extract_strided_slice %14 {offsets = [0, 0, 8], sizes = [1, 8, 8], strides = [1, 1, 1]} : vector<1x8x96xbf16> to vector<1x8x8xbf16>
    %47 = vector.extract_strided_slice %14 {offsets = [0, 0, 40], sizes = [1, 8, 8], strides = [1, 1, 1]} : vector<1x8x96xbf16> to vector<1x8x8xbf16>
    %48 = vector.extract_strided_slice %14 {offsets = [0, 0, 72], sizes = [1, 8, 8], strides = [1, 1, 1]} : vector<1x8x96xbf16> to vector<1x8x8xbf16>
    "tpu.trace_start"() <{level = 10 : i32, message = "bqd,bkd->bqk"}> : () -> ()
    %cst_23 = arith.constant dense<0.000000e+00> : vector<1x8x8xf32>
    %49 = tpu.matmul %46, %47, %cst_23 {dimension_numbers = #tpu.dot_dimension_numbers<[2], [2], [1], [1], [0, 0, 0, 1, 1, 1], [0], [0]>} : vector<1x8x8xbf16>, vector<1x8x8xbf16>, vector<1x8x8xf32> -> vector<1x8x8xf32>
    "tpu.trace_stop"() : () -> ()
    %cst_24 = arith.constant 0.353553385 : f32
    %50 = vector.broadcast %cst_24 : f32 to vector<1x8x8xf32>
    %51 = arith.mulf %49, %50 : vector<1x8x8xf32>
    %52 = vector.broadcast %19 : vector<1x1x8xf32> to vector<1x8x8xf32>
    %53 = arith.addf %51, %52 : vector<1x8x8xf32>
    %cst_25 = arith.constant dense<0xFF800000> : vector<1x8xf32>
    %54 = vector.multi_reduction <maximumf>, %53, %cst_25 [2] : vector<1x8x8xf32> to vector<1x8xf32>
    %55 = vector.shape_cast %54 : vector<1x8xf32> to vector<1x8x1xf32>
    %56 = vector.broadcast %55 : vector<1x8x1xf32> to vector<1x8x8xf32>
    %57 = arith.subf %53, %56 : vector<1x8x8xf32>
    %58 = math.exp %57 : vector<1x8x8xf32>
    %cst_26 = arith.constant dense<0.000000e+00> : vector<1x8xf32>
    %59 = vector.multi_reduction <add>, %58, %cst_26 [2] : vector<1x8x8xf32> to vector<1x8xf32>
    %60 = vector.shape_cast %59 : vector<1x8xf32> to vector<1x8x1xf32>
    %61 = tpu.reciprocal %60 : vector<1x8x1xf32> -> vector<1x8x1xf32>
    %62 = vector.broadcast %61 : vector<1x8x1xf32> to vector<1x8x8xf32>
    %63 = arith.mulf %58, %62 : vector<1x8x8xf32>
    %64 = arith.truncf %63 : vector<1x8x8xf32> to vector<1x8x8xbf16>
    "tpu.trace_start"() <{level = 10 : i32, message = "bqk,bkd->bqd"}> : () -> ()
    %cst_27 = arith.constant dense<0.000000e+00> : vector<1x8x8xf32>
    %65 = tpu.matmul %64, %48, %cst_27 {dimension_numbers = #tpu.dot_dimension_numbers<[2], [1], [1], [2], [0, 0, 0, 1, 1, 2], [0], [0]>} : vector<1x8x8xbf16>, vector<1x8x8xbf16>, vector<1x8x8xf32> -> vector<1x8x8xf32>
    "tpu.trace_stop"() : () -> ()
    %66 = vector.shape_cast %65 : vector<1x8x8xf32> to vector<8x8xf32>
    %67 = arith.truncf %66 : vector<8x8xf32> to vector<8x8xbf16>
    %c8 = arith.constant 8 : index
    %c0_28 = arith.constant 0 : index
    %68 = vector.load %arg6[%c8, %c0_28] : memref<32x32xbf16, #tpu.memory_space<vmem>>, vector<8x32xbf16>
    %cst_29 = arith.constant dense<0.000000e+00> : vector<8x32xf32>
    %69 = tpu.matmul %67, %68, %cst_29 {dimension_numbers = #tpu.dot_dimension_numbers<[1], [0], [0], [1], [0, 0, 1, 1], [], []>} : vector<8x8xbf16>, vector<8x32xbf16>, vector<8x32xf32> -> vector<8x32xf32>
    %70 = arith.addf %45, %69 : vector<8x32xf32>
    %71 = vector.extract_strided_slice %14 {offsets = [0, 0, 16], sizes = [1, 8, 8], strides = [1, 1, 1]} : vector<1x8x96xbf16> to vector<1x8x8xbf16>
    %72 = vector.extract_strided_slice %14 {offsets = [0, 0, 48], sizes = [1, 8, 8], strides = [1, 1, 1]} : vector<1x8x96xbf16> to vector<1x8x8xbf16>
    %73 = vector.extract_strided_slice %14 {offsets = [0, 0, 80], sizes = [1, 8, 8], strides = [1, 1, 1]} : vector<1x8x96xbf16> to vector<1x8x8xbf16>
    "tpu.trace_start"() <{level = 10 : i32, message = "bqd,bkd->bqk"}> : () -> ()
    %cst_30 = arith.constant dense<0.000000e+00> : vector<1x8x8xf32>
    %74 = tpu.matmul %71, %72, %cst_30 {dimension_numbers = #tpu.dot_dimension_numbers<[2], [2], [1], [1], [0, 0, 0, 1, 1, 1], [0], [0]>} : vector<1x8x8xbf16>, vector<1x8x8xbf16>, vector<1x8x8xf32> -> vector<1x8x8xf32>
    "tpu.trace_stop"() : () -> ()
    %cst_31 = arith.constant 0.353553385 : f32
    %75 = vector.broadcast %cst_31 : f32 to vector<1x8x8xf32>
    %76 = arith.mulf %74, %75 : vector<1x8x8xf32>
    %77 = vector.broadcast %19 : vector<1x1x8xf32> to vector<1x8x8xf32>
    %78 = arith.addf %76, %77 : vector<1x8x8xf32>
    %cst_32 = arith.constant dense<0xFF800000> : vector<1x8xf32>
    %79 = vector.multi_reduction <maximumf>, %78, %cst_32 [2] : vector<1x8x8xf32> to vector<1x8xf32>
    %80 = vector.shape_cast %79 : vector<1x8xf32> to vector<1x8x1xf32>
    %81 = vector.broadcast %80 : vector<1x8x1xf32> to vector<1x8x8xf32>
    %82 = arith.subf %78, %81 : vector<1x8x8xf32>
    %83 = math.exp %82 : vector<1x8x8xf32>
    %cst_33 = arith.constant dense<0.000000e+00> : vector<1x8xf32>
    %84 = vector.multi_reduction <add>, %83, %cst_33 [2] : vector<1x8x8xf32> to vector<1x8xf32>
    %85 = vector.shape_cast %84 : vector<1x8xf32> to vector<1x8x1xf32>
    %86 = tpu.reciprocal %85 : vector<1x8x1xf32> -> vector<1x8x1xf32>
    %87 = vector.broadcast %86 : vector<1x8x1xf32> to vector<1x8x8xf32>
    %88 = arith.mulf %83, %87 : vector<1x8x8xf32>
    %89 = arith.truncf %88 : vector<1x8x8xf32> to vector<1x8x8xbf16>
    "tpu.trace_start"() <{level = 10 : i32, message = "bqk,bkd->bqd"}> : () -> ()
    %cst_34 = arith.constant dense<0.000000e+00> : vector<1x8x8xf32>
    %90 = tpu.matmul %89, %73, %cst_34 {dimension_numbers = #tpu.dot_dimension_numbers<[2], [1], [1], [2], [0, 0, 0, 1, 1, 2], [0], [0]>} : vector<1x8x8xbf16>, vector<1x8x8xbf16>, vector<1x8x8xf32> -> vector<1x8x8xf32>
    "tpu.trace_stop"() : () -> ()
    %91 = vector.shape_cast %90 : vector<1x8x8xf32> to vector<8x8xf32>
    %92 = arith.truncf %91 : vector<8x8xf32> to vector<8x8xbf16>
    %c16 = arith.constant 16 : index
    %c0_35 = arith.constant 0 : index
    %93 = vector.load %arg6[%c16, %c0_35] : memref<32x32xbf16, #tpu.memory_space<vmem>>, vector<8x32xbf16>
    %cst_36 = arith.constant dense<0.000000e+00> : vector<8x32xf32>
    %94 = tpu.matmul %92, %93, %cst_36 {dimension_numbers = #tpu.dot_dimension_numbers<[1], [0], [0], [1], [0, 0, 1, 1], [], []>} : vector<8x8xbf16>, vector<8x32xbf16>, vector<8x32xf32> -> vector<8x32xf32>
    %95 = arith.addf %70, %94 : vector<8x32xf32>
    %96 = vector.extract_strided_slice %14 {offsets = [0, 0, 24], sizes = [1, 8, 8], strides = [1, 1, 1]} : vector<1x8x96xbf16> to vector<1x8x8xbf16>
    %97 = vector.extract_strided_slice %14 {offsets = [0, 0, 56], sizes = [1, 8, 8], strides = [1, 1, 1]} : vector<1x8x96xbf16> to vector<1x8x8xbf16>
    %98 = vector.extract_strided_slice %14 {offsets = [0, 0, 88], sizes = [1, 8, 8], strides = [1, 1, 1]} : vector<1x8x96xbf16> to vector<1x8x8xbf16>
    "tpu.trace_start"() <{level = 10 : i32, message = "bqd,bkd->bqk"}> : () -> ()
    %cst_37 = arith.constant dense<0.000000e+00> : vector<1x8x8xf32>
    %99 = tpu.matmul %96, %97, %cst_37 {dimension_numbers = #tpu.dot_dimension_numbers<[2], [2], [1], [1], [0, 0, 0, 1, 1, 1], [0], [0]>} : vector<1x8x8xbf16>, vector<1x8x8xbf16>, vector<1x8x8xf32> -> vector<1x8x8xf32>
    "tpu.trace_stop"() : () -> ()
    %cst_38 = arith.constant 0.353553385 : f32
    %100 = vector.broadcast %cst_38 : f32 to vector<1x8x8xf32>
    %101 = arith.mulf %99, %100 : vector<1x8x8xf32>
    %102 = vector.broadcast %19 : vector<1x1x8xf32> to vector<1x8x8xf32>
    %103 = arith.addf %101, %102 : vector<1x8x8xf32>
    %cst_39 = arith.constant dense<0xFF800000> : vector<1x8xf32>
    %104 = vector.multi_reduction <maximumf>, %103, %cst_39 [2] : vector<1x8x8xf32> to vector<1x8xf32>
    %105 = vector.shape_cast %104 : vector<1x8xf32> to vector<1x8x1xf32>
    %106 = vector.broadcast %105 : vector<1x8x1xf32> to vector<1x8x8xf32>
    %107 = arith.subf %103, %106 : vector<1x8x8xf32>
    %108 = math.exp %107 : vector<1x8x8xf32>
    %cst_40 = arith.constant dense<0.000000e+00> : vector<1x8xf32>
    %109 = vector.multi_reduction <add>, %108, %cst_40 [2] : vector<1x8x8xf32> to vector<1x8xf32>
    %110 = vector.shape_cast %109 : vector<1x8xf32> to vector<1x8x1xf32>
    %111 = tpu.reciprocal %110 : vector<1x8x1xf32> -> vector<1x8x1xf32>
    %112 = vector.broadcast %111 : vector<1x8x1xf32> to vector<1x8x8xf32>
    %113 = arith.mulf %108, %112 : vector<1x8x8xf32>
    %114 = arith.truncf %113 : vector<1x8x8xf32> to vector<1x8x8xbf16>
    "tpu.trace_start"() <{level = 10 : i32, message = "bqk,bkd->bqd"}> : () -> ()
    %cst_41 = arith.constant dense<0.000000e+00> : vector<1x8x8xf32>
    %115 = tpu.matmul %114, %98, %cst_41 {dimension_numbers = #tpu.dot_dimension_numbers<[2], [1], [1], [2], [0, 0, 0, 1, 1, 2], [0], [0]>} : vector<1x8x8xbf16>, vector<1x8x8xbf16>, vector<1x8x8xf32> -> vector<1x8x8xf32>
    "tpu.trace_stop"() : () -> ()
    %116 = vector.shape_cast %115 : vector<1x8x8xf32> to vector<8x8xf32>
    %117 = arith.truncf %116 : vector<8x8xf32> to vector<8x8xbf16>
    %c24 = arith.constant 24 : index
    %c0_42 = arith.constant 0 : index
    %118 = vector.load %arg6[%c24, %c0_42] : memref<32x32xbf16, #tpu.memory_space<vmem>>, vector<8x32xbf16>
    %cst_43 = arith.constant dense<0.000000e+00> : vector<8x32xf32>
    %119 = tpu.matmul %117, %118, %cst_43 {dimension_numbers = #tpu.dot_dimension_numbers<[1], [0], [0], [1], [0, 0, 1, 1], [], []>} : vector<8x8xbf16>, vector<8x32xbf16>, vector<8x32xf32> -> vector<8x32xf32>
    %120 = arith.addf %95, %119 : vector<8x32xf32>
    %c0_44 = arith.constant 0 : index
    %c0_45 = arith.constant 0 : index
    %121 = vector.load %arg7[%c0_44, %c0_45] : memref<1x32xf32, #tpu.memory_space<vmem>>, vector<1x32xf32>
    %122 = vector.broadcast %121 : vector<1x32xf32> to vector<8x32xf32>
    %123 = arith.addf %120, %122 : vector<8x32xf32>
    %124 = vector.shape_cast %5 : vector<1x8x32xf32> to vector<8x32xf32>
    %125 = arith.addf %124, %123 : vector<8x32xf32>
    %cst_46 = arith.constant dense<0.000000e+00> : vector<8xf32>
    %126 = vector.multi_reduction <add>, %125, %cst_46 [1] : vector<8x32xf32> to vector<8xf32>
    %127 = vector.shape_cast %126 : vector<8xf32> to vector<8x1xf32>
    %cst_47 = arith.constant 3.200000e+01 : f32
    %128 = vector.broadcast %cst_47 : f32 to vector<8x1xf32>
    %129 = arith.divf %127, %128 : vector<8x1xf32>
    %130 = vector.broadcast %129 : vector<8x1xf32> to vector<8x32xf32>
    %131 = arith.subf %125, %130 : vector<8x32xf32>
    %132 = arith.mulf %131, %131 : vector<8x32xf32>
    %cst_48 = arith.constant dense<0.000000e+00> : vector<8xf32>
    %133 = vector.multi_reduction <add>, %132, %cst_48 [1] : vector<8x32xf32> to vector<8xf32>
    %134 = vector.shape_cast %133 : vector<8xf32> to vector<8x1xf32>
    %cst_49 = arith.constant 3.200000e+01 : f32
    %135 = vector.broadcast %cst_49 : f32 to vector<8x1xf32>
    %136 = arith.divf %134, %135 : vector<8x1xf32>
    %137 = vector.broadcast %129 : vector<8x1xf32> to vector<8x32xf32>
    %138 = arith.subf %125, %137 : vector<8x32xf32>
    %cst_50 = arith.constant 9.99999974E-6 : f32
    %139 = vector.broadcast %cst_50 : f32 to vector<8x1xf32>
    %140 = arith.addf %136, %139 : vector<8x1xf32>
    %141 = math.rsqrt %140 : vector<8x1xf32>
    %142 = vector.broadcast %141 : vector<8x1xf32> to vector<8x32xf32>
    %143 = arith.mulf %138, %142 : vector<8x32xf32>
    %c0_51 = arith.constant 0 : index
    %c0_52 = arith.constant 0 : index
    %144 = vector.load %arg8[%c0_51, %c0_52] : memref<1x32xf32, #tpu.memory_space<vmem>>, vector<1x32xf32>
    %145 = vector.broadcast %144 : vector<1x32xf32> to vector<8x32xf32>
    %146 = arith.mulf %143, %145 : vector<8x32xf32>
    %c0_53 = arith.constant 0 : index
    %c0_54 = arith.constant 0 : index
    %147 = vector.load %arg9[%c0_53, %c0_54] : memref<1x32xf32, #tpu.memory_space<vmem>>, vector<1x32xf32>
    %148 = vector.broadcast %147 : vector<1x32xf32> to vector<8x32xf32>
    %149 = arith.addf %146, %148 : vector<8x32xf32>
    %150 = arith.truncf %149 : vector<8x32xf32> to vector<8x32xbf16>
    %cst_55 = arith.constant 0.000000e+00 : f32
    %151 = vector.broadcast %cst_55 : f32 to vector<8x32xf32>
    %c0_56 = arith.constant 0 : index
    %c0_57 = arith.constant 0 : index
    %152 = vector.load %arg10[%c0_56, %c0_57] : memref<32x64xbf16, #tpu.memory_space<vmem>>, vector<32x64xbf16>
    %cst_58 = arith.constant dense<0.000000e+00> : vector<8x64xf32>
    %153 = tpu.matmul %150, %152, %cst_58 {dimension_numbers = #tpu.dot_dimension_numbers<[1], [0], [0], [1], [0, 0, 1, 1], [], []>} : vector<8x32xbf16>, vector<32x64xbf16>, vector<8x64xf32> -> vector<8x64xf32>
    %c0_59 = arith.constant 0 : index
    %c0_60 = arith.constant 0 : index
    %154 = vector.load %arg11[%c0_59, %c0_60] : memref<1x64xf32, #tpu.memory_space<vmem>>, vector<1x64xf32>
    %155 = vector.broadcast %154 : vector<1x64xf32> to vector<8x64xf32>
    %156 = arith.addf %153, %155 : vector<8x64xf32>
    %cst_61 = arith.constant 0.000000e+00 : f32
    %157 = vector.broadcast %cst_61 : f32 to vector<8x64xf32>
    %158 = arith.maximumf %156, %157 : vector<8x64xf32>
    %159 = arith.truncf %158 : vector<8x64xf32> to vector<8x64xbf16>
    %c0_62 = arith.constant 0 : index
    %c0_63 = arith.constant 0 : index
    %160 = vector.load %arg12[%c0_62, %c0_63] : memref<64x32xbf16, #tpu.memory_space<vmem>>, vector<64x32xbf16>
    %cst_64 = arith.constant dense<0.000000e+00> : vector<8x32xf32>
    %161 = tpu.matmul %159, %160, %cst_64 {dimension_numbers = #tpu.dot_dimension_numbers<[1], [0], [0], [1], [0, 0, 1, 1], [], []>} : vector<8x64xbf16>, vector<64x32xbf16>, vector<8x32xf32> -> vector<8x32xf32>
    %162 = arith.addf %151, %161 : vector<8x32xf32>
    %c0_65 = arith.constant 0 : index
    %c0_66 = arith.constant 0 : index
    %163 = vector.load %arg13[%c0_65, %c0_66] : memref<1x32xf32, #tpu.memory_space<vmem>>, vector<1x32xf32>
    %164 = vector.broadcast %163 : vector<1x32xf32> to vector<8x32xf32>
    %165 = arith.addf %162, %164 : vector<8x32xf32>
    %166 = arith.addf %149, %165 : vector<8x32xf32>
    %cst_67 = arith.constant dense<0.000000e+00> : vector<8xf32>
    %167 = vector.multi_reduction <add>, %166, %cst_67 [1] : vector<8x32xf32> to vector<8xf32>
    %168 = vector.shape_cast %167 : vector<8xf32> to vector<8x1xf32>
    %cst_68 = arith.constant 3.200000e+01 : f32
    %169 = vector.broadcast %cst_68 : f32 to vector<8x1xf32>
    %170 = arith.divf %168, %169 : vector<8x1xf32>
    %171 = vector.broadcast %170 : vector<8x1xf32> to vector<8x32xf32>
    %172 = arith.subf %166, %171 : vector<8x32xf32>
    %173 = arith.mulf %172, %172 : vector<8x32xf32>
    %cst_69 = arith.constant dense<0.000000e+00> : vector<8xf32>
    %174 = vector.multi_reduction <add>, %173, %cst_69 [1] : vector<8x32xf32> to vector<8xf32>
    %175 = vector.shape_cast %174 : vector<8xf32> to vector<8x1xf32>
    %cst_70 = arith.constant 3.200000e+01 : f32
    %176 = vector.broadcast %cst_70 : f32 to vector<8x1xf32>
    %177 = arith.divf %175, %176 : vector<8x1xf32>
    %178 = vector.broadcast %170 : vector<8x1xf32> to vector<8x32xf32>
    %179 = arith.subf %166, %178 : vector<8x32xf32>
    %cst_71 = arith.constant 9.99999974E-6 : f32
    %180 = vector.broadcast %cst_71 : f32 to vector<8x1xf32>
    %181 = arith.addf %177, %180 : vector<8x1xf32>
    %182 = math.rsqrt %181 : vector<8x1xf32>
    %183 = vector.broadcast %182 : vector<8x1xf32> to vector<8x32xf32>
    %184 = arith.mulf %179, %183 : vector<8x32xf32>
    %c0_72 = arith.constant 0 : index
    %c0_73 = arith.constant 0 : index
    %185 = vector.load %arg14[%c0_72, %c0_73] : memref<1x32xf32, #tpu.memory_space<vmem>>, vector<1x32xf32>
    %186 = vector.broadcast %185 : vector<1x32xf32> to vector<8x32xf32>
    %187 = arith.mulf %184, %186 : vector<8x32xf32>
    %c0_74 = arith.constant 0 : index
    %c0_75 = arith.constant 0 : index
    %188 = vector.load %arg15[%c0_74, %c0_75] : memref<1x32xf32, #tpu.memory_space<vmem>>, vector<1x32xf32>
    %189 = vector.broadcast %188 : vector<1x32xf32> to vector<8x32xf32>
    %190 = arith.addf %187, %189 : vector<8x32xf32>
    %191 = vector.shape_cast %190 : vector<8x32xf32> to vector<1x8x32xf32>
    %192 = arith.truncf %191 : vector<1x8x32xf32> to vector<1x8x32xbf16>
    %c0_76 = arith.constant 0 : index
    %c0_77 = arith.constant 0 : index
    %c0_78 = arith.constant 0 : index
    %193 = vector.load %arg16[%c0_76, %c0_77, %c0_78] : memref<1x8x32xbf16, #tpu.memory_space<vmem>>, vector<1x8x32xbf16>
    tpu.vector_store %arg16[%c0_76, %c0_77, %c0_78], %192 {strides = array<i32>} : memref<1x8x32xbf16, #tpu.memory_space<vmem>>, vector<1x8x32xbf16>,
    return
  }
  func.func @transform_0(%arg0: i32) -> (i32, i32, i32) {
    %c0_i32 = arith.constant 0 : i32
    %c0_i32_0 = arith.constant 0 : i32
    %c0_i32_1 = arith.constant 0 : i32
    return %arg0, %c0_i32, %c0_i32_0 : i32, i32, i32
  }
  func.func @transform_1(%arg0: i32) -> (i32, i32, i32) {
    %c0_i32 = arith.constant 0 : i32
    %c0_i32_0 = arith.constant 0 : i32
    %c0_i32_1 = arith.constant 0 : i32
    return %arg0, %c0_i32, %c0_i32_0 : i32, i32, i32
  }
  func.func @transform_2(%arg0: i32) -> (i32, i32) {
    %c0_i32 = arith.constant 0 : i32
    %c0_i32_0 = arith.constant 0 : i32
    %c0_i32_1 = arith.constant 0 : i32
    return %c0_i32, %c0_i32_0 : i32, i32
  }
  func.func @transform_3(%arg0: i32) -> (i32, i32) {
    %c0_i32 = arith.constant 0 : i32
    %c0_i32_0 = arith.constant 0 : i32
    %c0_i32_1 = arith.constant 0 : i32
    return %c0_i32, %c0_i32_0 : i32, i32
  }
  func.func @transform_4(%arg0: i32) -> (i32, i32) {
    %c0_i32 = arith.constant 0 : i32
    %c0_i32_0 = arith.constant 0 : i32
    %c0_i32_1 = arith.constant 0 : i32
    return %c0_i32, %c0_i32_0 : i32, i32
  }
  func.func @transform_5(%arg0: i32) -> (i32, i32) {
    %c0_i32 = arith.constant 0 : i32
    %c0_i32_0 = arith.constant 0 : i32
    %c0_i32_1 = arith.constant 0 : i32
    return %c0_i32, %c0_i32_0 : i32, i32
  }
  func.func @transform_6(%arg0: i32) -> (i32, i32) {
    %c0_i32 = arith.constant 0 : i32
    %c0_i32_0 = arith.constant 0 : i32
    %c0_i32_1 = arith.constant 0 : i32
    return %c0_i32, %c0_i32_0 : i32, i32
  }
  func.func @transform_7(%arg0: i32) -> (i32, i32) {
    %c0_i32 = arith.constant 0 : i32
    %c0_i32_0 = arith.constant 0 : i32
    %c0_i32_1 = arith.constant 0 : i32
    return %c0_i32, %c0_i32_0 : i32, i32
  }
  func.func @transform_8(%arg0: i32) -> (i32, i32) {
    %c0_i32 = arith.constant 0 : i32
    %c0_i32_0 = arith.constant 0 : i32
    %c0_i32_1 = arith.constant 0 : i32
    return %c0_i32, %c0_i32_0 : i32, i32
  }
  func.func @transform_9(%arg0: i32) -> (i32, i32) {
    %c0_i32 = arith.constant 0 : i32
    %c0_i32_0 = arith.constant 0 : i32
    %c0_i32_1 = arith.constant 0 : i32
    return %c0_i32, %c0_i32_0 : i32, i32
  }
  func.func @transform_10(%arg0: i32) -> (i32, i32) {
    %c0_i32 = arith.constant 0 : i32
    %c0_i32_0 = arith.constant 0 : i32
    %c0_i32_1 = arith.constant 0 : i32
    return %c0_i32, %c0_i32_0 : i32, i32
  }
  func.func @transform_11(%arg0: i32) -> (i32, i32) {
    %c0_i32 = arith.constant 0 : i32
    %c0_i32_0 = arith.constant 0 : i32
    %c0_i32_1 = arith.constant 0 : i32
    return %c0_i32, %c0_i32_0 : i32, i32
  }
  func.func @transform_12(%arg0: i32) -> (i32, i32) {
    %c0_i32 = arith.constant 0 : i32
    %c0_i32_0 = arith.constant 0 : i32
    %c0_i32_1 = arith.constant 0 : i32
    return %c0_i32, %c0_i32_0 : i32, i32
  }
  func.func @transform_13(%arg0: i32) -> (i32, i32) {
    %c0_i32 = arith.constant 0 : i32
    %c0_i32_0 = arith.constant 0 : i32
    %c0_i32_1 = arith.constant 0 : i32
    return %c0_i32, %c0_i32_0 : i32, i32
  }
  func.func @transform_14(%arg0: i32) -> (i32, i32) {
    %c0_i32 = arith.constant 0 : i32
    %c0_i32_0 = arith.constant 0 : i32
    %c0_i32_1 = arith.constant 0 : i32
    return %c0_i32, %c0_i32_0 : i32, i32
  }
  func.func @transform_15(%arg0: i32) -> (i32, i32, i32) {
    %c0_i32 = arith.constant 0 : i32
    %c0_i32_0 = arith.constant 0 : i32
    %c0_i32_1 = arith.constant 0 : i32
    return %arg0, %c0_i32, %c0_i32_0 : i32, i32, i32
  }
}

module attributes {stable_mosaic.version = 11 : i64} {
  func.func @encoder_layer_kernel(%arg0: i32, %arg1: memref<1x8x32xf32, #tpu.memory_space<vmem>>, %arg2: memref<1x1x8xf32, #tpu.memory_space<vmem>>, %arg3: memref<8x32xf32, #tpu.memory_space<vmem>>, %arg4: memref<32x96xbf16, #tpu.memory_space<vmem>>, %arg5: memref<1x96xf32, #tpu.memory_space<vmem>>, %arg6: memref<32x32xbf16, #tpu.memory_space<vmem>>, %arg7: memref<1x32xf32, #tpu.memory_space<vmem>>, %arg8: memref<1x32xf32, #tpu.memory_space<vmem>>, %arg9: memref<1x32xf32, #tpu.memory_space<vmem>>, %arg10: memref<32x64xbf16, #tpu.memory_space<vmem>>, %arg11: memref<1x64xf32, #tpu.memory_space<vmem>>, %arg12: memref<64x32xbf16, #tpu.memory_space<vmem>>, %arg13: memref<1x32xf32, #tpu.memory_space<vmem>>, %arg14: memref<1x32xf32, #tpu.memory_space<vmem>>, %arg15: memref<1x32xf32, #tpu.memory_space<vmem>>, %arg16: memref<1x8x32xbf16, #tpu.memory_space<vmem>>) attributes {dimension_semantics = [#tpu.dimension_semantics<parallel>], iteration_bounds = array<i64: 2>, scalar_prefetch = 0 : i64, scratch_operands = 0 : i64, tpu.core_type = #tpu.core_type<tc>, window_params = [{transform_indices = @transform_0, window_bounds = array<i64: 1, 8, 32>}, {transform_indices = @transform_1, window_bounds = array<i64: 1, 1, 8>}, {pipeline_mode = #tpu.pipeline_mode<synchronous>, transform_indices = @transform_2, window_bounds = array<i64: 8, 32>}, {pipeline_mode = #tpu.pipeline_mode<synchronous>, transform_indices = @transform_3, window_bounds = array<i64: 32, 96>}, {pipeline_mode = #tpu.pipeline_mode<synchronous>, transform_indices = @transform_4, window_bounds = array<i64: 1, 96>}, {pipeline_mode = #tpu.pipeline_mode<synchronous>, transform_indices = @transform_5, window_bounds = array<i64: 32, 32>}, {pipeline_mode = #tpu.pipeline_mode<synchronous>, transform_indices = @transform_6, window_bounds = array<i64: 1, 32>}, {pipeline_mode = #tpu.pipeline_mode<synchronous>, transform_indices = @transform_7, window_bounds = array<i64: 1, 32>}, {pipeline_mode = #tpu.pipeline_mode<synchronous>, transform_indices = @transform_8, window_bounds = array<i64: 1, 32>}, {pipeline_mode = #tpu.pipeline_mode<synchronous>, transform_indices = @transform_9, window_bounds = array<i64: 32, 64>}, {pipeline_mode = #tpu.pipeline_mode<synchronous>, transform_indices = @transform_10, window_bounds = array<i64: 1, 64>}, {pipeline_mode = #tpu.pipeline_mode<synchronous>, transform_indices = @transform_11, window_bounds = array<i64: 64, 32>}, {pipeline_mode = #tpu.pipeline_mode<synchronous>, transform_indices = @transform_12, window_bounds = array<i64: 1, 32>}, {pipeline_mode = #tpu.pipeline_mode<synchronous>, transform_indices = @transform_13, window_bounds = array<i64: 1, 32>}, {pipeline_mode = #tpu.pipeline_mode<synchronous>, transform_indices = @transform_14, window_bounds = array<i64: 1, 32>}, {transform_indices = @transform_15, window_bounds = array<i64: 1, 8, 32>}]} {
    %c0 = arith.constant 0 : index
    %c0_0 = arith.constant 0 : index
    %c0_1 = arith.constant 0 : index
    %0 = vector.load %arg1[%c0, %c0_0, %c0_1] : memref<1x8x32xf32, #tpu.memory_space<vmem>>, vector<1x8x32xf32>
    %cst = arith.constant 5.65685415 : f32
    %1 = vector.broadcast %cst : f32 to vector<1x8x32xf32>
    %2 = arith.mulf %0, %1 : vector<1x8x32xf32>
    %c0_2 = arith.constant 0 : index
    %c0_3 = arith.constant 0 : index
    %3 = vector.load %arg3[%c0_2, %c0_3] : memref<8x32xf32, #tpu.memory_space<vmem>>, vector<8x32xf32>
    %4 = vector.shape_cast %3 : vector<8x32xf32> to vector<1x8x32xf32>
    %5 = arith.addf %2, %4 : vector<1x8x32xf32>
    %6 = vector.shape_cast %5 : vector<1x8x32xf32> to vector<8x32xf32>
    %7 = arith.truncf %6 : vector<8x32xf32> to vector<8x32xbf16>
    %c0_4 = arith.constant 0 : index
    %c0_5 = arith.constant 0 : index
    %8 = vector.load %arg4[%c0_4, %c0_5] : memref<32x96xbf16, #tpu.memory_space<vmem>>, vector<32x96xbf16>
    %cst_6 = arith.constant dense<0.000000e+00> : vector<8x96xf32>
    %9 = tpu.matmul %7, %8, %cst_6 {dimension_numbers = #tpu.dot_dimension_numbers<[1], [0], [0], [1], [0, 0, 1, 1], [], []>} : vector<8x32xbf16>, vector<32x96xbf16>, vector<8x96xf32> -> vector<8x96xf32>
    %c0_7 = arith.constant 0 : index
    %c0_8 = arith.constant 0 : index
    %10 = vector.load %arg5[%c0_7, %c0_8] : memref<1x96xf32, #tpu.memory_space<vmem>>, vector<1x96xf32>
    %11 = vector.broadcast %10 : vector<1x96xf32> to vector<8x96xf32>
    %12 = arith.addf %9, %11 : vector<8x96xf32>
    %13 = vector.shape_cast %12 : vector<8x96xf32> to vector<1x8x96xf32>
    %14 = arith.truncf %13 : vector<1x8x96xf32> to vector<1x8x96xbf16>
    %c0_9 = arith.constant 0 : index
    %c0_10 = arith.constant 0 : index
    %c0_11 = arith.constant 0 : index
    %15 = vector.load %arg2[%c0_9, %c0_10, %c0_11] : memref<1x1x8xf32, #tpu.memory_space<vmem>>, vector<1x1x8xf32>
    %cst_12 = arith.constant 1.000000e+00 : f32
    %16 = vector.broadcast %cst_12 : f32 to vector<1x1x8xf32>
    %17 = arith.subf %16, %15 : vector<1x1x8xf32>
    %cst_13 = arith.constant -1.000000e+09 : f32
    %18 = vector.broadcast %cst_13 : f32 to vector<1x1x8xf32>
    %19 = arith.mulf %17, %18 : vector<1x1x8xf32>
    %cst_14 = arith.constant 0.000000e+00 : f32
    %20 = vector.broadcast %cst_14 : f32 to vector<8x32xf32>
    %21 = vector.extract_strided_slice %14 {offsets = [0, 0, 0], sizes = [1, 8, 8], strides = [1, 1, 1]} : vector<1x8x96xbf16> to vector<1x8x8xbf16>
    %22 = vector.extract_strided_slice %14 {offsets = [0, 0, 32], sizes = [1, 8, 8], strides = [1, 1, 1]} : vector<1x8x96xbf16> to vector<1x8x8xbf16>
    %23 = vector.extract_strided_slice %14 {offsets = [0, 0, 64], sizes = [1, 8, 8], strides = [1, 1, 1]} : vector<1x8x96xbf16> to vector<1x8x8xbf16>
    "tpu.trace_start"() <{level = 10 : i32, message = "bqd,bkd->bqk"}> : () -> ()
    %cst_15 = arith.constant dense<0.000000e+00> : vector<1x8x8xf32>
    %24 = tpu.matmul %21, %22, %cst_15 {dimension_numbers = #tpu.dot_dimension_numbers<[2], [2], [1], [1], [0, 0, 0, 1, 1, 1], [0], [0]>} : vector<1x8x8xbf16>, vector<1x8x8xbf16>, vector<1x8x8xf32> -> vector<1x8x8xf32>
    "tpu.trace_stop"() : () -> ()
    %cst_16 = arith.constant 0.353553385 : f32
    %25 = vector.broadcast %cst_16 : f32 to vector<1x8x8xf32>
    %26 = arith.mulf %24, %25 : vector<1x8x8xf32>
    %27 = vector.broadcast %19 : vector<1x1x8xf32> to vector<1x8x8xf32>
    %28 = arith.addf %26, %27 : vector<1x8x8xf32>
    %cst_17 = arith.constant dense<0xFF800000> : vector<1x8xf32>
    %29 = vector.multi_reduction <maximumf>, %28, %cst_17 [2] : vector<1x8x8xf32> to vector<1x8xf32>
    %30 = vector.shape_cast %29 : vector<1x8xf32> to vector<1x8x1xf32>
    %31 = vector.broadcast %30 : vector<1x8x1xf32> to vector<1x8x8xf32>
    %32 = arith.subf %28, %31 : vector<1x8x8xf32>
    %33 = math.exp %32 : vector<1x8x8xf32>
    %cst_18 = arith.constant dense<0.000000e+00> : vector<1x8xf32>
    %34 = vector.multi_reduction <add>, %33, %cst_18 [2] : vector<1x8x8xf32> to vector<1x8xf32>
    %35 = vector.shape_cast %34 : vector<1x8xf32> to vector<1x8x1xf32>
    %36 = tpu.reciprocal %35 : vector<1x8x1xf32> -> vector<1x8x1xf32>
    %37 = vector.broadcast %36 : vector<1x8x1xf32> to vector<1x8x8xf32>
    %38 = arith.mulf %33, %37 : vector<1x8x8xf32>
    %39 = arith.truncf %38 : vector<1x8x8xf32> to vector<1x8x8xbf16>
    "tpu.trace_start"() <{level = 10 : i32, message = "bqk,bkd->bqd"}> : () -> ()
    %cst_19 = arith.constant dense<0.000000e+00> : vector<1x8x8xf32>
    %40 = tpu.matmul %39, %23, %cst_19 {dimension_numbers = #tpu.dot_dimension_numbers<[2], [1], [1], [2], [0, 0, 0, 1, 1, 2], [0], [0]>} : vector<1x8x8xbf16>, vector<1x8x8xbf16>, vector<1x8x8xf32> -> vector<1x8x8xf32>
    "tpu.trace_stop"() : () -> ()
    %41 = vector.shape_cast %40 : vector<1x8x8xf32> to vector<8x8xf32>
    %42 = arith.truncf %41 : vector<8x8xf32> to vector<8x8xbf16>
    %c0_20 = arith.constant 0 : index
    %c0_21 = arith.constant 0 : index
    %43 = vector.load %arg6[%c0_20, %c0_21] : memref<32x32xbf16, #tpu.memory_space<vmem>>, vector<8x32xbf16>
    %cst_22 = arith.constant dense<0.000000e+00> : vector<8x32xf32>
    %44 = tpu.matmul %42, %43, %cst_22 {dimension_numbers = #tpu.dot_dimension_numbers<[1], [0], [0], [1], [0, 0, 1, 1], [], []>} : vector<8x8xbf16>, vector<8x32xbf16>, vector<8x32xf32> -> vector<8x32xf32>
    %45 = arith.addf %20, %44 : vector<8x32xf32>
    %46 = vector.extract_strided_slice %14 {offsets = [0, 0, 8], sizes = [1, 8, 8], strides = [1, 1, 1]} : vector<1x8x96xbf16> to vector<1x8x8xbf16>
    %47 = vector.extract_strided_slice %14 {offsets = [0, 0, 40], sizes = [1, 8, 8], strides = [1, 1, 1]} : vector<1x8x96xbf16> to vector<1x8x8xbf16>
    %48 = vector.extract_strided_slice %14 {offsets = [0, 0, 72], sizes = [1, 8, 8], strides = [1, 1, 1]} : vector<1x8x96xbf16> to vector<1x8x8xbf16>
    "tpu.trace_start"() <{level = 10 : i32, message = "bqd,bkd->bqk"}> : () -> ()
    %cst_23 = arith.constant dense<0.000000e+00> : vector<1x8x8xf32>
    %49 = tpu.matmul %46, %47, %cst_23 {dimension_numbers = #tpu.dot_dimension_numbers<[2], [2], [1], [1], [0, 0, 0, 1, 1, 1], [0], [0]>} : vector<1x8x8xbf16>, vector<1x8x8xbf16>, vector<1x8x8xf32> -> vector<1x8x8xf32>
    "tpu.trace_stop"() : () -> ()
    %cst_24 = arith.constant 0.353553385 : f32
    %50 = vector.broadcast %cst_24 : f32 to vector<1x8x8xf32>
    %51 = arith.mulf %49, %50 : vector<1x8x8xf32>
    %52 = vector.broadcast %19 : vector<1x1x8xf32> to vector<1x8x8xf32>
    %53 = arith.addf %51, %52 : vector<1x8x8xf32>
    %cst_25 = arith.constant dense<0xFF800000> : vector<1x8xf32>
    %54 = vector.multi_reduction <maximumf>, %53, %cst_25 [2] : vector<1x8x8xf32> to vector<1x8xf32>
    %55 = vector.shape_cast %54 : vector<1x8xf32> to vector<1x8x1xf32>
    %56 = vector.broadcast %55 : vector<1x8x1xf32> to vector<1x8x8xf32>
    %57 = arith.subf %53, %56 : vector<1x8x8xf32>
    %58 = math.exp %57 : vector<1x8x8xf32>
    %cst_26 = arith.constant dense<0.000000e+00> : vector<1x8xf32>
    %59 = vector.multi_reduction <add>, %58, %cst_26 [2] : vector<1x8x8xf32> to vector<1x8xf32>
    %60 = vector.shape_cast %59 : vector<1x8xf32> to vector<1x8x1xf32>
    %61 = tpu.reciprocal %60 : vector<1x8x1xf32> -> vector<1x8x1xf32>
    %62 = vector.broadcast %61 : vector<1x8x1xf32> to vector<1x8x8xf32>
    %63 = arith.mulf %58, %62 : vector<1x8x8xf32>
    %64 = arith.truncf %63 : vector<1x8x8xf32> to vector<1x8x8xbf16>
    "tpu.trace_start"() <{level = 10 : i32, message = "bqk,bkd->bqd"}> : () -> ()
    %cst_27 = arith.constant dense<0.000000e+00> : vector<1x8x8xf32>
    %65 = tpu.matmul %64, %48, %cst_27 {dimension_numbers = #tpu.dot_dimension_numbers<[2], [1], [1], [2], [0, 0, 0, 1, 1, 2], [0], [0]>} : vector<1x8x8xbf16>, vector<1x8x8xbf16>, vector<1x8x8xf32> -> vector<1x8x8xf32>
    "tpu.trace_stop"() : () -> ()
    %66 = vector.shape_cast %65 : vector<1x8x8xf32> to vector<8x8xf32>
    %67 = arith.truncf %66 : vector<8x8xf32> to vector<8x8xbf16>
    %c8 = arith.constant 8 : index
    %c0_28 = arith.constant 0 : index
    %68 = vector.load %arg6[%c8, %c0_28] : memref<32x32xbf16, #tpu.memory_space<vmem>>, vector<8x32xbf16>
    %cst_29 = arith.constant dense<0.000000e+00> : vector<8x32xf32>
    %69 = tpu.matmul %67, %68, %cst_29 {dimension_numbers = #tpu.dot_dimension_numbers<[1], [0], [0], [1], [0, 0, 1, 1], [], []>} : vector<8x8xbf16>, vector<8x32xbf16>, vector<8x32xf32> -> vector<8x32xf32>
    %70 = arith.addf %45, %69 : vector<8x32xf32>
    %71 = vector.extract_strided_slice %14 {offsets = [0, 0, 16], sizes = [1, 8, 8], strides = [1, 1, 1]} : vector<1x8x96xbf16> to vector<1x8x8xbf16>
    %72 = vector.extract_strided_slice %14 {offsets = [0, 0, 48], sizes = [1, 8, 8], strides = [1, 1, 1]} : vector<1x8x96xbf16> to vector<1x8x8xbf16>
    %73 = vector.extract_strided_slice %14 {offsets = [0, 0, 80], sizes = [1, 8, 8], strides = [1, 1, 1]} : vector<1x8x96xbf16> to vector<1x8x8xbf16>
    "tpu.trace_start"() <{level = 10 : i32, message = "bqd,bkd->bqk"}> : () -> ()
    %cst_30 = arith.constant dense<0.000000e+00> : vector<1x8x8xf32>
    %74 = tpu.matmul %71, %72, %cst_30 {dimension_numbers = #tpu.dot_dimension_numbers<[2], [2], [1], [1], [0, 0, 0, 1, 1, 1], [0], [0]>} : vector<1x8x8xbf16>, vector<1x8x8xbf16>, vector<1x8x8xf32> -> vector<1x8x8xf32>
    "tpu.trace_stop"() : () -> ()
    %cst_31 = arith.constant 0.353553385 : f32
    %75 = vector.broadcast %cst_31 : f32 to vector<1x8x8xf32>
    %76 = arith.mulf %74, %75 : vector<1x8x8xf32>
    %77 = vector.broadcast %19 : vector<1x1x8xf32> to vector<1x8x8xf32>
    %78 = arith.addf %76, %77 : vector<1x8x8xf32>
    %cst_32 = arith.constant dense<0xFF800000> : vector<1x8xf32>
    %79 = vector.multi_reduction <maximumf>, %78, %cst_32 [2] : vector<1x8x8xf32> to vector<1x8xf32>
    %80 = vector.shape_cast %79 : vector<1x8xf32> to vector<1x8x1xf32>
    %81 = vector.broadcast %80 : vector<1x8x1xf32> to vector<1x8x8xf32>
    %82 = arith.subf %78, %81 : vector<1x8x8xf32>
    %83 = math.exp %82 : vector<1x8x8xf32>
    %cst_33 = arith.constant dense<0.000000e+00> : vector<1x8xf32>
    %84 = vector.multi_reduction <add>, %83, %cst_33 [2] : vector<1x8x8xf32> to vector<1x8xf32>
    %85 = vector.shape_cast %84 : vector<1x8xf32> to vector<1x8x1xf32>
    %86 = tpu.reciprocal %85 : vector<1x8x1xf32> -> vector<1x8x1xf32>
    %87 = vector.broadcast %86 : vector<1x8x1xf32> to vector<1x8x8xf32>
    %88 = arith.mulf %83, %87 : vector<1x8x8xf32>
    %89 = arith.truncf %88 : vector<1x8x8xf32> to vector<1x8x8xbf16>
    "tpu.trace_start"() <{level = 10 : i32, message = "bqk,bkd->bqd"}> : () -> ()
    %cst_34 = arith.constant dense<0.000000e+00> : vector<1x8x8xf32>
    %90 = tpu.matmul %89, %73, %cst_34 {dimension_numbers = #tpu.dot_dimension_numbers<[2], [1], [1], [2], [0, 0, 0, 1, 1, 2], [0], [0]>} : vector<1x8x8xbf16>, vector<1x8x8xbf16>, vector<1x8x8xf32> -> vector<1x8x8xf32>
    "tpu.trace_stop"() : () -> ()
    %91 = vector.shape_cast %90 : vector<1x8x8xf32> to vector<8x8xf32>
    %92 = arith.truncf %91 : vector<8x8xf32> to vector<8x8xbf16>
    %c16 = arith.constant 16 : index
    %c0_35 = arith.constant 0 : index
    %93 = vector.load %arg6[%c16, %c0_35] : memref<32x32xbf16, #tpu.memory_space<vmem>>, vector<8x32xbf16>
    %cst_36 = arith.constant dense<0.000000e+00> : vector<8x32xf32>
    %94 = tpu.matmul %92, %93, %cst_36 {dimension_numbers = #tpu.dot_dimension_numbers<[1], [0], [0], [1], [0, 0, 1, 1], [], []>} : vector<8x8xbf16>, vector<8x32xbf16>, vector<8x32xf32> -> vector<8x32xf32>
    %95 = arith.addf %70, %94 : vector<8x32xf32>
    %96 = vector.extract_strided_slice %14 {offsets = [0, 0, 24], sizes = [1, 8, 8], strides = [1, 1, 1]} : vector<1x8x96xbf16> to vector<1x8x8xbf16>
    %97 = vector.extract_strided_slice %14 {offsets = [0, 0, 56], sizes = [1, 8, 8], strides = [1, 1, 1]} : vector<1x8x96xbf16> to vector<1x8x8xbf16>
    %98 = vector.extract_strided_slice %14 {offsets = [0, 0, 88], sizes = [1, 8, 8], strides = [1, 1, 1]} : vector<1x8x96xbf16> to vector<1x8x8xbf16>
    "tpu.trace_start"() <{level = 10 : i32, message = "bqd,bkd->bqk"}> : () -> ()
    %cst_37 = arith.constant dense<0.000000e+00> : vector<1x8x8xf32>
    %99 = tpu.matmul %96, %97, %cst_37 {dimension_numbers = #tpu.dot_dimension_numbers<[2], [2], [1], [1], [0, 0, 0, 1, 1, 1], [0], [0]>} : vector<1x8x8xbf16>, vector<1x8x8xbf16>, vector<1x8x8xf32> -> vector<1x8x8xf32>
    "tpu.trace_stop"() : () -> ()
    %cst_38 = arith.constant 0.353553385 : f32
    %100 = vector.broadcast %cst_38 : f32 to vector<1x8x8xf32>
    %101 = arith.mulf %99, %100 : vector<1x8x8xf32>
    %102 = vector.broadcast %19 : vector<1x1x8xf32> to vector<1x8x8xf32>
    %103 = arith.addf %101, %102 : vector<1x8x8xf32>
    %cst_39 = arith.constant dense<0xFF800000> : vector<1x8xf32>
    %104 = vector.multi_reduction <maximumf>, %103, %cst_39 [2] : vector<1x8x8xf32> to vector<1x8xf32>
    %105 = vector.shape_cast %104 : vector<1x8xf32> to vector<1x8x1xf32>
    %106 = vector.broadcast %105 : vector<1x8x1xf32> to vector<1x8x8xf32>
    %107 = arith.subf %103, %106 : vector<1x8x8xf32>
    %108 = math.exp %107 : vector<1x8x8xf32>
    %cst_40 = arith.constant dense<0.000000e+00> : vector<1x8xf32>
    %109 = vector.multi_reduction <add>, %108, %cst_40 [2] : vector<1x8x8xf32> to vector<1x8xf32>
    %110 = vector.shape_cast %109 : vector<1x8xf32> to vector<1x8x1xf32>
    %111 = tpu.reciprocal %110 : vector<1x8x1xf32> -> vector<1x8x1xf32>
    %112 = vector.broadcast %111 : vector<1x8x1xf32> to vector<1x8x8xf32>
    %113 = arith.mulf %108, %112 : vector<1x8x8xf32>
    %114 = arith.truncf %113 : vector<1x8x8xf32> to vector<1x8x8xbf16>
    "tpu.trace_start"() <{level = 10 : i32, message = "bqk,bkd->bqd"}> : () -> ()
    %cst_41 = arith.constant dense<0.000000e+00> : vector<1x8x8xf32>
    %115 = tpu.matmul %114, %98, %cst_41 {dimension_numbers = #tpu.dot_dimension_numbers<[2], [1], [1], [2], [0, 0, 0, 1, 1, 2], [0], [0]>} : vector<1x8x8xbf16>, vector<1x8x8xbf16>, vector<1x8x8xf32> -> vector<1x8x8xf32>
    "tpu.trace_stop"() : () -> ()
    %116 = vector.shape_cast %115 : vector<1x8x8xf32> to vector<8x8xf32>
    %117 = arith.truncf %116 : vector<8x8xf32> to vector<8x8xbf16>
    %c24 = arith.constant 24 : index
    %c0_42 = arith.constant 0 : index
    %118 = vector.load %arg6[%c24, %c0_42] : memref<32x32xbf16, #tpu.memory_space<vmem>>, vector<8x32xbf16>
    %cst_43 = arith.constant dense<0.000000e+00> : vector<8x32xf32>
    %119 = tpu.matmul %117, %118, %cst_43 {dimension_numbers = #tpu.dot_dimension_numbers<[1], [0], [0], [1], [0, 0, 1, 1], [], []>} : vector<8x8xbf16>, vector<8x32xbf16>, vector<8x32xf32> -> vector<8x32xf32>
    %120 = arith.addf %95, %119 : vector<8x32xf32>
    %c0_44 = arith.constant 0 : index
    %c0_45 = arith.constant 0 : index
    %121 = vector.load %arg7[%c0_44, %c0_45] : memref<1x32xf32, #tpu.memory_space<vmem>>, vector<1x32xf32>
    %122 = vector.broadcast %121 : vector<1x32xf32> to vector<8x32xf32>
    %123 = arith.addf %120, %122 : vector<8x32xf32>
    %124 = vector.shape_cast %5 : vector<1x8x32xf32> to vector<8x32xf32>
    %125 = arith.addf %124, %123 : vector<8x32xf32>
    %cst_46 = arith.constant dense<0.000000e+00> : vector<8xf32>
    %126 = vector.multi_reduction <add>, %125, %cst_46 [1] : vector<8x32xf32> to vector<8xf32>
    %127 = vector.shape_cast %126 : vector<8xf32> to vector<8x1xf32>
    %cst_47 = arith.constant 3.200000e+01 : f32
    %128 = vector.broadcast %cst_47 : f32 to vector<8x1xf32>
    %129 = arith.divf %127, %128 : vector<8x1xf32>
    %130 = vector.broadcast %129 : vector<8x1xf32> to vector<8x32xf32>
    %131 = arith.subf %125, %130 : vector<8x32xf32>
    %132 = arith.mulf %131, %131 : vector<8x32xf32>
    %cst_48 = arith.constant dense<0.000000e+00> : vector<8xf32>
    %133 = vector.multi_reduction <add>, %132, %cst_48 [1] : vector<8x32xf32> to vector<8xf32>
    %134 = vector.shape_cast %133 : vector<8xf32> to vector<8x1xf32>
    %cst_49 = arith.constant 3.200000e+01 : f32
    %135 = vector.broadcast %cst_49 : f32 to vector<8x1xf32>
    %136 = arith.divf %134, %135 : vector<8x1xf32>
    %137 = vector.broadcast %129 : vector<8x1xf32> to vector<8x32xf32>
    %138 = arith.subf %125, %137 : vector<8x32xf32>
    %cst_50 = arith.constant 9.99999974E-6 : f32
    %139 = vector.broadcast %cst_50 : f32 to vector<8x1xf32>
    %140 = arith.addf %136, %139 : vector<8x1xf32>
    %141 = math.rsqrt %140 : vector<8x1xf32>
    %142 = vector.broadcast %141 : vector<8x1xf32> to vector<8x32xf32>
    %143 = arith.mulf %138, %142 : vector<8x32xf32>
    %c0_51 = arith.constant 0 : index
    %c0_52 = arith.constant 0 : index
    %144 = vector.load %arg8[%c0_51, %c0_52] : memref<1x32xf32, #tpu.memory_space<vmem>>, vector<1x32xf32>
    %145 = vector.broadcast %144 : vector<1x32xf32> to vector<8x32xf32>
    %146 = arith.mulf %143, %145 : vector<8x32xf32>
    %c0_53 = arith.constant 0 : index
    %c0_54 = arith.constant 0 : index
    %147 = vector.load %arg9[%c0_53, %c0_54] : memref<1x32xf32, #tpu.memory_space<vmem>>, vector<1x32xf32>
    %148 = vector.broadcast %147 : vector<1x32xf32> to vector<8x32xf32>
    %149 = arith.addf %146, %148 : vector<8x32xf32>
    %150 = arith.truncf %149 : vector<8x32xf32> to vector<8x32xbf16>
    %cst_55 = arith.constant 0.000000e+00 : f32
    %151 = vector.broadcast %cst_55 : f32 to vector<8x32xf32>
    %c0_56 = arith.constant 0 : index
    %c0_57 = arith.constant 0 : index
    %152 = vector.load %arg10[%c0_56, %c0_57] : memref<32x64xbf16, #tpu.memory_space<vmem>>, vector<32x64xbf16>
    %cst_58 = arith.constant dense<0.000000e+00> : vector<8x64xf32>
    %153 = tpu.matmul %150, %152, %cst_58 {dimension_numbers = #tpu.dot_dimension_numbers<[1], [0], [0], [1], [0, 0, 1, 1], [], []>} : vector<8x32xbf16>, vector<32x64xbf16>, vector<8x64xf32> -> vector<8x64xf32>
    %c0_59 = arith.constant 0 : index
    %c0_60 = arith.constant 0 : index
    %154 = vector.load %arg11[%c0_59, %c0_60] : memref<1x64xf32, #tpu.memory_space<vmem>>, vector<1x64xf32>
    %155 = vector.broadcast %154 : vector<1x64xf32> to vector<8x64xf32>
    %156 = arith.addf %153, %155 : vector<8x64xf32>
    %cst_61 = arith.constant 0.000000e+00 : f32
    %157 = vector.broadcast %cst_61 : f32 to vector<8x64xf32>
    %158 = arith.maximumf %156, %157 : vector<8x64xf32>
    %159 = arith.truncf %158 : vector<8x64xf32> to vector<8x64xbf16>
    %c0_62 = arith.constant 0 : index
    %c0_63 = arith.constant 0 : index
    %160 = vector.load %arg12[%c0_62, %c0_63] : memref<64x32xbf16, #tpu.memory_space<vmem>>, vector<64x32xbf16>
    %cst_64 = arith.constant dense<0.000000e+00> : vector<8x32xf32>
    %161 = tpu.matmul %159, %160, %cst_64 {dimension_numbers = #tpu.dot_dimension_numbers<[1], [0], [0], [1], [0, 0, 1, 1], [], []>} : vector<8x64xbf16>, vector<64x32xbf16>, vector<8x32xf32> -> vector<8x32xf32>
    %162 = arith.addf %151, %161 : vector<8x32xf32>
    %c0_65 = arith.constant 0 : index
    %c0_66 = arith.constant 0 : index
    %163 = vector.load %arg13[%c0_65, %c0_66] : memref<1x32xf32, #tpu.memory_space<vmem>>, vector<1x32xf32>
    %164 = vector.broadcast %163 : vector<1x32xf32> to vector<8x32xf32>
    %165 = arith.addf %162, %164 : vector<8x32xf32>
    %166 = arith.addf %149, %165 : vector<8x32xf32>
    %cst_67 = arith.constant dense<0.000000e+00> : vector<8xf32>
    %167 = vector.multi_reduction <add>, %166, %cst_67 [1] : vector<8x32xf32> to vector<8xf32>
    %168 = vector.shape_cast %167 : vector<8xf32> to vector<8x1xf32>
    %cst_68 = arith.constant 3.200000e+01 : f32
    %169 = vector.broadcast %cst_68 : f32 to vector<8x1xf32>
    %170 = arith.divf %168, %169 : vector<8x1xf32>
    %171 = vector.broadcast %170 : vector<8x1xf32> to vector<8x32xf32>
    %172 = arith.subf %166, %171 : vector<8x32xf32>
    %173 = arith.mulf %172, %172 : vector<8x32xf32>
    %cst_69 = arith.constant dense<0.000000e+00> : vector<8xf32>
    %174 = vector.multi_reduction <add>, %173, %cst_69 [1] : vector<8x32xf32> to vector<8xf32>
    %175 = vector.shape_cast %174 : vector<8xf32> to vector<8x1xf32>
    %cst_70 = arith.constant 3.200000e+01 : f32
    %176 = vector.broadcast %cst_70 : f32 to vector<8x1xf32>
    %177 = arith.divf %175, %176 : vector<8x1xf32>
    %178 = vector.broadcast %170 : vector<8x1xf32> to vector<8x32xf32>
    %179 = arith.subf %166, %178 : vector<8x32xf32>
    %cst_71 = arith.constant 9.99999974E-6 : f32
    %180 = vector.broadcast %cst_71 : f32 to vector<8x1xf32>
    %181 = arith.addf %177, %180 : vector<8x1xf32>
    %182 = math.rsqrt %181 : vector<8x1xf32>
    %183 = vector.broadcast %182 : vector<8x1xf32> to vector<8x32xf32>
    %184 = arith.mulf %179, %183 : vector<8x32xf32>
    %c0_72 = arith.constant 0 : index
    %c0_73 = arith.constant 0 : index
    %185 = vector.load %arg14[%c0_72, %c0_73] : memref<1x32xf32, #tpu.memory_space<vmem>>, vector<1x32xf32>
    %186 = vector.broadcast %185 : vector<1x32xf32> to vector<8x32xf32>
    %187 = arith.mulf %184, %186 : vector<8x32xf32>
    %c0_74 = arith.constant 0 : index
    %c0_75 = arith.constant 0 : index
    %188 = vector.load %arg15[%c0_74, %c0_75] : memref<1x32xf32, #tpu.memory_space<vmem>>, vector<1x32xf32>
    %189 = vector.broadcast %188 : vector<1x32xf32> to vector<8x32xf32>
    %190 = arith.addf %187, %189 : vector<8x32xf32>
    %191 = vector.shape_cast %190 : vector<8x32xf32> to vector<1x8x32xf32>
    %192 = arith.truncf %191 : vector<1x8x32xf32> to vector<1x8x32xbf16>
    %c0_76 = arith.constant 0 : index
    %c0_77 = arith.constant 0 : index
    %c0_78 = arith.constant 0 : index
    %193 = vector.load %arg16[%c0_76, %c0_77, %c0_78] : memref<1x8x32xbf16, #tpu.memory_space<vmem>>, vector<1x8x32xbf16>
    tpu.vector_store %arg16[%c0_76, %c0_77, %c0_78], %192 {strides = array<i32>} : memref<1x8x32xbf16, #tpu.memory_space<vmem>>, vector<1x8x32xbf16>,
    return
  }
  func.func @transform_0(%arg0: i32) -> (i32, i32, i32) {
    %c0_i32 = arith.constant 0 : i32
    %c0_i32_0 = arith.constant 0 : i32
    %c0_i32_1 = arith.constant 0 : i32
    return %arg0, %c0_i32, %c0_i32_0 : i32, i32, i32
  }
  func.func @transform_1(%arg0: i32) -> (i32, i32, i32) {
    %c0_i32 = arith.constant 0 : i32
    %c0_i32_0 = arith.constant 0 : i32
    %c0_i32_1 = arith.constant 0 : i32
    return %arg0, %c0_i32, %c0_i32_0 : i32, i32, i32
  }
  func.func @transform_2(%arg0: i32) -> (i32, i32) {
    %c0_i32 = arith.constant 0 : i32
    %c0_i32_0 = arith.constant 0 : i32
    %c0_i32_1 = arith.constant 0 : i32
    return %c0_i32, %c0_i32_0 : i32, i32
  }
  func.func @transform_3(%arg0: i32) -> (i32, i32) {
    %c0_i32 = arith.constant 0 : i32
    %c0_i32_0 = arith.constant 0 : i32
    %c0_i32_1 = arith.constant 0 : i32
    return %c0_i32, %c0_i32_0 : i32, i32
  }
  func.func @transform_4(%arg0: i32) -> (i32, i32) {
    %c0_i32 = arith.constant 0 : i32
    %c0_i32_0 = arith.constant 0 : i32
    %c0_i32_1 = arith.constant 0 : i32
    return %c0_i32, %c0_i32_0 : i32, i32
  }
  func.func @transform_5(%arg0: i32) -> (i32, i32) {
    %c0_i32 = arith.constant 0 : i32
    %c0_i32_0 = arith.constant 0 : i32
    %c0_i32_1 = arith.constant 0 : i32
    return %c0_i32, %c0_i32_0 : i32, i32
  }
  func.func @transform_6(%arg0: i32) -> (i32, i32) {
    %c0_i32 = arith.constant 0 : i32
    %c0_i32_0 = arith.constant 0 : i32
    %c0_i32_1 = arith.constant 0 : i32
    return %c0_i32, %c0_i32_0 : i32, i32
  }
  func.func @transform_7(%arg0: i32) -> (i32, i32) {
    %c0_i32 = arith.constant 0 : i32
    %c0_i32_0 = arith.constant 0 : i32
    %c0_i32_1 = arith.constant 0 : i32
    return %c0_i32, %c0_i32_0 : i32, i32
  }
  func.func @transform_8(%arg0: i32) -> (i32, i32) {
    %c0_i32 = arith.constant 0 : i32
    %c0_i32_0 = arith.constant 0 : i32
    %c0_i32_1 = arith.constant 0 : i32
    return %c0_i32, %c0_i32_0 : i32, i32
  }
  func.func @transform_9(%arg0: i32) -> (i32, i32) {
    %c0_i32 = arith.constant 0 : i32
    %c0_i32_0 = arith.constant 0 : i32
    %c0_i32_1 = arith.constant 0 : i32
    return %c0_i32, %c0_i32_0 : i32, i32
  }
  func.func @transform_10(%arg0: i32) -> (i32, i32) {
    %c0_i32 = arith.constant 0 : i32
    %c0_i32_0 = arith.constant 0 : i32
    %c0_i32_1 = arith.constant 0 : i32
    return %c0_i32, %c0_i32_0 : i32, i32
  }
  func.func @transform_11(%arg0: i32) -> (i32, i32) {
    %c0_i32 = arith.constant 0 : i32
    %c0_i32_0 = arith.constant 0 : i32
    %c0_i32_1 = arith.constant 0 : i32
    return %c0_i32, %c0_i32_0 : i32, i32
  }
  func.func @transform_12(%arg0: i32) -> (i32, i32) {
    %c0_i32 = arith.constant 0 : i32
    %c0_i32_0 = arith.constant 0 : i32
    %c0_i32_1 = arith.constant 0 : i32
    return %c0_i32, %c0_i32_0 : i32, i32
  }
  func.func @transform_13(%arg0: i32) -> (i32, i32) {
    %c0_i32 = arith.constant 0 : i32
    %c0_i32_0 = arith.constant 0 : i32
    %c0_i32_1 = arith.constant 0 : i32
    return %c0_i32, %c0_i32_0 : i32, i32
  }
  func.func @transform_14(%arg0: i32) -> (i32, i32) {
    %c0_i32 = arith.constant 0 : i32
    %c0_i32_0 = arith.constant 0 : i32
    %c0_i32_1 = arith.constant 0 : i32
    return %c0_i32, %c0_i32_0 : i32, i32
  }
  func.func @transform_15(%arg0: i32) -> (i32, i32, i32) {
    %c0_i32 = arith.constant 0 : i32
    %c0_i32_0 = arith.constant 0 : i32
    %c0_i32_1 = arith.constant 0 : i32
    return %arg0, %c0_i32, %c0_i32_0 : i32, i32, i32
  }
}

</mosaic_0001>

<bundles_post_ra>
// kernel: tpu_custom_call.1
= control target key start
LH: loop header
LB: loop body
LE: loop exit
PB: predicated region body
PF: predicated region fallthrough
CT: control target
= control target key end

     0   :  { %s2690_s0 = inlined_call_operand.vmem [shape: f32[2,8,32], index: 0, kind: input, shape index: {}]   ;;  %s2691_s1 = inlined_call_operand.vmem [shape: f32[2,1,8], index: 1, kind: input, shape index: {}]   ;;  %s2692_s2 = inlined_call_operand.hbm [shape: f32[8,32], index: 2, kind: input, shape index: {}]   ;;  %s2693_s3 = inlined_call_operand.vmem [shape: bf16[32,96], index: 3, kind: input, shape index: {}]   ;;  %s2694_s4 = inlined_call_operand.hbm [shape: f32[1,96], index: 4, kind: input, shape index: {}]   ;;  %s2695_s5 = inlined_call_operand.vmem [shape: bf16[32,32], index: 5, kind: input, shape index: {}]   ;;  %s2696_s6 = inlined_call_operand.hbm [shape: f32[1,32], index: 6, kind: input, shape index: {}]   ;;  %s2697_s7 = inlined_call_operand.hbm [shape: f32[1,32], index: 7, kind: input, shape index: {}]   ;;  %s2698_s8 = inlined_call_operand.hbm [shape: f32[1,32], index: 8, kind: input, shape index: {}]   ;;  %s2699_s9 = inlined_call_operand.vmem [shape: bf16[32,64], index: 9, kind: input, shape index: {}]   ;;  %s2700_s10 = inlined_call_operand.vmem [shape: f32[1,64], index: 10, kind: input, shape index: {}]   ;;  %s2701_s11 = inlined_call_operand.vmem [shape: bf16[64,32], index: 11, kind: input, shape index: {}]   ;;  %s2702_s12 = inlined_call_operand.vmem [shape: f32[1,32], index: 12, kind: input, shape index: {}]   ;;  %s2703_s13 = inlined_call_operand.vmem [shape: f32[1,32], index: 13, kind: input, shape index: {}]   ;;  %s2704_s14 = inlined_call_operand.vmem [shape: f32[1,32], index: 14, kind: input, shape index: {}]   ;;  %s2705_s15 = inlined_call_operand.hbm [shape: bf16[2,8,32], index: 15, kind: output, shape index: {}]  }
   0x1   :  { %2718 = sst [smem:[#allocation23_spill]] %s2694_s4 }
   0x2   :  { %2719 = sst [smem:[#allocation24_spill]] %s2704_s14 }
   0x3   :  { %2720 = sst [smem:[#allocation25_spill]] %s2705_s15 }
   0x4   :  { %20 = vsyncpa [#allocation3], 0 }
   0x5   :  { %21 = vsyncpa [#allocation6], 0 }
   0x6   :  { %22 = vsyncpa [#allocation9], 0 }
   0x7   :  { %23 = vsyncpa [#allocation4], 0 }
   0x8   :  { %25 = vsyncpa [#allocation4 + $0x1], 0  ;;  %s2281_s18 = smov 0   ;;  %s2283_s19 = smov 0  }
   0x9   :  { %s2285_s20 = smov 0   ;;  %s2287_s21 = smov 0  }
   0xa LB: > { %2721 = sst [smem:[#allocation16_spill]] %s2168_s18  ;;  %s2302_s22 = sadd.s32 4294967295, %s2180_s21   ;;  %s2180_s21 = sphi %s2287_s21, %s2750_s21   ;;  %s2176_s20 = sphi %s2285_s20, %s2752_s20   ;;  %s2172_s19 = sphi %s2283_s19, %s2754_s19   ;;  %s2168_s18 = sphi %s2281_s18, %s2753_s18  }
   0xb   : > { %2722 = sst [smem:[#allocation17_spill]] %s2176_s20  ;;  %s1649_s23 = sadd.s32 4294967294, %s2180_s21  }
   0xc   : > { %2723 = sst [smem:[#allocation18_spill]] %s2180_s21  ;;  %s2306_s24 = sadd.s32 1, %s2180_s21  }
   0xd   : > { %2724 = sst [smem:[#allocation19_spill]] %s2306_s24  ;;  %s363_s25 = sadd.s32 1, %s2176_s20 }
   0xe   : > { %s360_s26 = ssub.s32 %s2180_s21, %s2306_s24  ;;  %p373_p0 = scmp.ne.s32.totalorder %s2176_s20, %s2172_s19 }
   0xf   : > { %p361_p1 = scmp.eq.s32.totalorder %s360_s26, 0  ;;  %p374_p2 = scmp.eq.s32.totalorder %s2302_s22, 1 }
  0x10   : > { %p379_p3 = scmp.ne.s32.totalorder %s2172_s19, %s2168_s18  ;;  %p380_p4 = scmp.eq.s32.totalorder %s1649_s23, 1 }
  0x11   : > { %s2317_s27 = scalar_select %p361_p1, %s2176_s20, %s363_s25  }
  0x12   : > { %p2319_p5 = por %p374_p2, %p373_p0  ;;  %p2323_p6 = por %p380_p4, %p379_p3 }
  0x13   : > { %2725 = sst [smem:[#allocation20_spill]] %s2317_s27  ;;  %p1650_p7 = scmp.ge.s32.totalorder %s2180_s21, 1 }
  0x14   : > { %s2726_s28 = scalar_select %p2319_p5, 1, 0 }
  0x15   : > { %s2728_s29 = scalar_select %p2323_p6, 1, 0 }
  0x16   : > { %2727 = sst [smem:[#allocation21_spill]] %s2726_s28  ;;  %p387_p8 = scmp.lt.s32.totalorder %s2180_s21, 3 }
  0x17   : > { %2729 = sst [smem:[#allocation22_spill]] %s2728_s29  ;;  %p2713_p9 = scmp.eq.s32.totalorder %s2302_s22, 0 }
  0x18   : > { %p2330_p10 = pnand %p1650_p7, %p387_p8  ;;  %s2182_s16 = smov [#allocation5]  }
  0x19   : > { %s414_s17 = sshll.u32 %s2182_s16, 4  ;;  %s2183_s23 = smov [#allocation8]   ;;  %s415_s17 = int_to_ptr.vmem [resolvable:$true] %s414_s17 }
  0x1a   : > { %s2730_s30 = scalar_select %p2330_p10, 1, 0 }
  0x1b   : > { %p1857_p11 = pneg %p2330_p10  ;;  %s439_s25 = sshll.u32 %s2183_s23, 4  ;;  %s2342_s25 = int_to_ptr.vmem [resolvable:$true] %s439_s25 }
  0x1c   : > { %s2184_s27 = smov [#allocation2]   ;;  %s2732_s4 = sld [smem:[#allocation23_spill]] }
  0x1d   : > { %p2338_p12 = pnand %p2713_p9, %p1857_p11  ;;  %s400_s20 = sshll.u32 %s2184_s27, 4  ;;  %s2344_s20 = int_to_ptr.vmem [resolvable:$true] %s400_s20 }
  0x1f   : > { %p2354_p0 = pneg %p2338_p12 }
  0x22   : > { %s1966_s16 = scalar_lea.hbm %s2732_s4, 16 }
  0x23   : > { %p1967_p13 = scmp.ne.s32.totalorder %s2732_s4, %s1966_s16  ;;  %p1973_p3 = scmp.lt.u32.totalorder %s1966_s16, %s2732_s4 }
  0x25   : > { %p1969_p1 = pnand %p2354_p0, %p1967_p13 }
  0x27   : > { %p1970_p2 = pneg %p1969_p1 }
  0x29   : > { %p1975_p4 = pnand %p1973_p3, %p1970_p2 }
  0x2b   : > { %1978 = shalt.err (!%p1975_p4)
}
  0x2c   : > { %s1979_s24 = scalar_lea.vmem %s415_s17, 16  ;;  %s1986_s18 = scalar_lea.vmem %s415_s17, 32 }
  0x2d   : > { %p1980_p7 = scmp.ne.s32.totalorder %s415_s17, %s1979_s24  ;;  %p1987_p9 = scmp.lt.s32.totalorder %s415_s17, %s415_s17 }
  0x2e   : > { %p1988_p6 = scmp.lt.s32.totalorder %s1986_s18, %s1979_s24 }
  0x2f   : > { %p1982_p8 = pnand %p1980_p7, %p2354_p0 }
  0x30   : > { %p1989_p5 = por %p1988_p6, %p1987_p9 }
  0x31   : > { %p1983_p11 = pneg %p1982_p8 }
  0x33   : > { %p1990_p10 = pnand %p1989_p5, %p1983_p11 }
  0x35   : > { %1993 = shalt.err (!%p1990_p10)
}
  0x36   : > { %1863 = dma.hbm_to_vmem [thread:$0]  (!%p2338_p12), %s2732_s4, 16, %s415_s17, [#allocation6]  }
  0x37   : > { %s1994_s27 = scalar_lea.hbm %s2697_s7, 16 }
  0x38   : > { %p1995_p13 = scmp.ne.s32.totalorder %s2697_s7, %s1994_s27  ;;  %p2001_p5 = scmp.lt.u32.totalorder %s1994_s27, %s2697_s7 }
  0x3a   : > { %p1997_p1 = pnand %p1995_p13, %p2354_p0 }
  0x3c   : > { %p1998_p6 = pneg %p1997_p1 }
  0x3e   : > { %p2003_p9 = pnand %p2001_p5, %p1998_p6 }
  0x40   : > { %2006 = shalt.err (!%p2003_p9)
}
  0x41   : > { %s2007_s17 = scalar_lea.vmem %s2342_s25, 16  ;;  %s2014_s14 = scalar_lea.vmem %s2342_s25, 32 }
  0x42   : > { %p2008_p10 = scmp.ne.s32.totalorder %s2342_s25, %s2007_s17  ;;  %p2015_p4 = scmp.lt.s32.totalorder %s2342_s25, %s2342_s25 }
  0x43   : > { %p2016_p7 = scmp.lt.s32.totalorder %s2014_s14, %s2007_s17 }
  0x44   : > { %p2010_p2 = pnand %p2008_p10, %p2354_p0 }
  0x45   : > { %p2017_p8 = por %p2016_p7, %p2015_p4 }
  0x46   : > { %p2011_p3 = pneg %p2010_p2 }
  0x48   : > { %p2018_p11 = pnand %p2017_p8, %p2011_p3 }
  0x4a   : > { %2021 = shalt.err (!%p2018_p11)
}
  0x4b   : > { %1869 = dma.hbm_to_vmem [thread:$0]  (!%p2338_p12), %s2697_s7, 16, %s2342_s25, [#allocation9]  }
  0x4c   : > { %s2022_s16 = scalar_lea.hbm %s2692_s2, 128 }
  0x4d   : > { %p2023_p13 = scmp.ne.s32.totalorder %s2692_s2, %s2022_s16  ;;  %p2029_p5 = scmp.lt.u32.totalorder %s2022_s16, %s2692_s2 }
  0x4f   : > { %p2025_p1 = pnand %p2023_p13, %p2354_p0 }
  0x51   : > { %p2026_p6 = pneg %p2025_p1 }
  0x53   : > { %p2031_p9 = pnand %p2029_p5, %p2026_p6 }
  0x55   : > { %2034 = shalt.err (!%p2031_p9)
}
  0x56   : > { %s2035_s25 = scalar_lea.vmem %s2344_s20, 128  ;;  %p2043_p4 = scmp.lt.s32.totalorder %s2344_s20, %s2344_s20 }
  0x57   : > { %p2036_p10 = scmp.ne.s32.totalorder %s2344_s20, %s2035_s25  ;;  %p2044_p7 = scmp.lt.s32.totalorder %s2035_s25, %s2035_s25 }
  0x59   : > { %p2038_p2 = pnand %p2036_p10, %p2354_p0  ;;  %p2045_p8 = por %p2044_p7, %p2043_p4 }
  0x5b   : > { %p2039_p3 = pneg %p2038_p2 }
  0x5d   : > { %p2046_p11 = pnand %p2045_p8, %p2039_p3 }
  0x5f   : > { %2049 = shalt.err (!%p2046_p11)
}
  0x60   : > { %1860 = dma.hbm_to_vmem [thread:$0]  (!%p2338_p12), %s2692_s2, 128, %s2344_s20, [#allocation3]  }
  0x61   : > { %s2185_s21 = smov [#allocation7]   ;;  %s2186_s15 = smov [#allocation10]  }
  0x62   : > { %s428_s29 = sshll.u32 %s2185_s21, 4  ;;  %s450_s16 = sshll.u32 %s2186_s15, 4  ;;  %s429_s29 = int_to_ptr.vmem [resolvable:$true] %s428_s29  ;;  %s451_s16 = int_to_ptr.vmem [resolvable:$true] %s450_s16 }
  0x63   : > { %s2050_s18 = scalar_lea.hbm %s2696_s6, 16 }
  0x64   : > { %p2051_p13 = scmp.ne.s32.totalorder %s2696_s6, %s2050_s18  ;;  %p2057_p5 = scmp.lt.u32.totalorder %s2050_s18, %s2696_s6 }
  0x66   : > { %p2053_p1 = pnand %p2051_p13, %p2354_p0 }
  0x68   : > { %p2054_p6 = pneg %p2053_p1 }
  0x6a   : > { %p2059_p9 = pnand %p2057_p5, %p2054_p6 }
  0x6c   : > { %2062 = shalt.err (!%p2059_p9)
}
  0x6d   : > { %s2063_s20 = scalar_lea.vmem %s429_s29, 16  ;;  %s2070_s28 = scalar_lea.vmem %s429_s29, 32 }
  0x6e   : > { %p2064_p10 = scmp.ne.s32.totalorder %s429_s29, %s2063_s20  ;;  %p2071_p4 = scmp.lt.s32.totalorder %s429_s29, %s429_s29 }
  0x6f   : > { %p2072_p7 = scmp.lt.s32.totalorder %s2070_s28, %s2063_s20 }
  0x70   : > { %p2066_p2 = pnand %p2064_p10, %p2354_p0 }
  0x71   : > { %p2073_p8 = por %p2072_p7, %p2071_p4 }
  0x72   : > { %p2067_p3 = pneg %p2066_p2 }
  0x74   : > { %p2074_p11 = pnand %p2073_p8, %p2067_p3 }
  0x76   : > { %2077 = shalt.err (!%p2074_p11)
}
  0x77   : > { %1866 = dma.hbm_to_vmem [thread:$0]  (!%p2338_p12), %s2696_s6, 16, %s429_s29, [#allocation6]  }
  0x78   : > { %s2078_s24 = scalar_lea.hbm %s2698_s8, 16 }
  0x79   : > { %p2079_p13 = scmp.ne.s32.totalorder %s2698_s8, %s2078_s24  ;;  %p2085_p5 = scmp.lt.u32.totalorder %s2078_s24, %s2698_s8 }
  0x7b   : > { %p2081_p1 = pnand %p2079_p13, %p2354_p0 }
  0x7d   : > { %p2082_p6 = pneg %p2081_p1 }
  0x7f   : > { %p2087_p9 = pnand %p2085_p5, %p2082_p6 }
  0x81   : > { %2090 = shalt.err (!%p2087_p9)
}
  0x82   : > { %s2091_s20 = scalar_lea.vmem %s451_s16, 16  ;;  %s2098_s29 = scalar_lea.vmem %s451_s16, 32 }
  0x83   : > { %p2092_p10 = scmp.ne.s32.totalorder %s451_s16, %s2091_s20  ;;  %p2099_p4 = scmp.lt.s32.totalorder %s451_s16, %s451_s16 }
  0x84   : > { %p2100_p7 = scmp.lt.s32.totalorder %s2098_s29, %s2091_s20 }
  0x85   : > { %p2094_p2 = pnand %p2092_p10, %p2354_p0 }
  0x86   : > { %p2101_p8 = por %p2100_p7, %p2099_p4 }
  0x87   : > { %p2095_p3 = pneg %p2094_p2 }
  0x89   : > { %p2102_p11 = pnand %p2101_p8, %p2095_p3 }
  0x8b   : > { %2105 = shalt.err (!%p2102_p11)
}
  0x8c   : > { %1872 = dma.hbm_to_vmem [thread:$0]  (!%p2338_p12), %s2698_s8, 16, %s451_s16, [#allocation9]  }
  0x8d   : > { %p2734_p13 = scmp.ne.s32.totalorder %s2730_s30, 0 }
  0x8e   : > { %p2735_p1 = scmp.eq.s32.totalorder (!%p2734_p13), %s2302_s22, 0 }
  0x8f   : > { %494 = sbr.rel (%p2734_p13) target bundleno = 3854 (0xf0e), region = 80 }
  0x96   : > { %2151 = dma.done.wait (%p2735_p1), [#allocation3], 128   ;;  %p2736_p0 = pmov %p2735_p1 }
  0x98   : > { %2153 = vsyncadd (%p2736_p0), [#allocation3], 4294967168  ;;  %p2737_p6 = pmov %p2736_p0 }
  0x99   : > { %p2738_p5 = pmov %p2736_p0 }
  0x9a   : > { %2155 = dma.done.wait (%p2737_p6), [#allocation6], 32  }
  0x9b   : > { %2157 = vsyncadd (%p2738_p5), [#allocation6], 4294967264  ;;  %p2739_p9 = pmov %p2736_p0 }
  0x9c   : > { %p2740_p12 = pmov %p2736_p0 }
  0x9d   : > { %2159 = dma.done.wait (%p2739_p9), [#allocation9], 32  }
  0x9e   : > { %2161 = vsyncadd (%p2740_p12), [#allocation9], 4294967264  ;;  %p560_p10 = scmp.lt.s32.totalorder %s2302_s22, 1  ;;  %v2187_v0 = vmov 0.0   ;;  %vm2188_vm0 = vmmov 0   ;;  %v1938_v1 = vld [vmem:[%s2693_s3] sm:$0xff]   ;;  %v696_v20 = vlaneseq }
  0x9f   : > { %1735 = vmatprep.subr.bf16.mxu1 %v2187_v0  ;;  %1739 = vmatprep.mubr.msk.bf16.mxu1 %vm2188_vm0, %v2187_v0  ;;  %v1939_v2 = vld [vmem:[%s2693_s3 + $0x8] sm:$0xff]   ;;  %v570_v4 = vld [vmem:[#allocation2] sm:$0xff]  ;;  %vm596_vm1 = vcmask 261120   ;;  %s2189_s17 = smov 120   ;;  %s2190_s25 = smov 96   ;;  %vm647_vm2 = vcmask 64512  }
  0xa0   : > { %s2472_s30 = scalar_select %p560_p10, %s2302_s22, 1  ;;  %1749 = vmatprep.subr.bf16.mxu0 %v2187_v0  ;;  %1751 = vmatprep.mubr.msk.bf16.mxu0 %vm2188_vm0, %v2187_v0  ;;  %v1665_v8 = vld [vmem:[#allocation5] ss:$0 sm:$0xff]  ;;  %v697_v23 = vshrl.u32 %v696_v20, 7  ;;  %vm719_vm3 = vcmask 1043456   ;;  %vm1440_vm4 = vcmask 523264  }
  0xa1   : > { %1736 = vmatpush3.bf16.msra.mxu1 %v1938_v1  ;;  %s2191_s14 = smov 88   ;;  %s2192_s21 = smov 64   ;;  %v764_v63 = vld [vmem:[%s2695_s5] sm:$0xf]  ;;  %vm1515_vm5 = vcmask 257024  }
  0xa2   : > { %s1664_s26 = sshll.u32 %s2472_s30, 3  ;;  %1737 = vmatprep.subr.bf16.mxu1 %v2187_v0  ;;  %s566_s28 = scalar_lea.vmem %s2691_s1, %s2472_s30  ;;  %v698_v25 = vsub.s32 0, %v697_v23  ;;  %v929_v1 = vsel %vm719_vm3, %v764_v63, 0 }
  0xa3   : > { %s563_s15 = scalar_lea.vmem %s2690_s0, %s1664_s26  ;;  %v641_v21 = vld [vmem:[%s566_s28] sm:$0x1]  ;;  %s2193_s30 = smov 56  }
  0xa4   : > { %v568_v3 = vld [vmem:[%s563_s15] sm:$0xff]  ;;  %v642_v22 = vsub.f32 1.0, %v641_v21  ;;  %s2194_s26 = smov 112   ;;  %s2195_s23 = smov 80  }
  0xa5   : > { %v569_v5 = vmul.f32 5.656854, %v568_v3  ;;  %1738 = vmatpush3.bf16.msra.mxu1 %v1939_v2  ;;  %v878_v2 = vld [vmem:[%s2695_s5 + $0x4] sm:$0xf]  ;;  %s2196_s24 = smov 72   ;;  %s2197_s18 = smov 104  }
  0xa6   : > { %1743 = vmatprep.subr.bf16.mxu1 %v2187_v0  ;;  %v643_v24 = vmul.f32 -1e+09, %v642_v22  ;;  %v883_v3 = vsel %vm719_vm3, %v878_v2, 0  ;;  %s2199_s20 = smov 40   ;;  %s2741_s16 = sld [smem:[#allocation21_spill]] }
  0xa7   : > { %v2488_v6 = vadd.f32 %v570_v4, %v569_v5  ;;  %s2742_s27 = sld [smem:[#allocation24_spill]] }
  0xa8   : > { %v2516_v26 = vrot.slane %v643_v24, %v698_v25 }
  0xa9   : > { %v572_v7 = vpack.c.bf16 %v2488_v6, %v2488_v6 }
  0xab   : > { %1740 = vmatmul.mubr.msk.bf16.vlgmr.msra.gmra.mrb[0].mxu1 %vm596_vm1, %v572_v7 }
  0xac   : > { %1745 = vmatprep.mubr.msk.bf16.mxu1 %vm2188_vm0, %v2187_v0  ;;  %p2745_p3 = scmp.ne.s32.totalorder %s2741_s16, 0 }
 0x17e   : > { %v634_v9 = vpop.f32.mrb[0].mxu1 }
 0x17f   : > { %v635_v10 = vadd.f32 %v1665_v8, %v634_v9  ;;  %v1741_v11 = vpop.f32.mrb[1].mxu1 }
 0x180   : > { %v637_v12 = vpop.f32.mrb[2].mxu1 }
 0x181   : > { %v2496_v13 = vpack.c.bf16 %v635_v10, %v635_v10  ;;  %v1742_v14 = vpop.f32.mrb[3].mxu1 }
 0x183   : > { %765 = vrot.lane.b32.xlu1 %v2496_v13, %s2189_s17  ;;  %645 = vrot.lane.b32.xlu0 %v2496_v13, %s2190_s25  ;;  %s2198_s17 = smov 48  }
 0x187   : > { %767 = vrot.lane.b32.xlu0 %v2496_v13, %s2191_s14 }
 0x1f5   : > { %v646_v15 = vpop.permute.xlu0 %645  ;;  %v766_v19 = vpop.permute.xlu1 %765 }
 0x1f6   : > { %v652_v16 = vsel %vm647_vm2, %v646_v15, 0 }
 0x1f7   : > { %1744 = vmatpush3.bf16.xpose.msra.mxu1 %v652_v16 }
 0x1f8   : > { %1755 = vmatprep.subr.bf16.mxu1 %v2187_v0 }
 0x1f9   : > { %v768_v17 = vpop.permute.xlu0 %767 }
 0x1fa   : > { %v773_v18 = vsel %vm647_vm2, %v768_v17, 0 }
 0x1fe   : > { %1746 = vmatmul.mubr.msk.bf16.vlgmr.msra.gmra.mrb[4].mxu1 %vm647_vm2, %v2496_v13 }
 0x1ff   : > { %1756 = vmatpush3.bf16.xpose.msra.mxu1 %v773_v18  ;;  %1757 = vmatprep.mubr.msk.bf16.mxu1 %vm2188_vm0, %v2187_v0 }
 0x200   : > { %1767 = vmatprep.subr.bf16.mxu1 %v2187_v0 }
 0x206   : > { %1758 = vmatmul.mubr.msk.bf16.vlgmr.msra.gmra.mrb[8].mxu1 %vm647_vm2, %v766_v19 }
 0x207   : > { %1769 = vmatprep.mubr.msk.bf16.mxu1 %vm2188_vm0, %v2187_v0  ;;  %1768 = vmatpush3.bf16.msra.mxu1 %v883_v3 }
 0x208   : > { %1779 = vmatprep.subr.bf16.mxu1 %v2187_v0 }
 0x2d1   : > { %v688_v27 = vpop.f32.mrb[4].mxu1 }
 0x2d2   : > { %v694_v28 = vmul.f32 0.35355338, %v688_v27  ;;  %v1747_v29 = vpop.f32.mrb[5].mxu1 }
 0x2d3   : > { %v691_v30 = vpop.f32.mrb[6].mxu1 }
 0x2d4   : > { %v1748_v31 = vpop.f32.mrb[7].mxu1  ;;  %v701_v32 = vadd.f32 %v2516_v26, %v694_v28 }
 0x2d6   : > { %v702_v33 = vsel %vm647_vm2, %v701_v32, -inf }
 0x2d7   : > { %703 = vmax.xlane.f32.xlu1 %v702_v33 }
 0x2d9   : > { %v809_v34 = vpop.f32.mrb[8].mxu1 }
 0x2da   : > { %v815_v35 = vmul.f32 0.35355338, %v809_v34  ;;  %v1759_v36 = vpop.f32.mrb[9].mxu1 }
 0x2db   : > { %v812_v37 = vpop.f32.mrb[10].mxu1 }
 0x2dc   : > { %v1760_v38 = vpop.f32.mrb[11].mxu1  ;;  %v816_v39 = vadd.f32 %v815_v35, %v2516_v26 }
 0x2de   : > { %v817_v40 = vsel %vm647_vm2, %v816_v39, -inf }
 0x2df   : > { %818 = vmax.xlane.f32.xlu0 %v817_v40 }
 0x364   : > { %v704_v41 = vpop.xlane.xlu1 %703 }
 0x365   : > { %v705_v42 = vsub.f32 %v701_v32, %v704_v41 }
 0x367   : > { %v706_v43 = vmul.f32 1.442695, %v705_v42 }
 0x369   : > { %1946 = vpow2.f32 %v706_v43 }
 0x36c   : > { %v819_v44 = vpop.xlane.xlu0 %818 }
 0x36d   : > { %v820_v45 = vsub.f32 %v816_v39, %v819_v44 }
 0x36f   : > { %v821_v46 = vmul.f32 1.442695, %v820_v45 }
 0x371   : > { %1948 = vpow2.f32 %v821_v46 }
 0x373   : > { %v1947_v47 = vpop.eup %1946 }
 0x374   : > { %v708_v48 = vsel %vm647_vm2, %v1947_v47, 0.0 }
 0x375   : > { %709 = vadd.xlane.f32.xlu0 %v708_v48 }
 0x37b   : > { %v1949_v49 = vpop.eup %1948 }
 0x37c   : > { %v823_v50 = vsel %vm647_vm2, %v1949_v49, 0.0 }
 0x37d   : > { %824 = vadd.xlane.f32.xlu1 %v823_v50  ;;  %v1084_v50 = vld [vmem:[%s2695_s5 + $0x8] sm:$0xf] }
 0x38b   : > { %714 = vrot.lane.b32.xlu0 %v2496_v13, %s2192_s21  ;;  %s557_s21 = sand.u32 1, %s2172_s19  }
 0x38e   : > { %829 = vrot.lane.b32.xlu1 %v2496_v13, %s2193_s30  ;;  %s1663_s30 = sshll.u32 %s557_s21, 2 }
 0x38f   : > { %971 = vrot.lane.b32.xlu0 %v2496_v13, %s2194_s26  ;;  %s1518_s26 = scalar_lea.sflag [#allocation4], %s557_s21 }
 0x392   : > { %973 = vrot.lane.b32.xlu1 %v2496_v13, %s2195_s23 }
 0x402   : > { %v710_v51 = vpop.xlane.xlu0 %709 }
 0x403   : > { %1950 = vrcp.f32 %v710_v51  ;;  %v1089_v51 = vsel %vm719_vm3, %v1084_v50, 0 }
 0x406   : > { %v715_v52 = vpop.permute.xlu0 %714 }
 0x407   : > { %v721_v53 = vsel %vm719_vm3, %v715_v52, 0 }
 0x408   : > { %1750 = vmatpush3.bf16.msra.mxu0 %v721_v53 }
 0x409   : > { %1761 = vmatprep.subr.bf16.mxu0 %v2187_v0 }
 0x40a   : > { %v825_v54 = vpop.xlane.xlu1 %824  ;;  %v972_v18 = vpop.permute.xlu0 %971 }
 0x40b   : > { %1952 = vrcp.f32 %v825_v54 }
 0x40d   : > { %v1951_v55 = vpop.eup %1950 }
 0x40e   : > { %v712_v56 = vmul.f32 %v1951_v55, %v1947_v47  ;;  %v830_v57 = vpop.permute.xlu1 %829 }
 0x40f   : > { %v835_v59 = vsel %vm719_vm3, %v830_v57, 0 }
 0x410   : > { %v713_v58 = vpack.c.bf16 %v712_v56, %v712_v56 }
 0x412   : > { %1752 = vmatmul.mubr.msk.bf16.vlgmr.msra.gmra.mrb[0].mxu0 %vm647_vm2, %v713_v58  ;;  %v974_v10 = vpop.permute.xlu1 %973 }
 0x413   : > { %1762 = vmatpush3.bf16.msra.mxu0 %v835_v59  ;;  %1763 = vmatprep.mubr.msk.bf16.mxu0 %vm2188_vm0, %v2187_v0  ;;  %v979_v16 = vsel %vm647_vm2, %v974_v10, 0 }
 0x414   : > { %1773 = vmatprep.subr.bf16.mxu0 %v2187_v0 }
 0x415   : > { %v1953_v60 = vpop.eup %1952 }
 0x416   : > { %v827_v61 = vmul.f32 %v1953_v60, %v1949_v49 }
 0x418   : > { %v828_v62 = vpack.c.bf16 %v827_v61, %v827_v61 }
 0x41a   : > { %1764 = vmatmul.mubr.msk.bf16.vlgmr.msra.gmra.mrb[4].mxu0 %vm647_vm2, %v828_v62 }
 0x41b   : > { %1775 = vmatprep.mubr.msk.bf16.mxu0 %vm2188_vm0, %v2187_v0  ;;  %1774 = vmatpush3.bf16.msra.mxu0 %v929_v1 }
 0x41c   : > { %1785 = vmatprep.subr.bf16.mxu0 %v2187_v0 }
 0x4e5   : > { %v757_v4 = vpop.f32.mrb[0].mxu0 }
 0x4e6   : > { %v763_v5 = vpack.c.bf16 %v757_v4, %v757_v4  ;;  %v1753_v7 = vpop.f32.mrb[1].mxu0 }
 0x4e7   : > { %v760_v8 = vpop.f32.mrb[2].mxu0 }
 0x4e8   : > { %v1754_v9 = vpop.f32.mrb[3].mxu0  ;;  %1776 = vmatmul.mubr.msk.bf16.vlgmr.msra.gmra.mrb[8].mxu0 %vm647_vm2, %v763_v5 }
 0x4e9   : > { %1787 = vmatprep.mubr.msk.bf16.mxu0 %vm2188_vm0, %v2187_v0 }
 0x4ed   : > { %v871_v11 = vpop.f32.mrb[4].mxu0 }
 0x4ee   : > { %v877_v12 = vpack.c.bf16 %v871_v11, %v871_v11  ;;  %v1765_v14 = vpop.f32.mrb[5].mxu0 }
 0x4ef   : > { %v874_v15 = vpop.f32.mrb[6].mxu0 }
 0x4f0   : > { %v1766_v17 = vpop.f32.mrb[7].mxu0  ;;  %1770 = vmatmul.mubr.msk.bf16.vlgmr.msra.gmra.mrb[12].mxu1 %vm647_vm2, %v877_v12 }
 0x4f1   : > { %1780 = vmatpush3.bf16.xpose.msra.mxu1 %v979_v16  ;;  %1781 = vmatprep.mubr.msk.bf16.mxu1 %vm2188_vm0, %v2187_v0 }
 0x4f2   : > { %1791 = vmatprep.subr.bf16.mxu1 %v2187_v0 }
 0x4f8   : > { %1782 = vmatmul.mubr.msk.bf16.vlgmr.msra.gmra.mrb[16].mxu1 %vm647_vm2, %v972_v18 }
 0x4f9   : > { %1793 = vmatprep.mubr.msk.bf16.mxu1 %vm2188_vm0, %v2187_v0  ;;  %1792 = vmatpush3.bf16.msra.mxu1 %v1089_v51 }
 0x4fa   : > { %1803 = vmatprep.subr.bf16.mxu1 %v2187_v0 }
 0x5bb   : > { %v965_v19 = vpop.f32.mrb[8].mxu0 }
 0x5bc   : > { %v1777_v20 = vpop.f32.mrb[9].mxu0 }
 0x5bd   : > { %v968_v21 = vpop.f32.mrb[10].mxu0 }
 0x5be   : > { %v1778_v22 = vpop.f32.mrb[11].mxu0 }
 0x5c3   : > { %v919_v23 = vpop.f32.mrb[12].mxu1 }
 0x5c4   : > { %v2559_v24 = vadd.f32 %v965_v19, %v919_v23  ;;  %v1771_v25 = vpop.f32.mrb[13].mxu1 }
 0x5c5   : > { %v922_v27 = vpop.f32.mrb[14].mxu1  ;;  %v1681_v25 = vld [vmem:[#allocation7] ss:$0 sm:$0xff] }
 0x5c6   : > { %v1772_v28 = vpop.f32.mrb[15].mxu1 }
 0x5cb   : > { %v1015_v29 = vpop.f32.mrb[16].mxu1 }
 0x5cc   : > { %v1021_v30 = vmul.f32 0.35355338, %v1015_v29  ;;  %v1783_v31 = vpop.f32.mrb[17].mxu1 }
 0x5cd   : > { %v1018_v32 = vpop.f32.mrb[18].mxu1 }
 0x5ce   : > { %v1784_v33 = vpop.f32.mrb[19].mxu1  ;;  %v1022_v34 = vadd.f32 %v1021_v30, %v2516_v26 }
 0x5d0   : > { %v1023_v35 = vsel %vm647_vm2, %v1022_v34, -inf }
 0x5d1   : > { %1024 = vmax.xlane.f32.xlu1 %v1023_v35 }
 0x5e2   : > { %1134 = vrot.lane.b32.xlu1 %v2496_v13, %s2196_s24  ;;  %s1697_s24 = sshll.u32 %s2302_s22, 6  ;;  %s2200_s22 = smov [#allocation11]  }
 0x5e6   : > { %1132 = vrot.lane.b32.xlu1 %v2496_v13, %s2197_s18  ;;  %s559_s18 = scalar_lea.vmem [#allocation11], %s1663_s30  ;;  %s2110_s30 = sshll.u32 %s2200_s22, 4  ;;  %s2111_s30 = int_to_ptr.vmem [resolvable:$false] %s2110_s30 }
 0x5e7   : > { %s2112_s15 = scalar_lea.vmem %s2111_s30, 128 }
 0x65e   : > { %v1025_v36 = vpop.xlane.xlu1 %1024 }
 0x65f   : > { %v1026_v37 = vsub.f32 %v1022_v34, %v1025_v36 }
 0x661   : > { %v1027_v38 = vmul.f32 1.442695, %v1026_v37 }
 0x662   : > { %v1135_v46 = vpop.permute.xlu1 %1134 }
 0x663   : > { %1954 = vpow2.f32 %v1027_v38  ;;  %v1140_v48 = vsel %vm647_vm2, %v1135_v46, 0  ;;  %v1682_v46 = vld [vmem:[#allocation8] ss:$0 sm:$0xff] }
 0x666   : > { %v1133_v49 = vpop.permute.xlu1 %1132 }
 0x66d   : > { %v1955_v39 = vpop.eup %1954 }
 0x66e   : > { %v1029_v40 = vsel %vm647_vm2, %v1955_v39, 0.0 }
 0x66f   : > { %1030 = vadd.xlane.f32.xlu0 %v1029_v40  ;;  %v1941_v40 = vld [vmem:[%s2699_s9 + $0x8] sm:$0xff]  }
 0x685   : > { %1035 = vrot.lane.b32.xlu0 %v2496_v13, %s2198_s17  ;;  %s1531_s17 = sshll.u32 %s559_s18, 4  ;;  %s2650_s17 = int_to_ptr.vmem [resolvable:$true] %s1531_s17 }
 0x686   : > { %s2106_s23 = scalar_lea.vmem %s2650_s17, 64  ;;  %p2113_p8 = scmp.lt.s32.totalorder %s2650_s17, %s2111_s30 }
 0x687   : > { %p2107_p2 = scmp.ne.s32.totalorder %s2650_s17, %s2106_s23  ;;  %p2114_p11 = scmp.lt.s32.totalorder %s2112_s15, %s2106_s23 }
 0x689   : > { %p2108_p4 = pnand %p2107_p2, %p2745_p3  ;;  %p2115_p13 = por %p2114_p11, %p2113_p8 }
 0x68b   : > { %p2109_p7 = pneg %p2108_p4 }
 0x68d   : > { %p2116_p1 = pnand %p2115_p13, %p2109_p7 }
 0x6fc   : > { %v1031_v41 = vpop.xlane.xlu0 %1030 }
 0x6fd   : > { %1956 = vrcp.f32 %v1031_v41  ;;  %v1943_v41 = vld [vmem:[%s2701_s11 + $0x8] sm:$0xff]  }
 0x700   : > { %v1036_v42 = vpop.permute.xlu0 %1035 }
 0x701   : > { %v1041_v43 = vsel %vm719_vm3, %v1036_v42, 0 }
 0x702   : > { %1786 = vmatpush3.bf16.msra.mxu0 %v1041_v43 }
 0x703   : > { %1797 = vmatprep.subr.bf16.mxu0 %v2187_v0 }
 0x707   : > { %v1957_v44 = vpop.eup %1956 }
 0x708   : > { %v1033_v45 = vmul.f32 %v1957_v44, %v1955_v39  ;;  %v1940_v39 = vld [vmem:[%s2699_s9] sm:$0xff]  }
 0x70a   : > { %v1034_v47 = vpack.c.bf16 %v1033_v45, %v1033_v45 }
 0x70c   : > { %1788 = vmatmul.mubr.msk.bf16.vlgmr.msra.gmra.mrb[12].mxu0 %vm647_vm2, %v1034_v47 }
 0x70d   : > { %1798 = vmatpush3.bf16.xpose.msra.mxu0 %v1140_v48  ;;  %1799 = vmatprep.mubr.msk.bf16.mxu0 %vm2188_vm0, %v2187_v0  ;;  %v1683_v48 = vld [vmem:[#allocation10] ss:$0 sm:$0xff] }
 0x70e   : > { %1809 = vmatprep.subr.bf16.mxu0 %v2187_v0 }
 0x714   : > { %1800 = vmatmul.mubr.msk.bf16.vlgmr.msra.gmra.mrb[16].mxu0 %vm647_vm2, %v1133_v49 }
 0x715   : > { %1811 = vmatprep.mubr.msk.bf16.mxu0 %vm2188_vm0, %v2187_v0 }
 0x7df   : > { %v1077_v52 = vpop.f32.mrb[12].mxu0 }
 0x7e0   : > { %v1083_v53 = vpack.c.bf16 %v1077_v52, %v1077_v52  ;;  %v1789_v54 = vpop.f32.mrb[13].mxu0  ;;  %v1944_v52 = vld [vmem:[%s2701_s11 + $0x10] sm:$0xff]  }
 0x7e1   : > { %v1080_v55 = vpop.f32.mrb[14].mxu0  ;;  %v1684_v54 = vld [vmem:[%s2700_s10] ss:$0 sm:$0xff] }
 0x7e2   : > { %v1790_v56 = vpop.f32.mrb[15].mxu0  ;;  %1794 = vmatmul.mubr.msk.bf16.vlgmr.msra.gmra.mrb[20].mxu1 %vm647_vm2, %v1083_v53  ;;  %v1945_v53 = vld [vmem:[%s2701_s11 + $0x18] sm:$0xff]  }
 0x7e3   : > { %1805 = vmatprep.mubr.msk.bf16.mxu1 %vm2188_vm0, %v2187_v0 }
 0x7e7   : > { %v1176_v57 = vpop.f32.mrb[16].mxu0 }
 0x7e8   : > { %v1182_v58 = vmul.f32 0.35355338, %v1176_v57  ;;  %v1801_v59 = vpop.f32.mrb[17].mxu0 }
 0x7e9   : > { %v1179_v60 = vpop.f32.mrb[18].mxu0 }
 0x7ea   : > { %v1802_v61 = vpop.f32.mrb[19].mxu0  ;;  %v1183_v62 = vadd.f32 %v1182_v58, %v2516_v26  ;;  %v1245_v26 = vld [vmem:[%s2695_s5 + $0xc] sm:$0xf] }
 0x7ec   : > { %v1184_v63 = vsel %vm647_vm2, %v1183_v62, -inf }
 0x7ed   : > { %1185 = vmax.xlane.f32.xlu0 %v1184_v63 }
 0x803   : > { %1196 = vrot.lane.b32.xlu0 %v2496_v13, %s2199_s20  ;;  %v1250_v13 = vsel %vm719_vm3, %v1245_v26, 0  ;;  %s2743_s20 = sld [smem:[#allocation25_spill]] }
 0x804   : > { %1810 = vmatpush3.bf16.msra.mxu0 %v1250_v13 }
 0x805   : > { %1823 = vmatprep.subr.bf16.mxu0 %v2187_v0 }
 0x809   : > { %s2744_s29 = smov %s2743_s20  ;;  %s2648_s28 = scalar_lea.hbm %s2743_s20, %s1697_s24 }
 0x87a   : > { %v1186_v1 = vpop.xlane.xlu0 %1185 }
 0x87b   : > { %v1187_v2 = vsub.f32 %v1183_v62, %v1186_v1 }
 0x87d   : > { %v1188_v3 = vmul.f32 1.442695, %v1187_v2 }
 0x87e   : > { %v1197_v4 = vpop.permute.xlu0 %1196 }
 0x87f   : > { %1958 = vpow2.f32 %v1188_v3  ;;  %v1202_v5 = vsel %vm719_vm3, %v1197_v4, 0 }
 0x880   : > { %1804 = vmatpush3.bf16.msra.mxu1 %v1202_v5 }
 0x881   : > { %1815 = vmatprep.subr.bf16.mxu1 %v2187_v0 }
 0x889   : > { %v1959_v7 = vpop.eup %1958 }
 0x88a   : > { %v1190_v8 = vsel %vm647_vm2, %v1959_v7, 0.0 }
 0x88b   : > { %1191 = vadd.xlane.f32.xlu1 %v1190_v8 }
 0x8b5   : > { %v1125_v9 = vpop.f32.mrb[20].mxu1 }
 0x8b6   : > { %v1131_v10 = vadd.f32 %v1125_v9, %v2559_v24  ;;  %v1795_v11 = vpop.f32.mrb[21].mxu1 }
 0x8b7   : > { %v1128_v12 = vpop.f32.mrb[22].mxu1 }
 0x8b8   : > { %v1796_v14 = vpop.f32.mrb[23].mxu1 }
 0x918   : > { %v1192_v15 = vpop.xlane.xlu1 %1191 }
 0x919   : > { %1960 = vrcp.f32 %v1192_v15  ;;  %v1694_v15 = vld [vmem:[%s2703_s13] ss:$0 sm:$0xff] }
 0x923   : > { %v1961_v16 = vpop.eup %1960 }
 0x924   : > { %v1194_v17 = vmul.f32 %v1961_v16, %v1959_v7 }
 0x926   : > { %v1195_v18 = vpack.c.bf16 %v1194_v17, %v1194_v17  ;;  %v1695_v17 = vld [vmem:[%s2742_s27] ss:$0 sm:$0xff] }
 0x928   : > { %1806 = vmatmul.mubr.msk.bf16.vlgmr.msra.gmra.mrb[24].mxu1 %vm647_vm2, %v1195_v18 }
 0x929   : > { %1819 = vmatprep.mubr.msk.bf16.mxu1 %vm2188_vm0, %v2187_v0  ;;  %1816 = vmatpush3.bf16.msra.mxu1 %v1940_v39 }
 0x92a   : > { %1817 = vmatprep.subr.bf16.mxu1 %v2187_v0 }
 0x92d   : > { %1818 = vmatpush3.bf16.msra.mxu1 %v1941_v40 }
 0x9fb   : > { %v1238_v19 = vpop.f32.mrb[24].mxu1 }
 0x9fc   : > { %v1244_v20 = vpack.c.bf16 %v1238_v19, %v1238_v19  ;;  %v1807_v21 = vpop.f32.mrb[25].mxu1 }
 0x9fd   : > { %v1241_v22 = vpop.f32.mrb[26].mxu1 }
 0x9fe   : > { %v1808_v23 = vpop.f32.mrb[27].mxu1  ;;  %1812 = vmatmul.mubr.msk.bf16.vlgmr.msra.gmra.mrb[20].mxu0 %vm647_vm2, %v1244_v20 }
 0x9ff   : > { %1831 = vmatprep.mubr.msk.bf16.mxu0 %vm2188_vm0, %v2187_v0 }
 0xad1   : > { %v1286_v24 = vpop.f32.mrb[20].mxu0 }
 0xad2   : > { %v1292_v27 = vadd.f32 %v1286_v24, %v1131_v10  ;;  %v1813_v28 = vpop.f32.mrb[21].mxu0 }
 0xad3   : > { %v1289_v29 = vpop.f32.mrb[22].mxu0 }
 0xad4   : > { %v1300_v30 = vadd.f32 %v1681_v25, %v1292_v27  ;;  %v1814_v31 = vpop.f32.mrb[23].mxu0 }
 0xad6   : > { %v1301_v32 = vadd.f32 %v1300_v30, %v2488_v6  ;;  %v1942_v6 = vld [vmem:[%s2701_s11] sm:$0xff]  }
 0xad7   : > { %1824 = vmatpush3.bf16.msra.mxu0 %v1942_v6 }
 0xad8   : > { %v1302_v33 = vsel %vm596_vm1, %v1301_v32, 0.0  ;;  %1825 = vmatprep.subr.bf16.mxu0 %v2187_v0 }
 0xad9   : > { %1303 = vadd.xlane.f32.xlu1 %v1302_v33 }
 0xadb   : > { %1826 = vmatpush3.bf16.msra.mxu0 %v1943_v41 }
 0xadc   : > { %1827 = vmatprep.subr.bf16.mxu0 %v2187_v0 }
 0xadf   : > { %1828 = vmatpush3.bf16.msra.mxu0 %v1944_v52 }
 0xae0   : > { %1829 = vmatprep.subr.bf16.mxu0 %v2187_v0  ;;  %v1688_v0 = vld [vmem:[%s2702_s12] ss:$0 sm:$0xff] }
 0xae3   : > { %1830 = vmatpush3.bf16.msra.mxu0 %v1945_v53 }
 0xb66   : > { %v1304_v34 = vpop.xlane.xlu1 %1303 }
 0xb67   : > { %v1306_v35 = vmul.f32 0.03125, %v1304_v34 }
 0xb69   : > { %v1307_v36 = vsub.f32 %v1301_v32, %v1306_v35 }
 0xb6b   : > { %v1308_v37 = vmul.f32 %v1307_v36, %v1307_v36 }
 0xb6d   : > { %v1309_v38 = vsel %vm596_vm1, %v1308_v37, 0.0 }
 0xb6e   : > { %1310 = vadd.xlane.f32.xlu1 %v1309_v38 }
 0xbfb   : > { %v1311_v42 = vpop.xlane.xlu1 %1310 }
 0xbfc   : > { %v1312_v43 = vmul.f32 0.03125, %v1311_v42 }
 0xbfe   : > { %v1313_v44 = vadd.f32 1e-05, %v1312_v43 }
 0xc00   : > { %1962 = vrsqrt.f32 %v1313_v44 }
 0xc0a   : > { %v1963_v45 = vpop.eup %1962 }
 0xc0b   : > { %v1315_v47 = vmul.f32 %v1963_v45, %v1307_v36 }
 0xc0d   : > { %v1323_v49 = vmul.f32 %v1682_v46, %v1315_v47 }
 0xc0f   : > { %v1331_v50 = vadd.f32 %v1683_v48, %v1323_v49 }
 0xc11   : > { %v1332_v51 = vpack.c.bf16 %v1331_v50, %v1331_v50 }
 0xc13   : > { %1820 = vmatmul.mubr.msk.bf16.vlgmr.msra.gmra.mrb[28].mxu1 %vm596_vm1, %v1332_v51 }
 0xce6   : > { %v1393_v55 = vpop.f32.mrb[28].mxu1 }
 0xce7   : > { %v1394_v56 = vadd.f32 %v1684_v54, %v1393_v55  ;;  %v1821_v57 = vpop.f32.mrb[29].mxu1 }
 0xce8   : > { %v1396_v58 = vpop.f32.mrb[30].mxu1 }
 0xce9   : > { %v1399_v59 = vmax.f32 %v1394_v56, 0.0  ;;  %v1822_v60 = vpop.f32.mrb[31].mxu1 }
 0xceb   : > { %v1400_v61 = vpack.c.bf16 %v1399_v59, %v1399_v59 }
 0xced   : > { %1832 = vmatmul.mubr.msk.bf16.vlgmr.msra.gmra.mrb[24].mxu0 %vm1440_vm4, %v1400_v61 }
 0xdc0   : > { %v1478_v62 = vpop.f32.mrb[24].mxu0 }
 0xdc1   : > { %v1479_v63 = vadd.f32 %v1688_v0, %v1478_v62  ;;  %v1833_v1 = vpop.f32.mrb[25].mxu0 }
 0xdc2   : > { %v1481_v2 = vpop.f32.mrb[26].mxu0 }
 0xdc3   : > { %v1834_v3 = vpop.f32.mrb[27].mxu0  ;;  %v1484_v4 = vadd.f32 %v1479_v63, %v1331_v50 }
 0xdc5   : > { %v1485_v5 = vsel %vm596_vm1, %v1484_v4, 0.0 }
 0xdc6   : > { %1486 = vadd.xlane.f32.xlu1 %v1485_v5 }
 0xe53   : > { %v1487_v7 = vpop.xlane.xlu1 %1486 }
 0xe54   : > { %v1488_v8 = vmul.f32 0.03125, %v1487_v7 }
 0xe56   : > { %v1489_v26 = vsub.f32 %v1484_v4, %v1488_v8 }
 0xe58   : > { %v1490_v13 = vmul.f32 %v1489_v26, %v1489_v26 }
 0xe5a   : > { %v1491_v9 = vsel %vm596_vm1, %v1490_v13, 0.0 }
 0xe5b   : > { %1492 = vadd.xlane.f32.xlu1 %v1491_v9 }
 0xee8   : > { %v1493_v10 = vpop.xlane.xlu1 %1492 }
 0xee9   : > { %v1494_v11 = vmul.f32 0.03125, %v1493_v10 }
 0xeeb   : > { %v1495_v12 = vadd.f32 1e-05, %v1494_v11 }
 0xeed   : > { %1964 = vrsqrt.f32 %v1495_v12 }
 0xef7   : > { %v1965_v14 = vpop.eup %1964 }
 0xef8   : > { %v1497_v16 = vmul.f32 %v1965_v14, %v1489_v26 }
 0xefa   : > { %v1505_v18 = vmul.f32 %v1694_v15, %v1497_v16 }
 0xefc   : > { %v1513_v19 = vadd.f32 %v1695_v17, %v1505_v18 }
 0xefe   : > { %v1514_v20 = vpack.c.bf16 %v1513_v19, %v1513_v19 }
 0xf00   : > { %1516 = vst.msk [vmem:[%s559_s18] sm:$0xf] %vm1515_vm5, %v1514_v20 }
 0xf01   : > { %2119 = shalt.err (!%p2116_p1)
}
 0xf02   : > { %s2120_s21 = scalar_lea.hbm %s2648_s28, 64  ;;  %s2124_s24 = scalar_lea.hbm %s2744_s29, 128 }
 0xf03   : > { %p2121_p0 = scmp.ne.s32.totalorder %s2648_s28, %s2120_s21  ;;  %p2125_p9 = scmp.lt.u32.totalorder %s2648_s28, %s2744_s29 }
 0xf04   : > { %p2126_p12 = scmp.lt.u32.totalorder %s2124_s24, %s2120_s21  ;;  %p2128_p2 = scmp.lt.u32.totalorder %s2120_s21, %s2648_s28 }
 0xf05   : > { %p2122_p6 = pnand %p2121_p0, %p2745_p3 }
 0xf06   : > { %p2127_p10 = por %p2126_p12, %p2125_p9 }
 0xf07   : > { %p2123_p5 = pneg %p2122_p6 }
 0xf08   : > { %p2129_p4 = por %p2128_p2, %p2127_p10 }
 0xf0a   : > { %p2130_p7 = pnand %p2129_p4, %p2123_p5 }
 0xf0c   : > { %2133 = shalt.err (!%p2130_p7)
}
 0xf0d   : > { %1855 = dma.vmem_to_hbm [thread:$0]  (%p2745_p3), %s2650_s17, 64, %s2648_s28, %s1518_s26  }
 0xf0e PF: > { %s2746_s14 = sld [smem:[#allocation18_spill]]  ;;  %s2747_s20 = sld [smem:[#allocation16_spill]] }
 0xf0f   : > { %s2748_s23 = sld [smem:[#allocation22_spill]] }
 0xf14   : > { %p1887_p8 = scmp.ge.s32.totalorder %s2746_s14, 2  ;;  %s1543_s22 = sand.u32 1, %s2747_s20  }
 0xf15   : > { %p2749_p11 = scmp.ne.s32.totalorder %s2748_s23, 0  ;;  %s1544_s30 = scalar_lea.sflag [#allocation4], %s1543_s22 }
 0xf17   : > { %p1874_p13 = pnand %p1887_p8, %p2749_p11 }
 0xf19   : > { %2163 = dma.done.wait (!%p1874_p13), %s1544_s30, 64  }
 0xf1a   : > { %2165 = vsyncadd (!%p1874_p13), %s1544_s30, 4294967232  ;;  %s2750_s21 = sld [smem:[#allocation19_spill]]  ;;  %s2751_s15 = sld [smem:[#allocation17_spill]] }
 0xf1b   : > { %s2752_s20 = sld [smem:[#allocation20_spill]]  ;;  %s2753_s18 = smov %s2172_s19 }
 0xf20   : > { %p28_p1 = scmp.ge.s32.totalorder %s2750_s21, 4   ;;  %s2754_s19 = smov %s2751_s15 }
 0xf22   :  { %30 = sbr.rel (!%p28_p1) target bundleno = 10 (0xa), region = 139 }
 0xf29   :  { %1549 = vsyncpa [#allocation3], 1 }
 0xf2a   :  { %1551 = vsyncpa [#allocation3 + $0x1], 1 }
 0xf2b   :  { %1552 = vsyncpa [#allocation6], 1 }
 0xf2c   :  { %1553 = vsyncpa [#allocation9], 1 }
 0xf2d   :  { %1554 = vsyncpa [#allocation4], 1 }
 0xf2e   :  { %1556 = vsyncpa [#allocation4 + $0x1], 1 }

// kernel: tpu_custom_call.1
= control target key start
LH: loop header
LB: loop body
LE: loop exit
PB: predicated region body
PF: predicated region fallthrough
CT: control target
= control target key end

     0   :  { %s2690_s0 = inlined_call_operand.vmem [shape: f32[2,8,32], index: 0, kind: input, shape index: {}]   ;;  %s2691_s1 = inlined_call_operand.vmem [shape: f32[2,1,8], index: 1, kind: input, shape index: {}]   ;;  %s2692_s2 = inlined_call_operand.hbm [shape: f32[8,32], index: 2, kind: input, shape index: {}]   ;;  %s2693_s3 = inlined_call_operand.vmem [shape: bf16[32,96], index: 3, kind: input, shape index: {}]   ;;  %s2694_s4 = inlined_call_operand.hbm [shape: f32[1,96], index: 4, kind: input, shape index: {}]   ;;  %s2695_s5 = inlined_call_operand.vmem [shape: bf16[32,32], index: 5, kind: input, shape index: {}]   ;;  %s2696_s6 = inlined_call_operand.hbm [shape: f32[1,32], index: 6, kind: input, shape index: {}]   ;;  %s2697_s7 = inlined_call_operand.hbm [shape: f32[1,32], index: 7, kind: input, shape index: {}]   ;;  %s2698_s8 = inlined_call_operand.hbm [shape: f32[1,32], index: 8, kind: input, shape index: {}]   ;;  %s2699_s9 = inlined_call_operand.vmem [shape: bf16[32,64], index: 9, kind: input, shape index: {}]   ;;  %s2700_s10 = inlined_call_operand.vmem [shape: f32[1,64], index: 10, kind: input, shape index: {}]   ;;  %s2701_s11 = inlined_call_operand.vmem [shape: bf16[64,32], index: 11, kind: input, shape index: {}]   ;;  %s2702_s12 = inlined_call_operand.vmem [shape: f32[1,32], index: 12, kind: input, shape index: {}]   ;;  %s2703_s13 = inlined_call_operand.vmem [shape: f32[1,32], index: 13, kind: input, shape index: {}]   ;;  %s2704_s14 = inlined_call_operand.vmem [shape: f32[1,32], index: 14, kind: input, shape index: {}]   ;;  %s2705_s15 = inlined_call_operand.hbm [shape: bf16[2,8,32], index: 15, kind: output, shape index: {}]  }
   0x1   :  { %2718 = sst [smem:[#allocation23_spill]] %s2694_s4 }
   0x2   :  { %2719 = sst [smem:[#allocation24_spill]] %s2704_s14 }
   0x3   :  { %2720 = sst [smem:[#allocation25_spill]] %s2705_s15 }
   0x4   :  { %20 = vsyncpa [#allocation3], 0 }
   0x5   :  { %21 = vsyncpa [#allocation6], 0 }
   0x6   :  { %22 = vsyncpa [#allocation9], 0 }
   0x7   :  { %23 = vsyncpa [#allocation4], 0 }
   0x8   :  { %25 = vsyncpa [#allocation4 + $0x1], 0  ;;  %s2281_s18 = smov 0   ;;  %s2283_s19 = smov 0  }
   0x9   :  { %s2285_s20 = smov 0   ;;  %s2287_s21 = smov 0  }
   0xa LB: > { %2721 = sst [smem:[#allocation16_spill]] %s2168_s18  ;;  %s2302_s22 = sadd.s32 4294967295, %s2180_s21   ;;  %s2180_s21 = sphi %s2287_s21, %s2750_s21   ;;  %s2176_s20 = sphi %s2285_s20, %s2752_s20   ;;  %s2172_s19 = sphi %s2283_s19, %s2754_s19   ;;  %s2168_s18 = sphi %s2281_s18, %s2753_s18  }
   0xb   : > { %2722 = sst [smem:[#allocation17_spill]] %s2176_s20  ;;  %s1649_s23 = sadd.s32 4294967294, %s2180_s21  }
   0xc   : > { %2723 = sst [smem:[#allocation18_spill]] %s2180_s21  ;;  %s2306_s24 = sadd.s32 1, %s2180_s21  }
   0xd   : > { %2724 = sst [smem:[#allocation19_spill]] %s2306_s24  ;;  %s363_s25 = sadd.s32 1, %s2176_s20 }
   0xe   : > { %s360_s26 = ssub.s32 %s2180_s21, %s2306_s24  ;;  %p373_p0 = scmp.ne.s32.totalorder %s2176_s20, %s2172_s19 }
   0xf   : > { %p361_p1 = scmp.eq.s32.totalorder %s360_s26, 0  ;;  %p374_p2 = scmp.eq.s32.totalorder %s2302_s22, 1 }
  0x10   : > { %p379_p3 = scmp.ne.s32.totalorder %s2172_s19, %s2168_s18  ;;  %p380_p4 = scmp.eq.s32.totalorder %s1649_s23, 1 }
  0x11   : > { %s2317_s27 = scalar_select %p361_p1, %s2176_s20, %s363_s25  }
  0x12   : > { %p2319_p5 = por %p374_p2, %p373_p0  ;;  %p2323_p6 = por %p380_p4, %p379_p3 }
  0x13   : > { %2725 = sst [smem:[#allocation20_spill]] %s2317_s27  ;;  %p1650_p7 = scmp.ge.s32.totalorder %s2180_s21, 1 }
  0x14   : > { %s2726_s28 = scalar_select %p2319_p5, 1, 0 }
  0x15   : > { %s2728_s29 = scalar_select %p2323_p6, 1, 0 }
  0x16   : > { %2727 = sst [smem:[#allocation21_spill]] %s2726_s28  ;;  %p387_p8 = scmp.lt.s32.totalorder %s2180_s21, 3 }
  0x17   : > { %2729 = sst [smem:[#allocation22_spill]] %s2728_s29  ;;  %p2713_p9 = scmp.eq.s32.totalorder %s2302_s22, 0 }
  0x18   : > { %p2330_p10 = pnand %p1650_p7, %p387_p8  ;;  %s2182_s16 = smov [#allocation5]  }
  0x19   : > { %s414_s17 = sshll.u32 %s2182_s16, 4  ;;  %s2183_s23 = smov [#allocation8]   ;;  %s415_s17 = int_to_ptr.vmem [resolvable:$true] %s414_s17 }
  0x1a   : > { %s2730_s30 = scalar_select %p2330_p10, 1, 0 }
  0x1b   : > { %p1857_p11 = pneg %p2330_p10  ;;  %s439_s25 = sshll.u32 %s2183_s23, 4  ;;  %s2342_s25 = int_to_ptr.vmem [resolvable:$true] %s439_s25 }
  0x1c   : > { %s2184_s27 = smov [#allocation2]   ;;  %s2732_s4 = sld [smem:[#allocation23_spill]] }
  0x1d   : > { %p2338_p12 = pnand %p2713_p9, %p1857_p11  ;;  %s400_s20 = sshll.u32 %s2184_s27, 4  ;;  %s2344_s20 = int_to_ptr.vmem [resolvable:$true] %s400_s20 }
  0x1f   : > { %p2354_p0 = pneg %p2338_p12 }
  0x22   : > { %s1966_s16 = scalar_lea.hbm %s2732_s4, 16 }
  0x23   : > { %p1967_p13 = scmp.ne.s32.totalorder %s2732_s4, %s1966_s16  ;;  %p1973_p3 = scmp.lt.u32.totalorder %s1966_s16, %s2732_s4 }
  0x25   : > { %p1969_p1 = pnand %p2354_p0, %p1967_p13 }
  0x27   : > { %p1970_p2 = pneg %p1969_p1 }
  0x29   : > { %p1975_p4 = pnand %p1973_p3, %p1970_p2 }
  0x2b   : > { %1978 = shalt.err (!%p1975_p4)
}
  0x2c   : > { %s1979_s24 = scalar_lea.vmem %s415_s17, 16  ;;  %s1986_s18 = scalar_lea.vmem %s415_s17, 32 }
  0x2d   : > { %p1980_p7 = scmp.ne.s32.totalorder %s415_s17, %s1979_s24  ;;  %p1987_p9 = scmp.lt.s32.totalorder %s415_s17, %s415_s17 }
  0x2e   : > { %p1988_p6 = scmp.lt.s32.totalorder %s1986_s18, %s1979_s24 }
  0x2f   : > { %p1982_p8 = pnand %p1980_p7, %p2354_p0 }
  0x30   : > { %p1989_p5 = por %p1988_p6, %p1987_p9 }
  0x31   : > { %p1983_p11 = pneg %p1982_p8 }
  0x33   : > { %p1990_p10 = pnand %p1989_p5, %p1983_p11 }
  0x35   : > { %1993 = shalt.err (!%p1990_p10)
}
  0x36   : > { %1863 = dma.hbm_to_vmem [thread:$0]  (!%p2338_p12), %s2732_s4, 16, %s415_s17, [#allocation6]  }
  0x37   : > { %s1994_s27 = scalar_lea.hbm %s2697_s7, 16 }
  0x38   : > { %p1995_p13 = scmp.ne.s32.totalorder %s2697_s7, %s1994_s27  ;;  %p2001_p5 = scmp.lt.u32.totalorder %s1994_s27, %s2697_s7 }
  0x3a   : > { %p1997_p1 = pnand %p1995_p13, %p2354_p0 }
  0x3c   : > { %p1998_p6 = pneg %p1997_p1 }
  0x3e   : > { %p2003_p9 = pnand %p2001_p5, %p1998_p6 }
  0x40   : > { %2006 = shalt.err (!%p2003_p9)
}
  0x41   : > { %s2007_s17 = scalar_lea.vmem %s2342_s25, 16  ;;  %s2014_s14 = scalar_lea.vmem %s2342_s25, 32 }
  0x42   : > { %p2008_p10 = scmp.ne.s32.totalorder %s2342_s25, %s2007_s17  ;;  %p2015_p4 = scmp.lt.s32.totalorder %s2342_s25, %s2342_s25 }
  0x43   : > { %p2016_p7 = scmp.lt.s32.totalorder %s2014_s14, %s2007_s17 }
  0x44   : > { %p2010_p2 = pnand %p2008_p10, %p2354_p0 }
  0x45   : > { %p2017_p8 = por %p2016_p7, %p2015_p4 }
  0x46   : > { %p2011_p3 = pneg %p2010_p2 }
  0x48   : > { %p2018_p11 = pnand %p2017_p8, %p2011_p3 }
  0x4a   : > { %2021 = shalt.err (!%p2018_p11)
}
  0x4b   : > { %1869 = dma.hbm_to_vmem [thread:$0]  (!%p2338_p12), %s2697_s7, 16, %s2342_s25, [#allocation9]  }
  0x4c   : > { %s2022_s16 = scalar_lea.hbm %s2692_s2, 128 }
  0x4d   : > { %p2023_p13 = scmp.ne.s32.totalorder %s2692_s2, %s2022_s16  ;;  %p2029_p5 = scmp.lt.u32.totalorder %s2022_s16, %s2692_s2 }
  0x4f   : > { %p2025_p1 = pnand %p2023_p13, %p2354_p0 }
  0x51   : > { %p2026_p6 = pneg %p2025_p1 }
  0x53   : > { %p2031_p9 = pnand %p2029_p5, %p2026_p6 }
  0x55   : > { %2034 = shalt.err (!%p2031_p9)
}
  0x56   : > { %s2035_s25 = scalar_lea.vmem %s2344_s20, 128  ;;  %p2043_p4 = scmp.lt.s32.totalorder %s2344_s20, %s2344_s20 }
  0x57   : > { %p2036_p10 = scmp.ne.s32.totalorder %s2344_s20, %s2035_s25  ;;  %p2044_p7 = scmp.lt.s32.totalorder %s2035_s25, %s2035_s25 }
  0x59   : > { %p2038_p2 = pnand %p2036_p10, %p2354_p0  ;;  %p2045_p8 = por %p2044_p7, %p2043_p4 }
  0x5b   : > { %p2039_p3 = pneg %p2038_p2 }
  0x5d   : > { %p2046_p11 = pnand %p2045_p8, %p2039_p3 }
  0x5f   : > { %2049 = shalt.err (!%p2046_p11)
}
  0x60   : > { %1860 = dma.hbm_to_vmem [thread:$0]  (!%p2338_p12), %s2692_s2, 128, %s2344_s20, [#allocation3]  }
  0x61   : > { %s2185_s21 = smov [#allocation7]   ;;  %s2186_s15 = smov [#allocation10]  }
  0x62   : > { %s428_s29 = sshll.u32 %s2185_s21, 4  ;;  %s450_s16 = sshll.u32 %s2186_s15, 4  ;;  %s429_s29 = int_to_ptr.vmem [resolvable:$true] %s428_s29  ;;  %s451_s16 = int_to_ptr.vmem [resolvable:$true] %s450_s16 }
  0x63   : > { %s2050_s18 = scalar_lea.hbm %s2696_s6, 16 }
  0x64   : > { %p2051_p13 = scmp.ne.s32.totalorder %s2696_s6, %s2050_s18  ;;  %p2057_p5 = scmp.lt.u32.totalorder %s2050_s18, %s2696_s6 }
  0x66   : > { %p2053_p1 = pnand %p2051_p13, %p2354_p0 }
  0x68   : > { %p2054_p6 = pneg %p2053_p1 }
  0x6a   : > { %p2059_p9 = pnand %p2057_p5, %p2054_p6 }
  0x6c   : > { %2062 = shalt.err (!%p2059_p9)
}
  0x6d   : > { %s2063_s20 = scalar_lea.vmem %s429_s29, 16  ;;  %s2070_s28 = scalar_lea.vmem %s429_s29, 32 }
  0x6e   : > { %p2064_p10 = scmp.ne.s32.totalorder %s429_s29, %s2063_s20  ;;  %p2071_p4 = scmp.lt.s32.totalorder %s429_s29, %s429_s29 }
  0x6f   : > { %p2072_p7 = scmp.lt.s32.totalorder %s2070_s28, %s2063_s20 }
  0x70   : > { %p2066_p2 = pnand %p2064_p10, %p2354_p0 }
  0x71   : > { %p2073_p8 = por %p2072_p7, %p2071_p4 }
  0x72   : > { %p2067_p3 = pneg %p2066_p2 }
  0x74   : > { %p2074_p11 = pnand %p2073_p8, %p2067_p3 }
  0x76   : > { %2077 = shalt.err (!%p2074_p11)
}
  0x77   : > { %1866 = dma.hbm_to_vmem [thread:$0]  (!%p2338_p12), %s2696_s6, 16, %s429_s29, [#allocation6]  }
  0x78   : > { %s2078_s24 = scalar_lea.hbm %s2698_s8, 16 }
  0x79   : > { %p2079_p13 = scmp.ne.s32.totalorder %s2698_s8, %s2078_s24  ;;  %p2085_p5 = scmp.lt.u32.totalorder %s2078_s24, %s2698_s8 }
  0x7b   : > { %p2081_p1 = pnand %p2079_p13, %p2354_p0 }
  0x7d   : > { %p2082_p6 = pneg %p2081_p1 }
  0x7f   : > { %p2087_p9 = pnand %p2085_p5, %p2082_p6 }
  0x81   : > { %2090 = shalt.err (!%p2087_p9)
}
  0x82   : > { %s2091_s20 = scalar_lea.vmem %s451_s16, 16  ;;  %s2098_s29 = scalar_lea.vmem %s451_s16, 32 }
  0x83   : > { %p2092_p10 = scmp.ne.s32.totalorder %s451_s16, %s2091_s20  ;;  %p2099_p4 = scmp.lt.s32.totalorder %s451_s16, %s451_s16 }
  0x84   : > { %p2100_p7 = scmp.lt.s32.totalorder %s2098_s29, %s2091_s20 }
  0x85   : > { %p2094_p2 = pnand %p2092_p10, %p2354_p0 }
  0x86   : > { %p2101_p8 = por %p2100_p7, %p2099_p4 }
  0x87   : > { %p2095_p3 = pneg %p2094_p2 }
  0x89   : > { %p2102_p11 = pnand %p2101_p8, %p2095_p3 }
  0x8b   : > { %2105 = shalt.err (!%p2102_p11)
}
  0x8c   : > { %1872 = dma.hbm_to_vmem [thread:$0]  (!%p2338_p12), %s2698_s8, 16, %s451_s16, [#allocation9]  }
  0x8d   : > { %p2734_p13 = scmp.ne.s32.totalorder %s2730_s30, 0 }
  0x8e   : > { %p2735_p1 = scmp.eq.s32.totalorder (!%p2734_p13), %s2302_s22, 0 }
  0x8f   : > { %494 = sbr.rel (%p2734_p13) target bundleno = 3854 (0xf0e), region = 80 }
  0x96   : > { %2151 = dma.done.wait (%p2735_p1), [#allocation3], 128   ;;  %p2736_p0 = pmov %p2735_p1 }
  0x98   : > { %2153 = vsyncadd (%p2736_p0), [#allocation3], 4294967168  ;;  %p2737_p6 = pmov %p2736_p0 }
  0x99   : > { %p2738_p5 = pmov %p2736_p0 }
  0x9a   : > { %2155 = dma.done.wait (%p2737_p6), [#allocation6], 32  }
  0x9b   : > { %2157 = vsyncadd (%p2738_p5), [#allocation6], 4294967264  ;;  %p2739_p9 = pmov %p2736_p0 }
  0x9c   : > { %p2740_p12 = pmov %p2736_p0 }
  0x9d   : > { %2159 = dma.done.wait (%p2739_p9), [#allocation9], 32  }
  0x9e   : > { %2161 = vsyncadd (%p2740_p12), [#allocation9], 4294967264  ;;  %p560_p10 = scmp.lt.s32.totalorder %s2302_s22, 1  ;;  %v2187_v0 = vmov 0.0   ;;  %vm2188_vm0 = vmmov 0   ;;  %v1938_v1 = vld [vmem:[%s2693_s3] sm:$0xff]   ;;  %v696_v20 = vlaneseq }
  0x9f   : > { %1735 = vmatprep.subr.bf16.mxu1 %v2187_v0  ;;  %1739 = vmatprep.mubr.msk.bf16.mxu1 %vm2188_vm0, %v2187_v0  ;;  %v1939_v2 = vld [vmem:[%s2693_s3 + $0x8] sm:$0xff]   ;;  %v570_v4 = vld [vmem:[#allocation2] sm:$0xff]  ;;  %vm596_vm1 = vcmask 261120   ;;  %s2189_s17 = smov 120   ;;  %s2190_s25 = smov 96   ;;  %vm647_vm2 = vcmask 64512  }
  0xa0   : > { %s2472_s30 = scalar_select %p560_p10, %s2302_s22, 1  ;;  %1749 = vmatprep.subr.bf16.mxu0 %v2187_v0  ;;  %1751 = vmatprep.mubr.msk.bf16.mxu0 %vm2188_vm0, %v2187_v0  ;;  %v1665_v8 = vld [vmem:[#allocation5] ss:$0 sm:$0xff]  ;;  %v697_v23 = vshrl.u32 %v696_v20, 7  ;;  %vm719_vm3 = vcmask 1043456   ;;  %vm1440_vm4 = vcmask 523264  }
  0xa1   : > { %1736 = vmatpush3.bf16.msra.mxu1 %v1938_v1  ;;  %s2191_s14 = smov 88   ;;  %s2192_s21 = smov 64   ;;  %v764_v63 = vld [vmem:[%s2695_s5] sm:$0xf]  ;;  %vm1515_vm5 = vcmask 257024  }
  0xa2   : > { %s1664_s26 = sshll.u32 %s2472_s30, 3  ;;  %1737 = vmatprep.subr.bf16.mxu1 %v2187_v0  ;;  %s566_s28 = scalar_lea.vmem %s2691_s1, %s2472_s30  ;;  %v698_v25 = vsub.s32 0, %v697_v23  ;;  %v929_v1 = vsel %vm719_vm3, %v764_v63, 0 }
  0xa3   : > { %s563_s15 = scalar_lea.vmem %s2690_s0, %s1664_s26  ;;  %v641_v21 = vld [vmem:[%s566_s28] sm:$0x1]  ;;  %s2193_s30 = smov 56  }
  0xa4   : > { %v568_v3 = vld [vmem:[%s563_s15] sm:$0xff]  ;;  %v642_v22 = vsub.f32 1.0, %v641_v21  ;;  %s2194_s26 = smov 112   ;;  %s2195_s23 = smov 80  }
  0xa5   : > { %v569_v5 = vmul.f32 5.656854, %v568_v3  ;;  %1738 = vmatpush3.bf16.msra.mxu1 %v1939_v2  ;;  %v878_v2 = vld [vmem:[%s2695_s5 + $0x4] sm:$0xf]  ;;  %s2196_s24 = smov 72   ;;  %s2197_s18 = smov 104  }
  0xa6   : > { %1743 = vmatprep.subr.bf16.mxu1 %v2187_v0  ;;  %v643_v24 = vmul.f32 -1e+09, %v642_v22  ;;  %v883_v3 = vsel %vm719_vm3, %v878_v2, 0  ;;  %s2199_s20 = smov 40   ;;  %s2741_s16 = sld [smem:[#allocation21_spill]] }
  0xa7   : > { %v2488_v6 = vadd.f32 %v570_v4, %v569_v5  ;;  %s2742_s27 = sld [smem:[#allocation24_spill]] }
  0xa8   : > { %v2516_v26 = vrot.slane %v643_v24, %v698_v25 }
  0xa9   : > { %v572_v7 = vpack.c.bf16 %v2488_v6, %v2488_v6 }
  0xab   : > { %1740 = vmatmul.mubr.msk.bf16.vlgmr.msra.gmra.mrb[0].mxu1 %vm596_vm1, %v572_v7 }
  0xac   : > { %1745 = vmatprep.mubr.msk.bf16.mxu1 %vm2188_vm0, %v2187_v0  ;;  %p2745_p3 = scmp.ne.s32.totalorder %s2741_s16, 0 }
 0x17e   : > { %v634_v9 = vpop.f32.mrb[0].mxu1 }
 0x17f   : > { %v635_v10 = vadd.f32 %v1665_v8, %v634_v9  ;;  %v1741_v11 = vpop.f32.mrb[1].mxu1 }
 0x180   : > { %v637_v12 = vpop.f32.mrb[2].mxu1 }
 0x181   : > { %v2496_v13 = vpack.c.bf16 %v635_v10, %v635_v10  ;;  %v1742_v14 = vpop.f32.mrb[3].mxu1 }
 0x183   : > { %765 = vrot.lane.b32.xlu1 %v2496_v13, %s2189_s17  ;;  %645 = vrot.lane.b32.xlu0 %v2496_v13, %s2190_s25  ;;  %s2198_s17 = smov 48  }
 0x187   : > { %767 = vrot.lane.b32.xlu0 %v2496_v13, %s2191_s14 }
 0x1f5   : > { %v646_v15 = vpop.permute.xlu0 %645  ;;  %v766_v19 = vpop.permute.xlu1 %765 }
 0x1f6   : > { %v652_v16 = vsel %vm647_vm2, %v646_v15, 0 }
 0x1f7   : > { %1744 = vmatpush3.bf16.xpose.msra.mxu1 %v652_v16 }
 0x1f8   : > { %1755 = vmatprep.subr.bf16.mxu1 %v2187_v0 }
 0x1f9   : > { %v768_v17 = vpop.permute.xlu0 %767 }
 0x1fa   : > { %v773_v18 = vsel %vm647_vm2, %v768_v17, 0 }
 0x1fe   : > { %1746 = vmatmul.mubr.msk.bf16.vlgmr.msra.gmra.mrb[4].mxu1 %vm647_vm2, %v2496_v13 }
 0x1ff   : > { %1756 = vmatpush3.bf16.xpose.msra.mxu1 %v773_v18  ;;  %1757 = vmatprep.mubr.msk.bf16.mxu1 %vm2188_vm0, %v2187_v0 }
 0x200   : > { %1767 = vmatprep.subr.bf16.mxu1 %v2187_v0 }
 0x206   : > { %1758 = vmatmul.mubr.msk.bf16.vlgmr.msra.gmra.mrb[8].mxu1 %vm647_vm2, %v766_v19 }
 0x207   : > { %1769 = vmatprep.mubr.msk.bf16.mxu1 %vm2188_vm0, %v2187_v0  ;;  %1768 = vmatpush3.bf16.msra.mxu1 %v883_v3 }
 0x208   : > { %1779 = vmatprep.subr.bf16.mxu1 %v2187_v0 }
 0x2d1   : > { %v688_v27 = vpop.f32.mrb[4].mxu1 }
 0x2d2   : > { %v694_v28 = vmul.f32 0.35355338, %v688_v27  ;;  %v1747_v29 = vpop.f32.mrb[5].mxu1 }
 0x2d3   : > { %v691_v30 = vpop.f32.mrb[6].mxu1 }
 0x2d4   : > { %v1748_v31 = vpop.f32.mrb[7].mxu1  ;;  %v701_v32 = vadd.f32 %v2516_v26, %v694_v28 }
 0x2d6   : > { %v702_v33 = vsel %vm647_vm2, %v701_v32, -inf }
 0x2d7   : > { %703 = vmax.xlane.f32.xlu1 %v702_v33 }
 0x2d9   : > { %v809_v34 = vpop.f32.mrb[8].mxu1 }
 0x2da   : > { %v815_v35 = vmul.f32 0.35355338, %v809_v34  ;;  %v1759_v36 = vpop.f32.mrb[9].mxu1 }
 0x2db   : > { %v812_v37 = vpop.f32.mrb[10].mxu1 }
 0x2dc   : > { %v1760_v38 = vpop.f32.mrb[11].mxu1  ;;  %v816_v39 = vadd.f32 %v815_v35, %v2516_v26 }
 0x2de   : > { %v817_v40 = vsel %vm647_vm2, %v816_v39, -inf }
 0x2df   : > { %818 = vmax.xlane.f32.xlu0 %v817_v40 }
 0x364   : > { %v704_v41 = vpop.xlane.xlu1 %703 }
 0x365   : > { %v705_v42 = vsub.f32 %v701_v32, %v704_v41 }
 0x367   : > { %v706_v43 = vmul.f32 1.442695, %v705_v42 }
 0x369   : > { %1946 = vpow2.f32 %v706_v43 }
 0x36c   : > { %v819_v44 = vpop.xlane.xlu0 %818 }
 0x36d   : > { %v820_v45 = vsub.f32 %v816_v39, %v819_v44 }
 0x36f   : > { %v821_v46 = vmul.f32 1.442695, %v820_v45 }
 0x371   : > { %1948 = vpow2.f32 %v821_v46 }
 0x373   : > { %v1947_v47 = vpop.eup %1946 }
 0x374   : > { %v708_v48 = vsel %vm647_vm2, %v1947_v47, 0.0 }
 0x375   : > { %709 = vadd.xlane.f32.xlu0 %v708_v48 }
 0x37b   : > { %v1949_v49 = vpop.eup %1948 }
 0x37c   : > { %v823_v50 = vsel %vm647_vm2, %v1949_v49, 0.0 }
 0x37d   : > { %824 = vadd.xlane.f32.xlu1 %v823_v50  ;;  %v1084_v50 = vld [vmem:[%s2695_s5 + $0x8] sm:$0xf] }
 0x38b   : > { %714 = vrot.lane.b32.xlu0 %v2496_v13, %s2192_s21  ;;  %s557_s21 = sand.u32 1, %s2172_s19  }
 0x38e   : > { %829 = vrot.lane.b32.xlu1 %v2496_v13, %s2193_s30  ;;  %s1663_s30 = sshll.u32 %s557_s21, 2 }
 0x38f   : > { %971 = vrot.lane.b32.xlu0 %v2496_v13, %s2194_s26  ;;  %s1518_s26 = scalar_lea.sflag [#allocation4], %s557_s21 }
 0x392   : > { %973 = vrot.lane.b32.xlu1 %v2496_v13, %s2195_s23 }
 0x402   : > { %v710_v51 = vpop.xlane.xlu0 %709 }
 0x403   : > { %1950 = vrcp.f32 %v710_v51  ;;  %v1089_v51 = vsel %vm719_vm3, %v1084_v50, 0 }
 0x406   : > { %v715_v52 = vpop.permute.xlu0 %714 }
 0x407   : > { %v721_v53 = vsel %vm719_vm3, %v715_v52, 0 }
 0x408   : > { %1750 = vmatpush3.bf16.msra.mxu0 %v721_v53 }
 0x409   : > { %1761 = vmatprep.subr.bf16.mxu0 %v2187_v0 }
 0x40a   : > { %v825_v54 = vpop.xlane.xlu1 %824  ;;  %v972_v18 = vpop.permute.xlu0 %971 }
 0x40b   : > { %1952 = vrcp.f32 %v825_v54 }
 0x40d   : > { %v1951_v55 = vpop.eup %1950 }
 0x40e   : > { %v712_v56 = vmul.f32 %v1951_v55, %v1947_v47  ;;  %v830_v57 = vpop.permute.xlu1 %829 }
 0x40f   : > { %v835_v59 = vsel %vm719_vm3, %v830_v57, 0 }
 0x410   : > { %v713_v58 = vpack.c.bf16 %v712_v56, %v712_v56 }
 0x412   : > { %1752 = vmatmul.mubr.msk.bf16.vlgmr.msra.gmra.mrb[0].mxu0 %vm647_vm2, %v713_v58  ;;  %v974_v10 = vpop.permute.xlu1 %973 }
 0x413   : > { %1762 = vmatpush3.bf16.msra.mxu0 %v835_v59  ;;  %1763 = vmatprep.mubr.msk.bf16.mxu0 %vm2188_vm0, %v2187_v0  ;;  %v979_v16 = vsel %vm647_vm2, %v974_v10, 0 }
 0x414   : > { %1773 = vmatprep.subr.bf16.mxu0 %v2187_v0 }
 0x415   : > { %v1953_v60 = vpop.eup %1952 }
 0x416   : > { %v827_v61 = vmul.f32 %v1953_v60, %v1949_v49 }
 0x418   : > { %v828_v62 = vpack.c.bf16 %v827_v61, %v827_v61 }
 0x41a   : > { %1764 = vmatmul.mubr.msk.bf16.vlgmr.msra.gmra.mrb[4].mxu0 %vm647_vm2, %v828_v62 }
 0x41b   : > { %1775 = vmatprep.mubr.msk.bf16.mxu0 %vm2188_vm0, %v2187_v0  ;;  %1774 = vmatpush3.bf16.msra.mxu0 %v929_v1 }
 0x41c   : > { %1785 = vmatprep.subr.bf16.mxu0 %v2187_v0 }
 0x4e5   : > { %v757_v4 = vpop.f32.mrb[0].mxu0 }
 0x4e6   : > { %v763_v5 = vpack.c.bf16 %v757_v4, %v757_v4  ;;  %v1753_v7 = vpop.f32.mrb[1].mxu0 }
 0x4e7   : > { %v760_v8 = vpop.f32.mrb[2].mxu0 }
 0x4e8   : > { %v1754_v9 = vpop.f32.mrb[3].mxu0  ;;  %1776 = vmatmul.mubr.msk.bf16.vlgmr.msra.gmra.mrb[8].mxu0 %vm647_vm2, %v763_v5 }
 0x4e9   : > { %1787 = vmatprep.mubr.msk.bf16.mxu0 %vm2188_vm0, %v2187_v0 }
 0x4ed   : > { %v871_v11 = vpop.f32.mrb[4].mxu0 }
 0x4ee   : > { %v877_v12 = vpack.c.bf16 %v871_v11, %v871_v11  ;;  %v1765_v14 = vpop.f32.mrb[5].mxu0 }
 0x4ef   : > { %v874_v15 = vpop.f32.mrb[6].mxu0 }
 0x4f0   : > { %v1766_v17 = vpop.f32.mrb[7].mxu0  ;;  %1770 = vmatmul.mubr.msk.bf16.vlgmr.msra.gmra.mrb[12].mxu1 %vm647_vm2, %v877_v12 }
 0x4f1   : > { %1780 = vmatpush3.bf16.xpose.msra.mxu1 %v979_v16  ;;  %1781 = vmatprep.mubr.msk.bf16.mxu1 %vm2188_vm0, %v2187_v0 }
 0x4f2   : > { %1791 = vmatprep.subr.bf16.mxu1 %v2187_v0 }
 0x4f8   : > { %1782 = vmatmul.mubr.msk.bf16.vlgmr.msra.gmra.mrb[16].mxu1 %vm647_vm2, %v972_v18 }
 0x4f9   : > { %1793 = vmatprep.mubr.msk.bf16.mxu1 %vm2188_vm0, %v2187_v0  ;;  %1792 = vmatpush3.bf16.msra.mxu1 %v1089_v51 }
 0x4fa   : > { %1803 = vmatprep.subr.bf16.mxu1 %v2187_v0 }
 0x5bb   : > { %v965_v19 = vpop.f32.mrb[8].mxu0 }
 0x5bc   : > { %v1777_v20 = vpop.f32.mrb[9].mxu0 }
 0x5bd   : > { %v968_v21 = vpop.f32.mrb[10].mxu0 }
 0x5be   : > { %v1778_v22 = vpop.f32.mrb[11].mxu0 }
 0x5c3   : > { %v919_v23 = vpop.f32.mrb[12].mxu1 }
 0x5c4   : > { %v2559_v24 = vadd.f32 %v965_v19, %v919_v23  ;;  %v1771_v25 = vpop.f32.mrb[13].mxu1 }
 0x5c5   : > { %v922_v27 = vpop.f32.mrb[14].mxu1  ;;  %v1681_v25 = vld [vmem:[#allocation7] ss:$0 sm:$0xff] }
 0x5c6   : > { %v1772_v28 = vpop.f32.mrb[15].mxu1 }
 0x5cb   : > { %v1015_v29 = vpop.f32.mrb[16].mxu1 }
 0x5cc   : > { %v1021_v30 = vmul.f32 0.35355338, %v1015_v29  ;;  %v1783_v31 = vpop.f32.mrb[17].mxu1 }
 0x5cd   : > { %v1018_v32 = vpop.f32.mrb[18].mxu1 }
 0x5ce   : > { %v1784_v33 = vpop.f32.mrb[19].mxu1  ;;  %v1022_v34 = vadd.f32 %v1021_v30, %v2516_v26 }
 0x5d0   : > { %v1023_v35 = vsel %vm647_vm2, %v1022_v34, -inf }
 0x5d1   : > { %1024 = vmax.xlane.f32.xlu1 %v1023_v35 }
 0x5e2   : > { %1134 = vrot.lane.b32.xlu1 %v2496_v13, %s2196_s24  ;;  %s1697_s24 = sshll.u32 %s2302_s22, 6  ;;  %s2200_s22 = smov [#allocation11]  }
 0x5e6   : > { %1132 = vrot.lane.b32.xlu1 %v2496_v13, %s2197_s18  ;;  %s559_s18 = scalar_lea.vmem [#allocation11], %s1663_s30  ;;  %s2110_s30 = sshll.u32 %s2200_s22, 4  ;;  %s2111_s30 = int_to_ptr.vmem [resolvable:$false] %s2110_s30 }
 0x5e7   : > { %s2112_s15 = scalar_lea.vmem %s2111_s30, 128 }
 0x65e   : > { %v1025_v36 = vpop.xlane.xlu1 %1024 }
 0x65f   : > { %v1026_v37 = vsub.f32 %v1022_v34, %v1025_v36 }
 0x661   : > { %v1027_v38 = vmul.f32 1.442695, %v1026_v37 }
 0x662   : > { %v1135_v46 = vpop.permute.xlu1 %1134 }
 0x663   : > { %1954 = vpow2.f32 %v1027_v38  ;;  %v1140_v48 = vsel %vm647_vm2, %v1135_v46, 0  ;;  %v1682_v46 = vld [vmem:[#allocation8] ss:$0 sm:$0xff] }
 0x666   : > { %v1133_v49 = vpop.permute.xlu1 %1132 }
 0x66d   : > { %v1955_v39 = vpop.eup %1954 }
 0x66e   : > { %v1029_v40 = vsel %vm647_vm2, %v1955_v39, 0.0 }
 0x66f   : > { %1030 = vadd.xlane.f32.xlu0 %v1029_v40  ;;  %v1941_v40 = vld [vmem:[%s2699_s9 + $0x8] sm:$0xff]  }
 0x685   : > { %1035 = vrot.lane.b32.xlu0 %v2496_v13, %s2198_s17  ;;  %s1531_s17 = sshll.u32 %s559_s18, 4  ;;  %s2650_s17 = int_to_ptr.vmem [resolvable:$true] %s1531_s17 }
 0x686   : > { %s2106_s23 = scalar_lea.vmem %s2650_s17, 64  ;;  %p2113_p8 = scmp.lt.s32.totalorder %s2650_s17, %s2111_s30 }
 0x687   : > { %p2107_p2 = scmp.ne.s32.totalorder %s2650_s17, %s2106_s23  ;;  %p2114_p11 = scmp.lt.s32.totalorder %s2112_s15, %s2106_s23 }
 0x689   : > { %p2108_p4 = pnand %p2107_p2, %p2745_p3  ;;  %p2115_p13 = por %p2114_p11, %p2113_p8 }
 0x68b   : > { %p2109_p7 = pneg %p2108_p4 }
 0x68d   : > { %p2116_p1 = pnand %p2115_p13, %p2109_p7 }
 0x6fc   : > { %v1031_v41 = vpop.xlane.xlu0 %1030 }
 0x6fd   : > { %1956 = vrcp.f32 %v1031_v41  ;;  %v1943_v41 = vld [vmem:[%s2701_s11 + $0x8] sm:$0xff]  }
 0x700   : > { %v1036_v42 = vpop.permute.xlu0 %1035 }
 0x701   : > { %v1041_v43 = vsel %vm719_vm3, %v1036_v42, 0 }
 0x702   : > { %1786 = vmatpush3.bf16.msra.mxu0 %v1041_v43 }
 0x703   : > { %1797 = vmatprep.subr.bf16.mxu0 %v2187_v0 }
 0x707   : > { %v1957_v44 = vpop.eup %1956 }
 0x708   : > { %v1033_v45 = vmul.f32 %v1957_v44, %v1955_v39  ;;  %v1940_v39 = vld [vmem:[%s2699_s9] sm:$0xff]  }
 0x70a   : > { %v1034_v47 = vpack.c.bf16 %v1033_v45, %v1033_v45 }
 0x70c   : > { %1788 = vmatmul.mubr.msk.bf16.vlgmr.msra.gmra.mrb[12].mxu0 %vm647_vm2, %v1034_v47 }
 0x70d   : > { %1798 = vmatpush3.bf16.xpose.msra.mxu0 %v1140_v48  ;;  %1799 = vmatprep.mubr.msk.bf16.mxu0 %vm2188_vm0, %v2187_v0  ;;  %v1683_v48 = vld [vmem:[#allocation10] ss:$0 sm:$0xff] }
 0x70e   : > { %1809 = vmatprep.subr.bf16.mxu0 %v2187_v0 }
 0x714   : > { %1800 = vmatmul.mubr.msk.bf16.vlgmr.msra.gmra.mrb[16].mxu0 %vm647_vm2, %v1133_v49 }
 0x715   : > { %1811 = vmatprep.mubr.msk.bf16.mxu0 %vm2188_vm0, %v2187_v0 }
 0x7df   : > { %v1077_v52 = vpop.f32.mrb[12].mxu0 }
 0x7e0   : > { %v1083_v53 = vpack.c.bf16 %v1077_v52, %v1077_v52  ;;  %v1789_v54 = vpop.f32.mrb[13].mxu0  ;;  %v1944_v52 = vld [vmem:[%s2701_s11 + $0x10] sm:$0xff]  }
 0x7e1   : > { %v1080_v55 = vpop.f32.mrb[14].mxu0  ;;  %v1684_v54 = vld [vmem:[%s2700_s10] ss:$0 sm:$0xff] }
 0x7e2   : > { %v1790_v56 = vpop.f32.mrb[15].mxu0  ;;  %1794 = vmatmul.mubr.msk.bf16.vlgmr.msra.gmra.mrb[20].mxu1 %vm647_vm2, %v1083_v53  ;;  %v1945_v53 = vld [vmem:[%s2701_s11 + $0x18] sm:$0xff]  }
 0x7e3   : > { %1805 = vmatprep.mubr.msk.bf16.mxu1 %vm2188_vm0, %v2187_v0 }
 0x7e7   : > { %v1176_v57 = vpop.f32.mrb[16].mxu0 }
 0x7e8   : > { %v1182_v58 = vmul.f32 0.35355338, %v1176_v57  ;;  %v1801_v59 = vpop.f32.mrb[17].mxu0 }
 0x7e9   : > { %v1179_v60 = vpop.f32.mrb[18].mxu0 }
 0x7ea   : > { %v1802_v61 = vpop.f32.mrb[19].mxu0  ;;  %v1183_v62 = vadd.f32 %v1182_v58, %v2516_v26  ;;  %v1245_v26 = vld [vmem:[%s2695_s5 + $0xc] sm:$0xf] }
 0x7ec   : > { %v1184_v63 = vsel %vm647_vm2, %v1183_v62, -inf }
 0x7ed   : > { %1185 = vmax.xlane.f32.xlu0 %v1184_v63 }
 0x803   : > { %1196 = vrot.lane.b32.xlu0 %v2496_v13, %s2199_s20  ;;  %v1250_v13 = vsel %vm719_vm3, %v1245_v26, 0  ;;  %s2743_s20 = sld [smem:[#allocation25_spill]] }
 0x804   : > { %1810 = vmatpush3.bf16.msra.mxu0 %v1250_v13 }
 0x805   : > { %1823 = vmatprep.subr.bf16.mxu0 %v2187_v0 }
 0x809   : > { %s2744_s29 = smov %s2743_s20  ;;  %s2648_s28 = scalar_lea.hbm %s2743_s20, %s1697_s24 }
 0x87a   : > { %v1186_v1 = vpop.xlane.xlu0 %1185 }
 0x87b   : > { %v1187_v2 = vsub.f32 %v1183_v62, %v1186_v1 }
 0x87d   : > { %v1188_v3 = vmul.f32 1.442695, %v1187_v2 }
 0x87e   : > { %v1197_v4 = vpop.permute.xlu0 %1196 }
 0x87f   : > { %1958 = vpow2.f32 %v1188_v3  ;;  %v1202_v5 = vsel %vm719_vm3, %v1197_v4, 0 }
 0x880   : > { %1804 = vmatpush3.bf16.msra.mxu1 %v1202_v5 }
 0x881   : > { %1815 = vmatprep.subr.bf16.mxu1 %v2187_v0 }
 0x889   : > { %v1959_v7 = vpop.eup %1958 }
 0x88a   : > { %v1190_v8 = vsel %vm647_vm2, %v1959_v7, 0.0 }
 0x88b   : > { %1191 = vadd.xlane.f32.xlu1 %v1190_v8 }
 0x8b5   : > { %v1125_v9 = vpop.f32.mrb[20].mxu1 }
 0x8b6   : > { %v1131_v10 = vadd.f32 %v1125_v9, %v2559_v24  ;;  %v1795_v11 = vpop.f32.mrb[21].mxu1 }
 0x8b7   : > { %v1128_v12 = vpop.f32.mrb[22].mxu1 }
 0x8b8   : > { %v1796_v14 = vpop.f32.mrb[23].mxu1 }
 0x918   : > { %v1192_v15 = vpop.xlane.xlu1 %1191 }
 0x919   : > { %1960 = vrcp.f32 %v1192_v15  ;;  %v1694_v15 = vld [vmem:[%s2703_s13] ss:$0 sm:$0xff] }
 0x923   : > { %v1961_v16 = vpop.eup %1960 }
 0x924   : > { %v1194_v17 = vmul.f32 %v1961_v16, %v1959_v7 }
 0x926   : > { %v1195_v18 = vpack.c.bf16 %v1194_v17, %v1194_v17  ;;  %v1695_v17 = vld [vmem:[%s2742_s27] ss:$0 sm:$0xff] }
 0x928   : > { %1806 = vmatmul.mubr.msk.bf16.vlgmr.msra.gmra.mrb[24].mxu1 %vm647_vm2, %v1195_v18 }
 0x929   : > { %1819 = vmatprep.mubr.msk.bf16.mxu1 %vm2188_vm0, %v2187_v0  ;;  %1816 = vmatpush3.bf16.msra.mxu1 %v1940_v39 }
 0x92a   : > { %1817 = vmatprep.subr.bf16.mxu1 %v2187_v0 }
 0x92d   : > { %1818 = vmatpush3.bf16.msra.mxu1 %v1941_v40 }
 0x9fb   : > { %v1238_v19 = vpop.f32.mrb[24].mxu1 }
 0x9fc   : > { %v1244_v20 = vpack.c.bf16 %v1238_v19, %v1238_v19  ;;  %v1807_v21 = vpop.f32.mrb[25].mxu1 }
 0x9fd   : > { %v1241_v22 = vpop.f32.mrb[26].mxu1 }
 0x9fe   : > { %v1808_v23 = vpop.f32.mrb[27].mxu1  ;;  %1812 = vmatmul.mubr.msk.bf16.vlgmr.msra.gmra.mrb[20].mxu0 %vm647_vm2, %v1244_v20 }
 0x9ff   : > { %1831 = vmatprep.mubr.msk.bf16.mxu0 %vm2188_vm0, %v2187_v0 }
 0xad1   : > { %v1286_v24 = vpop.f32.mrb[20].mxu0 }
 0xad2   : > { %v1292_v27 = vadd.f32 %v1286_v24, %v1131_v10  ;;  %v1813_v28 = vpop.f32.mrb[21].mxu0 }
 0xad3   : > { %v1289_v29 = vpop.f32.mrb[22].mxu0 }
 0xad4   : > { %v1300_v30 = vadd.f32 %v1681_v25, %v1292_v27  ;;  %v1814_v31 = vpop.f32.mrb[23].mxu0 }
 0xad6   : > { %v1301_v32 = vadd.f32 %v1300_v30, %v2488_v6  ;;  %v1942_v6 = vld [vmem:[%s2701_s11] sm:$0xff]  }
 0xad7   : > { %1824 = vmatpush3.bf16.msra.mxu0 %v1942_v6 }
 0xad8   : > { %v1302_v33 = vsel %vm596_vm1, %v1301_v32, 0.0  ;;  %1825 = vmatprep.subr.bf16.mxu0 %v2187_v0 }
 0xad9   : > { %1303 = vadd.xlane.f32.xlu1 %v1302_v33 }
 0xadb   : > { %1826 = vmatpush3.bf16.msra.mxu0 %v1943_v41 }
 0xadc   : > { %1827 = vmatprep.subr.bf16.mxu0 %v2187_v0 }
 0xadf   : > { %1828 = vmatpush3.bf16.msra.mxu0 %v1944_v52 }
 0xae0   : > { %1829 = vmatprep.subr.bf16.mxu0 %v2187_v0  ;;  %v1688_v0 = vld [vmem:[%s2702_s12] ss:$0 sm:$0xff] }
 0xae3   : > { %1830 = vmatpush3.bf16.msra.mxu0 %v1945_v53 }
 0xb66   : > { %v1304_v34 = vpop.xlane.xlu1 %1303 }
 0xb67   : > { %v1306_v35 = vmul.f32 0.03125, %v1304_v34 }
 0xb69   : > { %v1307_v36 = vsub.f32 %v1301_v32, %v1306_v35 }
 0xb6b   : > { %v1308_v37 = vmul.f32 %v1307_v36, %v1307_v36 }
 0xb6d   : > { %v1309_v38 = vsel %vm596_vm1, %v1308_v37, 0.0 }
 0xb6e   : > { %1310 = vadd.xlane.f32.xlu1 %v1309_v38 }
 0xbfb   : > { %v1311_v42 = vpop.xlane.xlu1 %1310 }
 0xbfc   : > { %v1312_v43 = vmul.f32 0.03125, %v1311_v42 }
 0xbfe   : > { %v1313_v44 = vadd.f32 1e-05, %v1312_v43 }
 0xc00   : > { %1962 = vrsqrt.f32 %v1313_v44 }
 0xc0a   : > { %v1963_v45 = vpop.eup %1962 }
 0xc0b   : > { %v1315_v47 = vmul.f32 %v1963_v45, %v1307_v36 }
 0xc0d   : > { %v1323_v49 = vmul.f32 %v1682_v46, %v1315_v47 }
 0xc0f   : > { %v1331_v50 = vadd.f32 %v1683_v48, %v1323_v49 }
 0xc11   : > { %v1332_v51 = vpack.c.bf16 %v1331_v50, %v1331_v50 }
 0xc13   : > { %1820 = vmatmul.mubr.msk.bf16.vlgmr.msra.gmra.mrb[28].mxu1 %vm596_vm1, %v1332_v51 }
 0xce6   : > { %v1393_v55 = vpop.f32.mrb[28].mxu1 }
 0xce7   : > { %v1394_v56 = vadd.f32 %v1684_v54, %v1393_v55  ;;  %v1821_v57 = vpop.f32.mrb[29].mxu1 }
 0xce8   : > { %v1396_v58 = vpop.f32.mrb[30].mxu1 }
 0xce9   : > { %v1399_v59 = vmax.f32 %v1394_v56, 0.0  ;;  %v1822_v60 = vpop.f32.mrb[31].mxu1 }
 0xceb   : > { %v1400_v61 = vpack.c.bf16 %v1399_v59, %v1399_v59 }
 0xced   : > { %1832 = vmatmul.mubr.msk.bf16.vlgmr.msra.gmra.mrb[24].mxu0 %vm1440_vm4, %v1400_v61 }
 0xdc0   : > { %v1478_v62 = vpop.f32.mrb[24].mxu0 }
 0xdc1   : > { %v1479_v63 = vadd.f32 %v1688_v0, %v1478_v62  ;;  %v1833_v1 = vpop.f32.mrb[25].mxu0 }
 0xdc2   : > { %v1481_v2 = vpop.f32.mrb[26].mxu0 }
 0xdc3   : > { %v1834_v3 = vpop.f32.mrb[27].mxu0  ;;  %v1484_v4 = vadd.f32 %v1479_v63, %v1331_v50 }
 0xdc5   : > { %v1485_v5 = vsel %vm596_vm1, %v1484_v4, 0.0 }
 0xdc6   : > { %1486 = vadd.xlane.f32.xlu1 %v1485_v5 }
 0xe53   : > { %v1487_v7 = vpop.xlane.xlu1 %1486 }
 0xe54   : > { %v1488_v8 = vmul.f32 0.03125, %v1487_v7 }
 0xe56   : > { %v1489_v26 = vsub.f32 %v1484_v4, %v1488_v8 }
 0xe58   : > { %v1490_v13 = vmul.f32 %v1489_v26, %v1489_v26 }
 0xe5a   : > { %v1491_v9 = vsel %vm596_vm1, %v1490_v13, 0.0 }
 0xe5b   : > { %1492 = vadd.xlane.f32.xlu1 %v1491_v9 }
 0xee8   : > { %v1493_v10 = vpop.xlane.xlu1 %1492 }
 0xee9   : > { %v1494_v11 = vmul.f32 0.03125, %v1493_v10 }
 0xeeb   : > { %v1495_v12 = vadd.f32 1e-05, %v1494_v11 }
 0xeed   : > { %1964 = vrsqrt.f32 %v1495_v12 }
 0xef7   : > { %v1965_v14 = vpop.eup %1964 }
 0xef8   : > { %v1497_v16 = vmul.f32 %v1965_v14, %v1489_v26 }
 0xefa   : > { %v1505_v18 = vmul.f32 %v1694_v15, %v1497_v16 }
 0xefc   : > { %v1513_v19 = vadd.f32 %v1695_v17, %v1505_v18 }
 0xefe   : > { %v1514_v20 = vpack.c.bf16 %v1513_v19, %v1513_v19 }
 0xf00   : > { %1516 = vst.msk [vmem:[%s559_s18] sm:$0xf] %vm1515_vm5, %v1514_v20 }
 0xf01   : > { %2119 = shalt.err (!%p2116_p1)
}
 0xf02   : > { %s2120_s21 = scalar_lea.hbm %s2648_s28, 64  ;;  %s2124_s24 = scalar_lea.hbm %s2744_s29, 128 }
 0xf03   : > { %p2121_p0 = scmp.ne.s32.totalorder %s2648_s28, %s2120_s21  ;;  %p2125_p9 = scmp.lt.u32.totalorder %s2648_s28, %s2744_s29 }
 0xf04   : > { %p2126_p12 = scmp.lt.u32.totalorder %s2124_s24, %s2120_s21  ;;  %p2128_p2 = scmp.lt.u32.totalorder %s2120_s21, %s2648_s28 }
 0xf05   : > { %p2122_p6 = pnand %p2121_p0, %p2745_p3 }
 0xf06   : > { %p2127_p10 = por %p2126_p12, %p2125_p9 }
 0xf07   : > { %p2123_p5 = pneg %p2122_p6 }
 0xf08   : > { %p2129_p4 = por %p2128_p2, %p2127_p10 }
 0xf0a   : > { %p2130_p7 = pnand %p2129_p4, %p2123_p5 }
 0xf0c   : > { %2133 = shalt.err (!%p2130_p7)
}
 0xf0d   : > { %1855 = dma.vmem_to_hbm [thread:$0]  (%p2745_p3), %s2650_s17, 64, %s2648_s28, %s1518_s26  }
 0xf0e PF: > { %s2746_s14 = sld [smem:[#allocation18_spill]]  ;;  %s2747_s20 = sld [smem:[#allocation16_spill]] }
 0xf0f   : > { %s2748_s23 = sld [smem:[#allocation22_spill]] }
 0xf14   : > { %p1887_p8 = scmp.ge.s32.totalorder %s2746_s14, 2  ;;  %s1543_s22 = sand.u32 1, %s2747_s20  }
 0xf15   : > { %p2749_p11 = scmp.ne.s32.totalorder %s2748_s23, 0  ;;  %s1544_s30 = scalar_lea.sflag [#allocation4], %s1543_s22 }
 0xf17   : > { %p1874_p13 = pnand %p1887_p8, %p2749_p11 }
 0xf19   : > { %2163 = dma.done.wait (!%p1874_p13), %s1544_s30, 64  }
 0xf1a   : > { %2165 = vsyncadd (!%p1874_p13), %s1544_s30, 4294967232  ;;  %s2750_s21 = sld [smem:[#allocation19_spill]]  ;;  %s2751_s15 = sld [smem:[#allocation17_spill]] }
 0xf1b   : > { %s2752_s20 = sld [smem:[#allocation20_spill]]  ;;  %s2753_s18 = smov %s2172_s19 }
 0xf20   : > { %p28_p1 = scmp.ge.s32.totalorder %s2750_s21, 4   ;;  %s2754_s19 = smov %s2751_s15 }
 0xf22   :  { %30 = sbr.rel (!%p28_p1) target bundleno = 10 (0xa), region = 139 }
 0xf29   :  { %1549 = vsyncpa [#allocation3], 1 }
 0xf2a   :  { %1551 = vsyncpa [#allocation3 + $0x1], 1 }
 0xf2b   :  { %1552 = vsyncpa [#allocation6], 1 }
 0xf2c   :  { %1553 = vsyncpa [#allocation9], 1 }
 0xf2d   :  { %1554 = vsyncpa [#allocation4], 1 }
 0xf2e   :  { %1556 = vsyncpa [#allocation4 + $0x1], 1 }

// kernel: tpu_custom_call.1
= control target key start
LH: loop header
LB: loop body
LE: loop exit
PB: predicated region body
PF: predicated region fallthrough
CT: control target
= control target key end

     0   :  { %s2690_s0 = inlined_call_operand.vmem [shape: f32[2,8,32], index: 0, kind: input, shape index: {}]   ;;  %s2691_s1 = inlined_call_operand.vmem [shape: f32[2,1,8], index: 1, kind: input, shape index: {}]   ;;  %s2692_s2 = inlined_call_operand.hbm [shape: f32[8,32], index: 2, kind: input, shape index: {}]   ;;  %s2693_s3 = inlined_call_operand.vmem [shape: bf16[32,96], index: 3, kind: input, shape index: {}]   ;;  %s2694_s4 = inlined_call_operand.hbm [shape: f32[1,96], index: 4, kind: input, shape index: {}]   ;;  %s2695_s5 = inlined_call_operand.vmem [shape: bf16[32,32], index: 5, kind: input, shape index: {}]   ;;  %s2696_s6 = inlined_call_operand.hbm [shape: f32[1,32], index: 6, kind: input, shape index: {}]   ;;  %s2697_s7 = inlined_call_operand.hbm [shape: f32[1,32], index: 7, kind: input, shape index: {}]   ;;  %s2698_s8 = inlined_call_operand.hbm [shape: f32[1,32], index: 8, kind: input, shape index: {}]   ;;  %s2699_s9 = inlined_call_operand.vmem [shape: bf16[32,64], index: 9, kind: input, shape index: {}]   ;;  %s2700_s10 = inlined_call_operand.vmem [shape: f32[1,64], index: 10, kind: input, shape index: {}]   ;;  %s2701_s11 = inlined_call_operand.vmem [shape: bf16[64,32], index: 11, kind: input, shape index: {}]   ;;  %s2702_s12 = inlined_call_operand.vmem [shape: f32[1,32], index: 12, kind: input, shape index: {}]   ;;  %s2703_s13 = inlined_call_operand.vmem [shape: f32[1,32], index: 13, kind: input, shape index: {}]   ;;  %s2704_s14 = inlined_call_operand.vmem [shape: f32[1,32], index: 14, kind: input, shape index: {}]   ;;  %s2705_s15 = inlined_call_operand.hbm [shape: bf16[2,8,32], index: 15, kind: output, shape index: {}]  }
   0x1   :  { %2718 = sst [smem:[#allocation23_spill]] %s2694_s4 }
   0x2   :  { %2719 = sst [smem:[#allocation24_spill]] %s2704_s14 }
   0x3   :  { %2720 = sst [smem:[#allocation25_spill]] %s2705_s15 }
   0x4   :  { %20 = vsyncpa [#allocation3], 0 }
   0x5   :  { %21 = vsyncpa [#allocation6], 0 }
   0x6   :  { %22 = vsyncpa [#allocation9], 0 }
   0x7   :  { %23 = vsyncpa [#allocation4], 0 }
   0x8   :  { %25 = vsyncpa [#allocation4 + $0x1], 0  ;;  %s2281_s18 = smov 0   ;;  %s2283_s19 = smov 0  }
   0x9   :  { %s2285_s20 = smov 0   ;;  %s2287_s21 = smov 0  }
   0xa LB: > { %2721 = sst [smem:[#allocation16_spill]] %s2168_s18  ;;  %s2302_s22 = sadd.s32 4294967295, %s2180_s21   ;;  %s2180_s21 = sphi %s2287_s21, %s2750_s21   ;;  %s2176_s20 = sphi %s2285_s20, %s2752_s20   ;;  %s2172_s19 = sphi %s2283_s19, %s2754_s19   ;;  %s2168_s18 = sphi %s2281_s18, %s2753_s18  }
   0xb   : > { %2722 = sst [smem:[#allocation17_spill]] %s2176_s20  ;;  %s1649_s23 = sadd.s32 4294967294, %s2180_s21  }
   0xc   : > { %2723 = sst [smem:[#allocation18_spill]] %s2180_s21  ;;  %s2306_s24 = sadd.s32 1, %s2180_s21  }
   0xd   : > { %2724 = sst [smem:[#allocation19_spill]] %s2306_s24  ;;  %s363_s25 = sadd.s32 1, %s2176_s20 }
   0xe   : > { %s360_s26 = ssub.s32 %s2180_s21, %s2306_s24  ;;  %p373_p0 = scmp.ne.s32.totalorder %s2176_s20, %s2172_s19 }
   0xf   : > { %p361_p1 = scmp.eq.s32.totalorder %s360_s26, 0  ;;  %p374_p2 = scmp.eq.s32.totalorder %s2302_s22, 1 }
  0x10   : > { %p379_p3 = scmp.ne.s32.totalorder %s2172_s19, %s2168_s18  ;;  %p380_p4 = scmp.eq.s32.totalorder %s1649_s23, 1 }
  0x11   : > { %s2317_s27 = scalar_select %p361_p1, %s2176_s20, %s363_s25  }
  0x12   : > { %p2319_p5 = por %p374_p2, %p373_p0  ;;  %p2323_p6 = por %p380_p4, %p379_p3 }
  0x13   : > { %2725 = sst [smem:[#allocation20_spill]] %s2317_s27  ;;  %p1650_p7 = scmp.ge.s32.totalorder %s2180_s21, 1 }
  0x14   : > { %s2726_s28 = scalar_select %p2319_p5, 1, 0 }
  0x15   : > { %s2728_s29 = scalar_select %p2323_p6, 1, 0 }
  0x16   : > { %2727 = sst [smem:[#allocation21_spill]] %s2726_s28  ;;  %p387_p8 = scmp.lt.s32.totalorder %s2180_s21, 3 }
  0x17   : > { %2729 = sst [smem:[#allocation22_spill]] %s2728_s29  ;;  %p2713_p9 = scmp.eq.s32.totalorder %s2302_s22, 0 }
  0x18   : > { %p2330_p10 = pnand %p1650_p7, %p387_p8  ;;  %s2182_s16 = smov [#allocation5]  }
  0x19   : > { %s414_s17 = sshll.u32 %s2182_s16, 4  ;;  %s2183_s23 = smov [#allocation8]   ;;  %s415_s17 = int_to_ptr.vmem [resolvable:$true] %s414_s17 }
  0x1a   : > { %s2730_s30 = scalar_select %p2330_p10, 1, 0 }
  0x1b   : > { %p1857_p11 = pneg %p2330_p10  ;;  %s439_s25 = sshll.u32 %s2183_s23, 4  ;;  %s2342_s25 = int_to_ptr.vmem [resolvable:$true] %s439_s25 }
  0x1c   : > { %s2184_s27 = smov [#allocation2]   ;;  %s2732_s4 = sld [smem:[#allocation23_spill]] }
  0x1d   : > { %p2338_p12 = pnand %p2713_p9, %p1857_p11  ;;  %s400_s20 = sshll.u32 %s2184_s27, 4  ;;  %s2344_s20 = int_to_ptr.vmem [resolvable:$true] %s400_s20 }
  0x1f   : > { %p2354_p0 = pneg %p2338_p12 }
  0x22   : > { %s1966_s16 = scalar_lea.hbm %s2732_s4, 16 }
  0x23   : > { %p1967_p13 = scmp.ne.s32.totalorder %s2732_s4, %s1966_s16  ;;  %p1973_p3 = scmp.lt.u32.totalorder %s1966_s16, %s2732_s4 }
  0x25   : > { %p1969_p1 = pnand %p2354_p0, %p1967_p13 }
  0x27   : > { %p1970_p2 = pneg %p1969_p1 }
  0x29   : > { %p1975_p4 = pnand %p1973_p3, %p1970_p2 }
  0x2b   : > { %1978 = shalt.err (!%p1975_p4)
}
  0x2c   : > { %s1979_s24 = scalar_lea.vmem %s415_s17, 16  ;;  %s1986_s18 = scalar_lea.vmem %s415_s17, 32 }
  0x2d   : > { %p1980_p7 = scmp.ne.s32.totalorder %s415_s17, %s1979_s24  ;;  %p1987_p9 = scmp.lt.s32.totalorder %s415_s17, %s415_s17 }
  0x2e   : > { %p1988_p6 = scmp.lt.s32.totalorder %s1986_s18, %s1979_s24 }
  0x2f   : > { %p1982_p8 = pnand %p1980_p7, %p2354_p0 }
  0x30   : > { %p1989_p5 = por %p1988_p6, %p1987_p9 }
  0x31   : > { %p1983_p11 = pneg %p1982_p8 }
  0x33   : > { %p1990_p10 = pnand %p1989_p5, %p1983_p11 }
  0x35   : > { %1993 = shalt.err (!%p1990_p10)
}
  0x36   : > { %1863 = dma.hbm_to_vmem [thread:$0]  (!%p2338_p12), %s2732_s4, 16, %s415_s17, [#allocation6]  }
  0x37   : > { %s1994_s27 = scalar_lea.hbm %s2697_s7, 16 }
  0x38   : > { %p1995_p13 = scmp.ne.s32.totalorder %s2697_s7, %s1994_s27  ;;  %p2001_p5 = scmp.lt.u32.totalorder %s1994_s27, %s2697_s7 }
  0x3a   : > { %p1997_p1 = pnand %p1995_p13, %p2354_p0 }
  0x3c   : > { %p1998_p6 = pneg %p1997_p1 }
  0x3e   : > { %p2003_p9 = pnand %p2001_p5, %p1998_p6 }
  0x40   : > { %2006 = shalt.err (!%p2003_p9)
}
  0x41   : > { %s2007_s17 = scalar_lea.vmem %s2342_s25, 16  ;;  %s2014_s14 = scalar_lea.vmem %s2342_s25, 32 }
  0x42   : > { %p2008_p10 = scmp.ne.s32.totalorder %s2342_s25, %s2007_s17  ;;  %p2015_p4 = scmp.lt.s32.totalorder %s2342_s25, %s2342_s25 }
  0x43   : > { %p2016_p7 = scmp.lt.s32.totalorder %s2014_s14, %s2007_s17 }
  0x44   : > { %p2010_p2 = pnand %p2008_p10, %p2354_p0 }
  0x45   : > { %p2017_p8 = por %p2016_p7, %p2015_p4 }
  0x46   : > { %p2011_p3 = pneg %p2010_p2 }
  0x48   : > { %p2018_p11 = pnand %p2017_p8, %p2011_p3 }
  0x4a   : > { %2021 = shalt.err (!%p2018_p11)
}
  0x4b   : > { %1869 = dma.hbm_to_vmem [thread:$0]  (!%p2338_p12), %s2697_s7, 16, %s2342_s25, [#allocation9]  }
  0x4c   : > { %s2022_s16 = scalar_lea.hbm %s2692_s2, 128 }
  0x4d   : > { %p2023_p13 = scmp.ne.s32.totalorder %s2692_s2, %s2022_s16  ;;  %p2029_p5 = scmp.lt.u32.totalorder %s2022_s16, %s2692_s2 }
  0x4f   : > { %p2025_p1 = pnand %p2023_p13, %p2354_p0 }
  0x51   : > { %p2026_p6 = pneg %p2025_p1 }
  0x53   : > { %p2031_p9 = pnand %p2029_p5, %p2026_p6 }
  0x55   : > { %2034 = shalt.err (!%p2031_p9)
}
  0x56   : > { %s2035_s25 = scalar_lea.vmem %s2344_s20, 128  ;;  %p2043_p4 = scmp.lt.s32.totalorder %s2344_s20, %s2344_s20 }
  0x57   : > { %p2036_p10 = scmp.ne.s32.totalorder %s2344_s20, %s2035_s25  ;;  %p2044_p7 = scmp.lt.s32.totalorder %s2035_s25, %s2035_s25 }
  0x59   : > { %p2038_p2 = pnand %p2036_p10, %p2354_p0  ;;  %p2045_p8 = por %p2044_p7, %p2043_p4 }
  0x5b   : > { %p2039_p3 = pneg %p2038_p2 }
  0x5d   : > { %p2046_p11 = pnand %p2045_p8, %p2039_p3 }
  0x5f   : > { %2049 = shalt.err (!%p2046_p11)
}
  0x60   : > { %1860 = dma.hbm_to_vmem [thread:$0]  (!%p2338_p12), %s2692_s2, 128, %s2344_s20, [#allocation3]  }
  0x61   : > { %s2185_s21 = smov [#allocation7]   ;;  %s2186_s15 = smov [#allocation10]  }
  0x62   : > { %s428_s29 = sshll.u32 %s2185_s21, 4  ;;  %s450_s16 = sshll.u32 %s2186_s15, 4  ;;  %s429_s29 = int_to_ptr.vmem [resolvable:$true] %s428_s29  ;;  %s451_s16 = int_to_ptr.vmem [resolvable:$true] %s450_s16 }
  0x63   : > { %s2050_s18 = scalar_lea.hbm %s2696_s6, 16 }
  0x64   : > { %p2051_p13 = scmp.ne.s32.totalorder %s2696_s6, %s2050_s18  ;;  %p2057_p5 = scmp.lt.u32.totalorder %s2050_s18, %s2696_s6 }
  0x66   : > { %p2053_p1 = pnand %p2051_p13, %p2354_p0 }
  0x68   : > { %p2054_p6 = pneg %p2053_p1 }
  0x6a   : > { %p2059_p9 = pnand %p2057_p5, %p2054_p6 }
  0x6c   : > { %2062 = shalt.err (!%p2059_p9)
}
  0x6d   : > { %s2063_s20 = scalar_lea.vmem %s429_s29, 16  ;;  %s2070_s28 = scalar_lea.vmem %s429_s29, 32 }
  0x6e   : > { %p2064_p10 = scmp.ne.s32.totalorder %s429_s29, %s2063_s20  ;;  %p2071_p4 = scmp.lt.s32.totalorder %s429_s29, %s429_s29 }
  0x6f   : > { %p2072_p7 = scmp.lt.s32.totalorder %s2070_s28, %s2063_s20 }
  0x70   : > { %p2066_p2 = pnand %p2064_p10, %p2354_p0 }
  0x71   : > { %p2073_p8 = por %p2072_p7, %p2071_p4 }
  0x72   : > { %p2067_p3 = pneg %p2066_p2 }
  0x74   : > { %p2074_p11 = pnand %p2073_p8, %p2067_p3 }
  0x76   : > { %2077 = shalt.err (!%p2074_p11)
}
  0x77   : > { %1866 = dma.hbm_to_vmem [thread:$0]  (!%p2338_p12), %s2696_s6, 16, %s429_s29, [#allocation6]  }
  0x78   : > { %s2078_s24 = scalar_lea.hbm %s2698_s8, 16 }
  0x79   : > { %p2079_p13 = scmp.ne.s32.totalorder %s2698_s8, %s2078_s24  ;;  %p2085_p5 = scmp.lt.u32.totalorder %s2078_s24, %s2698_s8 }
  0x7b   : > { %p2081_p1 = pnand %p2079_p13, %p2354_p0 }
  0x7d   : > { %p2082_p6 = pneg %p2081_p1 }
  0x7f   : > { %p2087_p9 = pnand %p2085_p5, %p2082_p6 }
  0x81   : > { %2090 = shalt.err (!%p2087_p9)
}
  0x82   : > { %s2091_s20 = scalar_lea.vmem %s451_s16, 16  ;;  %s2098_s29 = scalar_lea.vmem %s451_s16, 32 }
  0x83   : > { %p2092_p10 = scmp.ne.s32.totalorder %s451_s16, %s2091_s20  ;;  %p2099_p4 = scmp.lt.s32.totalorder %s451_s16, %s451_s16 }
  0x84   : > { %p2100_p7 = scmp.lt.s32.totalorder %s2098_s29, %s2091_s20 }
  0x85   : > { %p2094_p2 = pnand %p2092_p10, %p2354_p0 }
  0x86   : > { %p2101_p8 = por %p2100_p7, %p2099_p4 }
  0x87   : > { %p2095_p3 = pneg %p2094_p2 }
  0x89   : > { %p2102_p11 = pnand %p2101_p8, %p2095_p3 }
  0x8b   : > { %2105 = shalt.err (!%p2102_p11)
}
  0x8c   : > { %1872 = dma.hbm_to_vmem [thread:$0]  (!%p2338_p12), %s2698_s8, 16, %s451_s16, [#allocation9]  }
  0x8d   : > { %p2734_p13 = scmp.ne.s32.totalorder %s2730_s30, 0 }
  0x8e   : > { %p2735_p1 = scmp.eq.s32.totalorder (!%p2734_p13), %s2302_s22, 0 }
  0x8f   : > { %494 = sbr.rel (%p2734_p13) target bundleno = 3854 (0xf0e), region = 80 }
  0x96   : > { %2151 = dma.done.wait (%p2735_p1), [#allocation3], 128   ;;  %p2736_p0 = pmov %p2735_p1 }
  0x98   : > { %2153 = vsyncadd (%p2736_p0), [#allocation3], 4294967168  ;;  %p2737_p6 = pmov %p2736_p0 }
  0x99   : > { %p2738_p5 = pmov %p2736_p0 }
  0x9a   : > { %2155 = dma.done.wait (%p2737_p6), [#allocation6], 32  }
  0x9b   : > { %2157 = vsyncadd (%p2738_p5), [#allocation6], 4294967264  ;;  %p2739_p9 = pmov %p2736_p0 }
  0x9c   : > { %p2740_p12 = pmov %p2736_p0 }
  0x9d   : > { %2159 = dma.done.wait (%p2739_p9), [#allocation9], 32  }
  0x9e   : > { %2161 = vsyncadd (%p2740_p12), [#allocation9], 4294967264  ;;  %p560_p10 = scmp.lt.s32.totalorder %s2302_s22, 1  ;;  %v2187_v0 = vmov 0.0   ;;  %vm2188_vm0 = vmmov 0   ;;  %v1938_v1 = vld [vmem:[%s2693_s3] sm:$0xff]   ;;  %v696_v20 = vlaneseq }
  0x9f   : > { %1735 = vmatprep.subr.bf16.mxu1 %v2187_v0  ;;  %1739 = vmatprep.mubr.msk.bf16.mxu1 %vm2188_vm0, %v2187_v0  ;;  %v1939_v2 = vld [vmem:[%s2693_s3 + $0x8] sm:$0xff]   ;;  %v570_v4 = vld [vmem:[#allocation2] sm:$0xff]  ;;  %vm596_vm1 = vcmask 261120   ;;  %s2189_s17 = smov 120   ;;  %s2190_s25 = smov 96   ;;  %vm647_vm2 = vcmask 64512  }
  0xa0   : > { %s2472_s30 = scalar_select %p560_p10, %s2302_s22, 1  ;;  %1749 = vmatprep.subr.bf16.mxu0 %v2187_v0  ;;  %1751 = vmatprep.mubr.msk.bf16.mxu0 %vm2188_vm0, %v2187_v0  ;;  %v1665_v8 = vld [vmem:[#allocation5] ss:$0 sm:$0xff]  ;;  %v697_v23 = vshrl.u32 %v696_v20, 7  ;;  %vm719_vm3 = vcmask 1043456   ;;  %vm1440_vm4 = vcmask 523264  }
  0xa1   : > { %1736 = vmatpush3.bf16.msra.mxu1 %v1938_v1  ;;  %s2191_s14 = smov 88   ;;  %s2192_s21 = smov 64   ;;  %v764_v63 = vld [vmem:[%s2695_s5] sm:$0xf]  ;;  %vm1515_vm5 = vcmask 257024  }
  0xa2   : > { %s1664_s26 = sshll.u32 %s2472_s30, 3  ;;  %1737 = vmatprep.subr.bf16.mxu1 %v2187_v0  ;;  %s566_s28 = scalar_lea.vmem %s2691_s1, %s2472_s30  ;;  %v698_v25 = vsub.s32 0, %v697_v23  ;;  %v929_v1 = vsel %vm719_vm3, %v764_v63, 0 }
  0xa3   : > { %s563_s15 = scalar_lea.vmem %s2690_s0, %s1664_s26  ;;  %v641_v21 = vld [vmem:[%s566_s28] sm:$0x1]  ;;  %s2193_s30 = smov 56  }
  0xa4   : > { %v568_v3 = vld [vmem:[%s563_s15] sm:$0xff]  ;;  %v642_v22 = vsub.f32 1.0, %v641_v21  ;;  %s2194_s26 = smov 112   ;;  %s2195_s23 = smov 80  }
  0xa5   : > { %v569_v5 = vmul.f32 5.656854, %v568_v3  ;;  %1738 = vmatpush3.bf16.msra.mxu1 %v1939_v2  ;;  %v878_v2 = vld [vmem:[%s2695_s5 + $0x4] sm:$0xf]  ;;  %s2196_s24 = smov 72   ;;  %s2197_s18 = smov 104  }
  0xa6   : > { %1743 = vmatprep.subr.bf16.mxu1 %v2187_v0  ;;  %v643_v24 = vmul.f32 -1e+09, %v642_v22  ;;  %v883_v3 = vsel %vm719_vm3, %v878_v2, 0  ;;  %s2199_s20 = smov 40   ;;  %s2741_s16 = sld [smem:[#allocation21_spill]] }
  0xa7   : > { %v2488_v6 = vadd.f32 %v570_v4, %v569_v5  ;;  %s2742_s27 = sld [smem:[#allocation24_spill]] }
  0xa8   : > { %v2516_v26 = vrot.slane %v643_v24, %v698_v25 }
  0xa9   : > { %v572_v7 = vpack.c.bf16 %v2488_v6, %v2488_v6 }
  0xab   : > { %1740 = vmatmul.mubr.msk.bf16.vlgmr.msra.gmra.mrb[0].mxu1 %vm596_vm1, %v572_v7 }
  0xac   : > { %1745 = vmatprep.mubr.msk.bf16.mxu1 %vm2188_vm0, %v2187_v0  ;;  %p2745_p3 = scmp.ne.s32.totalorder %s2741_s16, 0 }
 0x17e   : > { %v634_v9 = vpop.f32.mrb[0].mxu1 }
 0x17f   : > { %v635_v10 = vadd.f32 %v1665_v8, %v634_v9  ;;  %v1741_v11 = vpop.f32.mrb[1].mxu1 }
 0x180   : > { %v637_v12 = vpop.f32.mrb[2].mxu1 }
 0x181   : > { %v2496_v13 = vpack.c.bf16 %v635_v10, %v635_v10  ;;  %v1742_v14 = vpop.f32.mrb[3].mxu1 }
 0x183   : > { %765 = vrot.lane.b32.xlu1 %v2496_v13, %s2189_s17  ;;  %645 = vrot.lane.b32.xlu0 %v2496_v13, %s2190_s25  ;;  %s2198_s17 = smov 48  }
 0x187   : > { %767 = vrot.lane.b32.xlu0 %v2496_v13, %s2191_s14 }
 0x1f5   : > { %v646_v15 = vpop.permute.xlu0 %645  ;;  %v766_v19 = vpop.permute.xlu1 %765 }
 0x1f6   : > { %v652_v16 = vsel %vm647_vm2, %v646_v15, 0 }
 0x1f7   : > { %1744 = vmatpush3.bf16.xpose.msra.mxu1 %v652_v16 }
 0x1f8   : > { %1755 = vmatprep.subr.bf16.mxu1 %v2187_v0 }
 0x1f9   : > { %v768_v17 = vpop.permute.xlu0 %767 }
 0x1fa   : > { %v773_v18 = vsel %vm647_vm2, %v768_v17, 0 }
 0x1fe   : > { %1746 = vmatmul.mubr.msk.bf16.vlgmr.msra.gmra.mrb[4].mxu1 %vm647_vm2, %v2496_v13 }
 0x1ff   : > { %1756 = vmatpush3.bf16.xpose.msra.mxu1 %v773_v18  ;;  %1757 = vmatprep.mubr.msk.bf16.mxu1 %vm2188_vm0, %v2187_v0 }
 0x200   : > { %1767 = vmatprep.subr.bf16.mxu1 %v2187_v0 }
 0x206   : > { %1758 = vmatmul.mubr.msk.bf16.vlgmr.msra.gmra.mrb[8].mxu1 %vm647_vm2, %v766_v19 }
 0x207   : > { %1769 = vmatprep.mubr.msk.bf16.mxu1 %vm2188_vm0, %v2187_v0  ;;  %1768 = vmatpush3.bf16.msra.mxu1 %v883_v3 }
 0x208   : > { %1779 = vmatprep.subr.bf16.mxu1 %v2187_v0 }
 0x2d1   : > { %v688_v27 = vpop.f32.mrb[4].mxu1 }
 0x2d2   : > { %v694_v28 = vmul.f32 0.35355338, %v688_v27  ;;  %v1747_v29 = vpop.f32.mrb[5].mxu1 }
 0x2d3   : > { %v691_v30 = vpop.f32.mrb[6].mxu1 }
 0x2d4   : > { %v1748_v31 = vpop.f32.mrb[7].mxu1  ;;  %v701_v32 = vadd.f32 %v2516_v26, %v694_v28 }
 0x2d6   : > { %v702_v33 = vsel %vm647_vm2, %v701_v32, -inf }
 0x2d7   : > { %703 = vmax.xlane.f32.xlu1 %v702_v33 }
 0x2d9   : > { %v809_v34 = vpop.f32.mrb[8].mxu1 }
 0x2da   : > { %v815_v35 = vmul.f32 0.35355338, %v809_v34  ;;  %v1759_v36 = vpop.f32.mrb[9].mxu1 }
 0x2db   : > { %v812_v37 = vpop.f32.mrb[10].mxu1 }
 0x2dc   : > { %v1760_v38 = vpop.f32.mrb[11].mxu1  ;;  %v816_v39 = vadd.f32 %v815_v35, %v2516_v26 }
 0x2de   : > { %v817_v40 = vsel %vm647_vm2, %v816_v39, -inf }
 0x2df   : > { %818 = vmax.xlane.f32.xlu0 %v817_v40 }
 0x364   : > { %v704_v41 = vpop.xlane.xlu1 %703 }
 0x365   : > { %v705_v42 = vsub.f32 %v701_v32, %v704_v41 }
 0x367   : > { %v706_v43 = vmul.f32 1.442695, %v705_v42 }
 0x369   : > { %1946 = vpow2.f32 %v706_v43 }
 0x36c   : > { %v819_v44 = vpop.xlane.xlu0 %818 }
 0x36d   : > { %v820_v45 = vsub.f32 %v816_v39, %v819_v44 }
 0x36f   : > { %v821_v46 = vmul.f32 1.442695, %v820_v45 }
 0x371   : > { %1948 = vpow2.f32 %v821_v46 }
 0x373   : > { %v1947_v47 = vpop.eup %1946 }
 0x374   : > { %v708_v48 = vsel %vm647_vm2, %v1947_v47, 0.0 }
 0x375   : > { %709 = vadd.xlane.f32.xlu0 %v708_v48 }
 0x37b   : > { %v1949_v49 = vpop.eup %1948 }
 0x37c   : > { %v823_v50 = vsel %vm647_vm2, %v1949_v49, 0.0 }
 0x37d   : > { %824 = vadd.xlane.f32.xlu1 %v823_v50  ;;  %v1084_v50 = vld [vmem:[%s2695_s5 + $0x8] sm:$0xf] }
 0x38b   : > { %714 = vrot.lane.b32.xlu0 %v2496_v13, %s2192_s21  ;;  %s557_s21 = sand.u32 1, %s2172_s19  }
 0x38e   : > { %829 = vrot.lane.b32.xlu1 %v2496_v13, %s2193_s30  ;;  %s1663_s30 = sshll.u32 %s557_s21, 2 }
 0x38f   : > { %971 = vrot.lane.b32.xlu0 %v2496_v13, %s2194_s26  ;;  %s1518_s26 = scalar_lea.sflag [#allocation4], %s557_s21 }
 0x392   : > { %973 = vrot.lane.b32.xlu1 %v2496_v13, %s2195_s23 }
 0x402   : > { %v710_v51 = vpop.xlane.xlu0 %709 }
 0x403   : > { %1950 = vrcp.f32 %v710_v51  ;;  %v1089_v51 = vsel %vm719_vm3, %v1084_v50, 0 }
 0x406   : > { %v715_v52 = vpop.permute.xlu0 %714 }
 0x407   : > { %v721_v53 = vsel %vm719_vm3, %v715_v52, 0 }
 0x408   : > { %1750 = vmatpush3.bf16.msra.mxu0 %v721_v53 }
 0x409   : > { %1761 = vmatprep.subr.bf16.mxu0 %v2187_v0 }
 0x40a   : > { %v825_v54 = vpop.xlane.xlu1 %824  ;;  %v972_v18 = vpop.permute.xlu0 %971 }
 0x40b   : > { %1952 = vrcp.f32 %v825_v54 }
 0x40d   : > { %v1951_v55 = vpop.eup %1950 }
 0x40e   : > { %v712_v56 = vmul.f32 %v1951_v55, %v1947_v47  ;;  %v830_v57 = vpop.permute.xlu1 %829 }
 0x40f   : > { %v835_v59 = vsel %vm719_vm3, %v830_v57, 0 }
 0x410   : > { %v713_v58 = vpack.c.bf16 %v712_v56, %v712_v56 }
 0x412   : > { %1752 = vmatmul.mubr.msk.bf16.vlgmr.msra.gmra.mrb[0].mxu0 %vm647_vm2, %v713_v58  ;;  %v974_v10 = vpop.permute.xlu1 %973 }
 0x413   : > { %1762 = vmatpush3.bf16.msra.mxu0 %v835_v59  ;;  %1763 = vmatprep.mubr.msk.bf16.mxu0 %vm2188_vm0, %v2187_v0  ;;  %v979_v16 = vsel %vm647_vm2, %v974_v10, 0 }
 0x414   : > { %1773 = vmatprep.subr.bf16.mxu0 %v2187_v0 }
 0x415   : > { %v1953_v60 = vpop.eup %1952 }
 0x416   : > { %v827_v61 = vmul.f32 %v1953_v60, %v1949_v49 }
 0x418   : > { %v828_v62 = vpack.c.bf16 %v827_v61, %v827_v61 }
 0x41a   : > { %1764 = vmatmul.mubr.msk.bf16.vlgmr.msra.gmra.mrb[4].mxu0 %vm647_vm2, %v828_v62 }
 0x41b   : > { %1775 = vmatprep.mubr.msk.bf16.mxu0 %vm2188_vm0, %v2187_v0  ;;  %1774 = vmatpush3.bf16.msra.mxu0 %v929_v1 }
 0x41c   : > { %1785 = vmatprep.subr.bf16.mxu0 %v2187_v0 }
 0x4e5   : > { %v757_v4 = vpop.f32.mrb[0].mxu0 }
 0x4e6   : > { %v763_v5 = vpack.c.bf16 %v757_v4, %v757_v4  ;;  %v1753_v7 = vpop.f32.mrb[1].mxu0 }
 0x4e7   : > { %v760_v8 = vpop.f32.mrb[2].mxu0 }
 0x4e8   : > { %v1754_v9 = vpop.f32.mrb[3].mxu0  ;;  %1776 = vmatmul.mubr.msk.bf16.vlgmr.msra.gmra.mrb[8].mxu0 %vm647_vm2, %v763_v5 }
 0x4e9   : > { %1787 = vmatprep.mubr.msk.bf16.mxu0 %vm2188_vm0, %v2187_v0 }
 0x4ed   : > { %v871_v11 = vpop.f32.mrb[4].mxu0 }
 0x4ee   : > { %v877_v12 = vpack.c.bf16 %v871_v11, %v871_v11  ;;  %v1765_v14 = vpop.f32.mrb[5].mxu0 }
 0x4ef   : > { %v874_v15 = vpop.f32.mrb[6].mxu0 }
 0x4f0   : > { %v1766_v17 = vpop.f32.mrb[7].mxu0  ;;  %1770 = vmatmul.mubr.msk.bf16.vlgmr.msra.gmra.mrb[12].mxu1 %vm647_vm2, %v877_v12 }
 0x4f1   : > { %1780 = vmatpush3.bf16.xpose.msra.mxu1 %v979_v16  ;;  %1781 = vmatprep.mubr.msk.bf16.mxu1 %vm2188_vm0, %v2187_v0 }
 0x4f2   : > { %1791 = vmatprep.subr.bf16.mxu1 %v2187_v0 }
 0x4f8   : > { %1782 = vmatmul.mubr.msk.bf16.vlgmr.msra.gmra.mrb[16].mxu1 %vm647_vm2, %v972_v18 }
 0x4f9   : > { %1793 = vmatprep.mubr.msk.bf16.mxu1 %vm2188_vm0, %v2187_v0  ;;  %1792 = vmatpush3.bf16.msra.mxu1 %v1089_v51 }
 0x4fa   : > { %1803 = vmatprep.subr.bf16.mxu1 %v2187_v0 }
 0x5bb   : > { %v965_v19 = vpop.f32.mrb[8].mxu0 }
 0x5bc   : > { %v1777_v20 = vpop.f32.mrb[9].mxu0 }
 0x5bd   : > { %v968_v21 = vpop.f32.mrb[10].mxu0 }
 0x5be   : > { %v1778_v22 = vpop.f32.mrb[11].mxu0 }
 0x5c3   : > { %v919_v23 = vpop.f32.mrb[12].mxu1 }
 0x5c4   : > { %v2559_v24 = vadd.f32 %v965_v19, %v919_v23  ;;  %v1771_v25 = vpop.f32.mrb[13].mxu1 }
 0x5c5   : > { %v922_v27 = vpop.f32.mrb[14].mxu1  ;;  %v1681_v25 = vld [vmem:[#allocation7] ss:$0 sm:$0xff] }
 0x5c6   : > { %v1772_v28 = vpop.f32.mrb[15].mxu1 }
 0x5cb   : > { %v1015_v29 = vpop.f32.mrb[16].mxu1 }
 0x5cc   : > { %v1021_v30 = vmul.f32 0.35355338, %v1015_v29  ;;  %v1783_v31 = vpop.f32.mrb[17].mxu1 }
 0x5cd   : > { %v1018_v32 = vpop.f32.mrb[18].mxu1 }
 0x5ce   : > { %v1784_v33 = vpop.f32.mrb[19].mxu1  ;;  %v1022_v34 = vadd.f32 %v1021_v30, %v2516_v26 }
 0x5d0   : > { %v1023_v35 = vsel %vm647_vm2, %v1022_v34, -inf }
 0x5d1   : > { %1024 = vmax.xlane.f32.xlu1 %v1023_v35 }
 0x5e2   : > { %1134 = vrot.lane.b32.xlu1 %v2496_v13, %s2196_s24  ;;  %s1697_s24 = sshll.u32 %s2302_s22, 6  ;;  %s2200_s22 = smov [#allocation11]  }
 0x5e6   : > { %1132 = vrot.lane.b32.xlu1 %v2496_v13, %s2197_s18  ;;  %s559_s18 = scalar_lea.vmem [#allocation11], %s1663_s30  ;;  %s2110_s30 = sshll.u32 %s2200_s22, 4  ;;  %s2111_s30 = int_to_ptr.vmem [resolvable:$false] %s2110_s30 }
 0x5e7   : > { %s2112_s15 = scalar_lea.vmem %s2111_s30, 128 }
 0x65e   : > { %v1025_v36 = vpop.xlane.xlu1 %1024 }
 0x65f   : > { %v1026_v37 = vsub.f32 %v1022_v34, %v1025_v36 }
 0x661   : > { %v1027_v38 = vmul.f32 1.442695, %v1026_v37 }
 0x662   : > { %v1135_v46 = vpop.permute.xlu1 %1134 }
 0x663   : > { %1954 = vpow2.f32 %v1027_v38  ;;  %v1140_v48 = vsel %vm647_vm2, %v1135_v46, 0  ;;  %v1682_v46 = vld [vmem:[#allocation8] ss:$0 sm:$0xff] }
 0x666   : > { %v1133_v49 = vpop.permute.xlu1 %1132 }
 0x66d   : > { %v1955_v39 = vpop.eup %1954 }
 0x66e   : > { %v1029_v40 = vsel %vm647_vm2, %v1955_v39, 0.0 }
 0x66f   : > { %1030 = vadd.xlane.f32.xlu0 %v1029_v40  ;;  %v1941_v40 = vld [vmem:[%s2699_s9 + $0x8] sm:$0xff]  }
 0x685   : > { %1035 = vrot.lane.b32.xlu0 %v2496_v13, %s2198_s17  ;;  %s1531_s17 = sshll.u32 %s559_s18, 4  ;;  %s2650_s17 = int_to_ptr.vmem [resolvable:$true] %s1531_s17 }
 0x686   : > { %s2106_s23 = scalar_lea.vmem %s2650_s17, 64  ;;  %p2113_p8 = scmp.lt.s32.totalorder %s2650_s17, %s2111_s30 }
 0x687   : > { %p2107_p2 = scmp.ne.s32.totalorder %s2650_s17, %s2106_s23  ;;  %p2114_p11 = scmp.lt.s32.totalorder %s2112_s15, %s2106_s23 }
 0x689   : > { %p2108_p4 = pnand %p2107_p2, %p2745_p3  ;;  %p2115_p13 = por %p2114_p11, %p2113_p8 }
 0x68b   : > { %p2109_p7 = pneg %p2108_p4 }
 0x68d   : > { %p2116_p1 = pnand %p2115_p13, %p2109_p7 }
 0x6fc   : > { %v1031_v41 = vpop.xlane.xlu0 %1030 }
 0x6fd   : > { %1956 = vrcp.f32 %v1031_v41  ;;  %v1943_v41 = vld [vmem:[%s2701_s11 + $0x8] sm:$0xff]  }
 0x700   : > { %v1036_v42 = vpop.permute.xlu0 %1035 }
 0x701   : > { %v1041_v43 = vsel %vm719_vm3, %v1036_v42, 0 }
 0x702   : > { %1786 = vmatpush3.bf16.msra.mxu0 %v1041_v43 }
 0x703   : > { %1797 = vmatprep.subr.bf16.mxu0 %v2187_v0 }
 0x707   : > { %v1957_v44 = vpop.eup %1956 }
 0x708   : > { %v1033_v45 = vmul.f32 %v1957_v44, %v1955_v39  ;;  %v1940_v39 = vld [vmem:[%s2699_s9] sm:$0xff]  }
 0x70a   : > { %v1034_v47 = vpack.c.bf16 %v1033_v45, %v1033_v45 }
 0x70c   : > { %1788 = vmatmul.mubr.msk.bf16.vlgmr.msra.gmra.mrb[12].mxu0 %vm647_vm2, %v1034_v47 }
 0x70d   : > { %1798 = vmatpush3.bf16.xpose.msra.mxu0 %v1140_v48  ;;  %1799 = vmatprep.mubr.msk.bf16.mxu0 %vm2188_vm0, %v2187_v0  ;;  %v1683_v48 = vld [vmem:[#allocation10] ss:$0 sm:$0xff] }
 0x70e   : > { %1809 = vmatprep.subr.bf16.mxu0 %v2187_v0 }
 0x714   : > { %1800 = vmatmul.mubr.msk.bf16.vlgmr.msra.gmra.mrb[16].mxu0 %vm647_vm2, %v1133_v49 }
 0x715   : > { %1811 = vmatprep.mubr.msk.bf16.mxu0 %vm2188_vm0, %v2187_v0 }
 0x7df   : > { %v1077_v52 = vpop.f32.mrb[12].mxu0 }
 0x7e0   : > { %v1083_v53 = vpack.c.bf16 %v1077_v52, %v1077_v52  ;;  %v1789_v54 = vpop.f32.mrb[13].mxu0  ;;  %v1944_v52 = vld [vmem:[%s2701_s11 + $0x10] sm:$0xff]  }
 0x7e1   : > { %v1080_v55 = vpop.f32.mrb[14].mxu0  ;;  %v1684_v54 = vld [vmem:[%s2700_s10] ss:$0 sm:$0xff] }
 0x7e2   : > { %v1790_v56 = vpop.f32.mrb[15].mxu0  ;;  %1794 = vmatmul.mubr.msk.bf16.vlgmr.msra.gmra.mrb[20].mxu1 %vm647_vm2, %v1083_v53  ;;  %v1945_v53 = vld [vmem:[%s2701_s11 + $0x18] sm:$0xff]  }
 0x7e3   : > { %1805 = vmatprep.mubr.msk.bf16.mxu1 %vm2188_vm0, %v2187_v0 }
 0x7e7   : > { %v1176_v57 = vpop.f32.mrb[16].mxu0 }
 0x7e8   : > { %v1182_v58 = vmul.f32 0.35355338, %v1176_v57  ;;  %v1801_v59 = vpop.f32.mrb[17].mxu0 }
 0x7e9   : > { %v1179_v60 = vpop.f32.mrb[18].mxu0 }
 0x7ea   : > { %v1802_v61 = vpop.f32.mrb[19].mxu0  ;;  %v1183_v62 = vadd.f32 %v1182_v58, %v2516_v26  ;;  %v1245_v26 = vld [vmem:[%s2695_s5 + $0xc] sm:$0xf] }
 0x7ec   : > { %v1184_v63 = vsel %vm647_vm2, %v1183_v62, -inf }
 0x7ed   : > { %1185 = vmax.xlane.f32.xlu0 %v1184_v63 }
 0x803   : > { %1196 = vrot.lane.b32.xlu0 %v2496_v13, %s2199_s20  ;;  %v1250_v13 = vsel %vm719_vm3, %v1245_v26, 0  ;;  %s2743_s20 = sld [smem:[#allocation25_spill]] }
 0x804   : > { %1810 = vmatpush3.bf16.msra.mxu0 %v1250_v13 }
 0x805   : > { %1823 = vmatprep.subr.bf16.mxu0 %v2187_v0 }
 0x809   : > { %s2744_s29 = smov %s2743_s20  ;;  %s2648_s28 = scalar_lea.hbm %s2743_s20, %s1697_s24 }
 0x87a   : > { %v1186_v1 = vpop.xlane.xlu0 %1185 }
 0x87b   : > { %v1187_v2 = vsub.f32 %v1183_v62, %v1186_v1 }
 0x87d   : > { %v1188_v3 = vmul.f32 1.442695, %v1187_v2 }
 0x87e   : > { %v1197_v4 = vpop.permute.xlu0 %1196 }
 0x87f   : > { %1958 = vpow2.f32 %v1188_v3  ;;  %v1202_v5 = vsel %vm719_vm3, %v1197_v4, 0 }
 0x880   : > { %1804 = vmatpush3.bf16.msra.mxu1 %v1202_v5 }
 0x881   : > { %1815 = vmatprep.subr.bf16.mxu1 %v2187_v0 }
 0x889   : > { %v1959_v7 = vpop.eup %1958 }
 0x88a   : > { %v1190_v8 = vsel %vm647_vm2, %v1959_v7, 0.0 }
 0x88b   : > { %1191 = vadd.xlane.f32.xlu1 %v1190_v8 }
 0x8b5   : > { %v1125_v9 = vpop.f32.mrb[20].mxu1 }
 0x8b6   : > { %v1131_v10 = vadd.f32 %v1125_v9, %v2559_v24  ;;  %v1795_v11 = vpop.f32.mrb[21].mxu1 }
 0x8b7   : > { %v1128_v12 = vpop.f32.mrb[22].mxu1 }
 0x8b8   : > { %v1796_v14 = vpop.f32.mrb[23].mxu1 }
 0x918   : > { %v1192_v15 = vpop.xlane.xlu1 %1191 }
 0x919   : > { %1960 = vrcp.f32 %v1192_v15  ;;  %v1694_v15 = vld [vmem:[%s2703_s13] ss:$0 sm:$0xff] }
 0x923   : > { %v1961_v16 = vpop.eup %1960 }
 0x924   : > { %v1194_v17 = vmul.f32 %v1961_v16, %v1959_v7 }
 0x926   : > { %v1195_v18 = vpack.c.bf16 %v1194_v17, %v1194_v17  ;;  %v1695_v17 = vld [vmem:[%s2742_s27] ss:$0 sm:$0xff] }
 0x928   : > { %1806 = vmatmul.mubr.msk.bf16.vlgmr.msra.gmra.mrb[24].mxu1 %vm647_vm2, %v1195_v18 }
 0x929   : > { %1819 = vmatprep.mubr.msk.bf16.mxu1 %vm2188_vm0, %v2187_v0  ;;  %1816 = vmatpush3.bf16.msra.mxu1 %v1940_v39 }
 0x92a   : > { %1817 = vmatprep.subr.bf16.mxu1 %v2187_v0 }
 0x92d   : > { %1818 = vmatpush3.bf16.msra.mxu1 %v1941_v40 }
 0x9fb   : > { %v1238_v19 = vpop.f32.mrb[24].mxu1 }
 0x9fc   : > { %v1244_v20 = vpack.c.bf16 %v1238_v19, %v1238_v19  ;;  %v1807_v21 = vpop.f32.mrb[25].mxu1 }
 0x9fd   : > { %v1241_v22 = vpop.f32.mrb[26].mxu1 }
 0x9fe   : > { %v1808_v23 = vpop.f32.mrb[27].mxu1  ;;  %1812 = vmatmul.mubr.msk.bf16.vlgmr.msra.gmra.mrb[20].mxu0 %vm647_vm2, %v1244_v20 }
 0x9ff   : > { %1831 = vmatprep.mubr.msk.bf16.mxu0 %vm2188_vm0, %v2187_v0 }
 0xad1   : > { %v1286_v24 = vpop.f32.mrb[20].mxu0 }
 0xad2   : > { %v1292_v27 = vadd.f32 %v1286_v24, %v1131_v10  ;;  %v1813_v28 = vpop.f32.mrb[21].mxu0 }
 0xad3   : > { %v1289_v29 = vpop.f32.mrb[22].mxu0 }
 0xad4   : > { %v1300_v30 = vadd.f32 %v1681_v25, %v1292_v27  ;;  %v1814_v31 = vpop.f32.mrb[23].mxu0 }
 0xad6   : > { %v1301_v32 = vadd.f32 %v1300_v30, %v2488_v6  ;;  %v1942_v6 = vld [vmem:[%s2701_s11] sm:$0xff]  }
 0xad7   : > { %1824 = vmatpush3.bf16.msra.mxu0 %v1942_v6 }
 0xad8   : > { %v1302_v33 = vsel %vm596_vm1, %v1301_v32, 0.0  ;;  %1825 = vmatprep.subr.bf16.mxu0 %v2187_v0 }
 0xad9   : > { %1303 = vadd.xlane.f32.xlu1 %v1302_v33 }
 0xadb   : > { %1826 = vmatpush3.bf16.msra.mxu0 %v1943_v41 }
 0xadc   : > { %1827 = vmatprep.subr.bf16.mxu0 %v2187_v0 }
 0xadf   : > { %1828 = vmatpush3.bf16.msra.mxu0 %v1944_v52 }
 0xae0   : > { %1829 = vmatprep.subr.bf16.mxu0 %v2187_v0  ;;  %v1688_v0 = vld [vmem:[%s2702_s12] ss:$0 sm:$0xff] }
 0xae3   : > { %1830 = vmatpush3.bf16.msra.mxu0 %v1945_v53 }
 0xb66   : > { %v1304_v34 = vpop.xlane.xlu1 %1303 }
 0xb67   : > { %v1306_v35 = vmul.f32 0.03125, %v1304_v34 }
 0xb69   : > { %v1307_v36 = vsub.f32 %v1301_v32, %v1306_v35 }
 0xb6b   : > { %v1308_v37 = vmul.f32 %v1307_v36, %v1307_v36 }
 0xb6d   : > { %v1309_v38 = vsel %vm596_vm1, %v1308_v37, 0.0 }
 0xb6e   : > { %1310 = vadd.xlane.f32.xlu1 %v1309_v38 }
 0xbfb   : > { %v1311_v42 = vpop.xlane.xlu1 %1310 }
 0xbfc   : > { %v1312_v43 = vmul.f32 0.03125, %v1311_v42 }
 0xbfe   : > { %v1313_v44 = vadd.f32 1e-05, %v1312_v43 }
 0xc00   : > { %1962 = vrsqrt.f32 %v1313_v44 }
 0xc0a   : > { %v1963_v45 = vpop.eup %1962 }
 0xc0b   : > { %v1315_v47 = vmul.f32 %v1963_v45, %v1307_v36 }
 0xc0d   : > { %v1323_v49 = vmul.f32 %v1682_v46, %v1315_v47 }
 0xc0f   : > { %v1331_v50 = vadd.f32 %v1683_v48, %v1323_v49 }
 0xc11   : > { %v1332_v51 = vpack.c.bf16 %v1331_v50, %v1331_v50 }
 0xc13   : > { %1820 = vmatmul.mubr.msk.bf16.vlgmr.msra.gmra.mrb[28].mxu1 %vm596_vm1, %v1332_v51 }
 0xce6   : > { %v1393_v55 = vpop.f32.mrb[28].mxu1 }
 0xce7   : > { %v1394_v56 = vadd.f32 %v1684_v54, %v1393_v55  ;;  %v1821_v57 = vpop.f32.mrb[29].mxu1 }
 0xce8   : > { %v1396_v58 = vpop.f32.mrb[30].mxu1 }
 0xce9   : > { %v1399_v59 = vmax.f32 %v1394_v56, 0.0  ;;  %v1822_v60 = vpop.f32.mrb[31].mxu1 }
 0xceb   : > { %v1400_v61 = vpack.c.bf16 %v1399_v59, %v1399_v59 }
 0xced   : > { %1832 = vmatmul.mubr.msk.bf16.vlgmr.msra.gmra.mrb[24].mxu0 %vm1440_vm4, %v1400_v61 }
 0xdc0   : > { %v1478_v62 = vpop.f32.mrb[24].mxu0 }
 0xdc1   : > { %v1479_v63 = vadd.f32 %v1688_v0, %v1478_v62  ;;  %v1833_v1 = vpop.f32.mrb[25].mxu0 }
 0xdc2   : > { %v1481_v2 = vpop.f32.mrb[26].mxu0 }
 0xdc3   : > { %v1834_v3 = vpop.f32.mrb[27].mxu0  ;;  %v1484_v4 = vadd.f32 %v1479_v63, %v1331_v50 }
 0xdc5   : > { %v1485_v5 = vsel %vm596_vm1, %v1484_v4, 0.0 }
 0xdc6   : > { %1486 = vadd.xlane.f32.xlu1 %v1485_v5 }
 0xe53   : > { %v1487_v7 = vpop.xlane.xlu1 %1486 }
 0xe54   : > { %v1488_v8 = vmul.f32 0.03125, %v1487_v7 }
 0xe56   : > { %v1489_v26 = vsub.f32 %v1484_v4, %v1488_v8 }
 0xe58   : > { %v1490_v13 = vmul.f32 %v1489_v26, %v1489_v26 }
 0xe5a   : > { %v1491_v9 = vsel %vm596_vm1, %v1490_v13, 0.0 }
 0xe5b   : > { %1492 = vadd.xlane.f32.xlu1 %v1491_v9 }
 0xee8   : > { %v1493_v10 = vpop.xlane.xlu1 %1492 }
 0xee9   : > { %v1494_v11 = vmul.f32 0.03125, %v1493_v10 }
 0xeeb   : > { %v1495_v12 = vadd.f32 1e-05, %v1494_v11 }
 0xeed   : > { %1964 = vrsqrt.f32 %v1495_v12 }
 0xef7   : > { %v1965_v14 = vpop.eup %1964 }
 0xef8   : > { %v1497_v16 = vmul.f32 %v1965_v14, %v1489_v26 }
 0xefa   : > { %v1505_v18 = vmul.f32 %v1694_v15, %v1497_v16 }
 0xefc   : > { %v1513_v19 = vadd.f32 %v1695_v17, %v1505_v18 }
 0xefe   : > { %v1514_v20 = vpack.c.bf16 %v1513_v19, %v1513_v19 }
 0xf00   : > { %1516 = vst.msk [vmem:[%s559_s18] sm:$0xf] %vm1515_vm5, %v1514_v20 }
 0xf01   : > { %2119 = shalt.err (!%p2116_p1)
}
 0xf02   : > { %s2120_s21 = scalar_lea.hbm %s2648_s28, 64  ;;  %s2124_s24 = scalar_lea.hbm %s2744_s29, 128 }
 0xf03   : > { %p2121_p0 = scmp.ne.s32.totalorder %s2648_s28, %s2120_s21  ;;  %p2125_p9 = scmp.lt.u32.totalorder %s2648_s28, %s2744_s29 }
 0xf04   : > { %p2126_p12 = scmp.lt.u32.totalorder %s2124_s24, %s2120_s21  ;;  %p2128_p2 = scmp.lt.u32.totalorder %s2120_s21, %s2648_s28 }
 0xf05   : > { %p2122_p6 = pnand %p2121_p0, %p2745_p3 }
 0xf06   : > { %p2127_p10 = por %p2126_p12, %p2125_p9 }
 0xf07   : > { %p2123_p5 = pneg %p2122_p6 }
 0xf08   : > { %p2129_p4 = por %p2128_p2, %p2127_p10 }
 0xf0a   : > { %p2130_p7 = pnand %p2129_p4, %p2123_p5 }
 0xf0c   : > { %2133 = shalt.err (!%p2130_p7)
}
 0xf0d   : > { %1855 = dma.vmem_to_hbm [thread:$0]  (%p2745_p3), %s2650_s17, 64, %s2648_s28, %s1518_s26  }
 0xf0e PF: > { %s2746_s14 = sld [smem:[#allocation18_spill]]  ;;  %s2747_s20 = sld [smem:[#allocation16_spill]] }
 0xf0f   : > { %s2748_s23 = sld [smem:[#allocation22_spill]] }
 0xf14   : > { %p1887_p8 = scmp.ge.s32.totalorder %s2746_s14, 2  ;;  %s1543_s22 = sand.u32 1, %s2747_s20  }
 0xf15   : > { %p2749_p11 = scmp.ne.s32.totalorder %s2748_s23, 0  ;;  %s1544_s30 = scalar_lea.sflag [#allocation4], %s1543_s22 }
 0xf17   : > { %p1874_p13 = pnand %p1887_p8, %p2749_p11 }
 0xf19   : > { %2163 = dma.done.wait (!%p1874_p13), %s1544_s30, 64  }
 0xf1a   : > { %2165 = vsyncadd (!%p1874_p13), %s1544_s30, 4294967232  ;;  %s2750_s21 = sld [smem:[#allocation19_spill]]  ;;  %s2751_s15 = sld [smem:[#allocation17_spill]] }
 0xf1b   : > { %s2752_s20 = sld [smem:[#allocation20_spill]]  ;;  %s2753_s18 = smov %s2172_s19 }
 0xf20   : > { %p28_p1 = scmp.ge.s32.totalorder %s2750_s21, 4   ;;  %s2754_s19 = smov %s2751_s15 }
 0xf22   :  { %30 = sbr.rel (!%p28_p1) target bundleno = 10 (0xa), region = 139 }
 0xf29   :  { %1549 = vsyncpa [#allocation3], 1 }
 0xf2a   :  { %1551 = vsyncpa [#allocation3 + $0x1], 1 }
 0xf2b   :  { %1552 = vsyncpa [#allocation6], 1 }
 0xf2c   :  { %1553 = vsyncpa [#allocation9], 1 }
 0xf2d   :  { %1554 = vsyncpa [#allocation4], 1 }
 0xf2e   :  { %1556 = vsyncpa [#allocation4 + $0x1], 1 }

</bundles_post_ra>
